<compile_context>
chip_gen: v6e
topology: v6e:2x2x1
jax: 0.10.0
libtpu: 0.0.40
codegen_flags: <defaults>
</compile_context>

<pallas_src>
import jax
import jax.numpy as jnp
import numpy as np
from jax.experimental import pallas as pl
from jax.experimental.pallas import tpu as pltpu

LANE = 128       # last-dim tiling unit
SUBLANE = 8      # second-to-last-dim tiling unit


def _round_up(n, m):
    return ((n + m - 1) // m) * m


def _device_kind():
    try:
        return jax.devices()[0].device_kind.lower()
    except Exception:
        return ""


def _pipeline_mode_supported():
    if not hasattr(pl, "Buffered"):
        return False
    try:
        pl.BlockSpec((8, 128), lambda i, j: (0, 0), pipeline_mode=pl.Buffered(1))
        return True
    except Exception:
        return False


_HAS_BUFFERED = _pipeline_mode_supported()


def _const_spec(shape):
    """BlockSpec for a grid-invariant operand; single-buffered when supported."""
    idx = lambda b, c, hi: tuple(0 for _ in shape)
    if _HAS_BUFFERED:
        return pl.BlockSpec(shape, idx, pipeline_mode=pl.Buffered(1))
    return pl.BlockSpec(shape, idx)


# ----------------------------------------------------------------------------
# Fused kernel: layer-0 input projection (chunk-hoisted) + GRU stack +
# last-valid-step gather + final Linear.  Gate order follows nn.GRU: (r, z, n).
# ----------------------------------------------------------------------------
def _make_gru_stack_kernel(num_layers, time_chunk, Hp, cdt):
    G3 = 3 * Hp
    G4 = 4 * Hp

    def kernel(*refs):
        chunk_hi_ref = refs[0]       # SMEM (n_bsh,) int32: last active chunk
        last_ref = refs[1]           # (Bsh, 1) int32: clamp(lengths-1, 0, T-1)
        x_ref = refs[2]              # (Tc, Bsh, Dp) bf16 raw input chunk
        wih0_ref, bih0_ref, whh0_ref, bhh0_ref = refs[3:7]
        pos = 7
        wu, bu = [], []
        for _ in range(1, num_layers):
            wu.append(refs[pos]); bu.append(refs[pos + 1]); pos += 2
        lin_w_ref, lin_b_ref = refs[pos], refs[pos + 1]
        out_ref = refs[pos + 2]
        h_scr = refs[pos + 3]        # (L, Bsh, Hp) f32 hidden-state carry
        dec_scr = refs[pos + 4]      # (Bsh, Hp) f32 gathered last-step hidden
        gi0_scr = refs[pos + 5]      # (Tc*Bsh, 3Hp) f32 chunk input projection

        b = pl.program_id(0)
        c = pl.program_id(1)
        Bsh = dec_scr.shape[0]
        Dp = x_ref.shape[2]
        hi_b = chunk_hi_ref[b]
        t0 = c * time_chunk

        @pl.when(c <= hi_b)          # skip dead (fully padded) time chunks
        def _active():
            @pl.when(c == 0)
            def _():
                h_scr[...] = jnp.zeros_like(h_scr)
                dec_scr[...] = jnp.zeros_like(dec_scr)

            # ---- layer-0 input projection, hoisted over the whole chunk ----
            x2 = x_ref[...].reshape(time_chunk * Bsh, Dp)
            gi0_scr[...] = (
                jnp.dot(x2, wih0_ref[...], preferred_element_type=jnp.float32)
                + bih0_ref[...])

            # Hoist bias broadcasts out of the (partially unrolled) time loop.
            bhh0_b = jnp.broadcast_to(bhh0_ref[...], (Bsh, G3))
            bu_b = [jnp.broadcast_to(bu[j][...], (Bsh, G4))
                    for j in range(num_layers - 1)]

            last = last_ref[...]                      # (Bsh, 1) int32

            def step(i, carry):
                hs, dec = carry
                new_hs = []
                # --- layer 0: x-proj precomputed; one (Bsh,Hp)x(Hp,3Hp) dot ---
                row0 = pl.multiple_of(i * Bsh, SUBLANE)
                gi = gi0_scr[pl.ds(row0, Bsh), :]
                gh = jnp.dot(hs[0].astype(cdt), whh0_ref[...],
                             preferred_element_type=jnp.float32) + bhh0_b
                r = jax.nn.sigmoid(gi[:, :Hp] + gh[:, :Hp])
                z = jax.nn.sigmoid(gi[:, Hp:2 * Hp] + gh[:, Hp:2 * Hp])
                n = jnp.tanh(gi[:, 2 * Hp:] + r * gh[:, 2 * Hp:])
                new_hs.append(n + z * (hs[0] - n))
                # --- upper layers: single (Bsh,2Hp)x(2Hp,4Hp) fused dot ------
                for l in range(1, num_layers):
                    cat = jnp.concatenate(
                        [new_hs[l - 1].astype(cdt), hs[l].astype(cdt)], axis=1)
                    g = jnp.dot(cat, wu[l - 1][...],
                                preferred_element_type=jnp.float32) + bu_b[l - 1]
                    r = jax.nn.sigmoid(g[:, :Hp])
                    z = jax.nn.sigmoid(g[:, Hp:2 * Hp])
                    n = jnp.tanh(g[:, 2 * Hp:3 * Hp] + r * g[:, 3 * Hp:])
                    new_hs.append(n + z * (hs[l] - n))
                # last-valid-timestep gather kept in VMEM (no (T,B,H) writeback)
                sel = last == (t0 + i)
                dec = jnp.where(sel, new_hs[-1], dec)
                return tuple(new_hs), dec

            hs0 = tuple(h_scr[l] for l in range(num_layers))
            hs_f, dec_f = jax.lax.fori_loop(
                0, time_chunk, step, (hs0, dec_scr[...]),
                unroll=min(8, time_chunk))

            for l in range(num_layers):
                h_scr[l] = hs_f[l]
            dec_scr[...] = dec_f

            # Fused final Linear at this shard's last active chunk; the output
            # block stays resident (constant index over c) until writeback.
            @pl.when(c == hi_b)
            def _():
                out_ref[...] = (
                    jnp.dot(dec_f.astype(cdt), lin_w_ref[...],
                            preferred_element_type=jnp.float32)
                    + lin_b_ref[...])

    return kernel


def _gru_stack(last_t, x_seq, layers, lin_w, lin_b, *, time_chunk, Hp, Op, cdt):
    Tp, Bp, Dp = x_seq.shape
    num_layers = len(layers)
    n_chunks = Tp // time_chunk

    kind = _device_kind()
    is_v7 = "v7" in kind
    # Batch sharding only pays off on v7x (2 TensorCores) with a full-ish M.
    n_bsh = 2 if (is_v7 and Bp % (2 * SUBLANE) == 0 and Bp // 2 >= 128) else 1
    Bsh = Bp // n_bsh

    # Per-shard last active chunk index for the scalar prefetch (skips padding).
    chunk_hi = (jnp.max(last_t.reshape(n_bsh, Bsh), axis=1)
                // time_chunk).astype(jnp.int32)

    inputs = [last_t, x_seq,
              layers[0]["wih"], layers[0]["bih"],
              layers[0]["whh"], layers[0]["bhh"]]
    in_specs = [
        pl.BlockSpec((Bsh, 1), lambda b, c, hi: (b, 0)),
        # clamp to the last active chunk so dead chunks re-use the resident block
        pl.BlockSpec((time_chunk, Bsh, Dp),
                     lambda b, c, hi: (jnp.minimum(c, hi[b]), b, 0)),
        _const_spec(layers[0]["wih"].shape),
        _const_spec(layers[0]["bih"].shape),
        _const_spec(layers[0]["whh"].shape),
        _const_spec(layers[0]["bhh"].shape),
    ]
    for l in range(1, num_layers):
        inputs += [layers[l]["w"], layers[l]["b"]]
        in_specs += [_const_spec(layers[l]["w"].shape),
                     _const_spec(layers[l]["b"].shape)]
    inputs += [lin_w, lin_b]
    in_specs += [_const_spec(lin_w.shape), _const_spec(lin_b.shape)]

    # ---- per-generation VMEM budget --------------------------------------
    def _nbytes(a):
        return int(np.prod(a.shape)) * a.dtype.itemsize

    wbuf = 1 if _HAS_BUFFERED else 2
    weight_bytes = sum(_nbytes(v) for ly in layers for v in ly.values())
    weight_bytes += _nbytes(lin_w) + _nbytes(lin_b)
    stream_bytes = 2 * time_chunk * Bsh * Dp * 2          # x chunk, bf16, 2 bufs
    scratch_bytes = 4 * (num_layers * Bsh * Hp + Bsh * Hp
                         + time_chunk * Bsh * 3 * Hp)
    out_bytes = 2 * Bsh * Op * 4
    est = wbuf * weight_bytes + stream_bytes + scratch_bytes + out_bytes
    cap = (56 if is_v7 else 100) * 1024 * 1024
    vmem_limit = int(min(cap, max(4 * est, 32 * 1024 * 1024)))

    kernel = _make_gru_stack_kernel(num_layers, time_chunk, Hp, cdt)
    return pl.pallas_call(
        kernel,
        out_shape=jax.ShapeDtypeStruct((Bp, Op), jnp.float32),
        grid_spec=pltpu.PrefetchScalarGridSpec(
            num_scalar_prefetch=1,
            grid=(n_bsh, n_chunks),
            in_specs=in_specs,
            out_specs=pl.BlockSpec((Bsh, Op), lambda b, c, hi: (b, 0)),
            scratch_shapes=[
                pltpu.VMEM((num_layers, Bsh, Hp), jnp.float32),
                pltpu.VMEM((Bsh, Hp), jnp.float32),
                pltpu.VMEM((time_chunk * Bsh, 3 * Hp), jnp.float32),
            ]),
        compiler_params=pltpu.CompilerParams(
            dimension_semantics=("parallel", "arbitrary"),
            vmem_limit_bytes=vmem_limit),
    )(chunk_hi, *inputs)


# ----------------------------------------------------------------------------
# Parameter init (logical shapes per nn.GRU / nn.Linear) and packing:
# gate fusion, upper-layer K-concat fusion, zero padding to lane multiples,
# bf16 weight cast (f32 biases / accumulation).
# ----------------------------------------------------------------------------
def init_params(key, input_dim, hidden_dim, output_dim, num_layers):
    H = hidden_dim
    scale = 1.0 / np.sqrt(H)
    gru_params = []
    for layer in range(num_layers):
        din = input_dim if layer == 0 else H
        key, k1, k2, k3, k4 = jax.random.split(key, 5)
        # PyTorch stores weight_ih as (3H, din); we store transposed, per gate.
        wih = jax.random.uniform(k1, (3, din, H), jnp.float32, -scale, scale)
        whh = jax.random.uniform(k2, (3, H, H), jnp.float32, -scale, scale)
        bih = jax.random.uniform(k3, (3, 1, H), jnp.float32, -scale, scale)
        bhh = jax.random.uniform(k4, (3, 1, H), jnp.float32, -scale, scale)
        gru_params.append((wih, whh, bih, bhh))
    key, k5, k6 = jax.random.split(key, 3)
    lin_w = jax.random.uniform(k5, (H, output_dim), jnp.float32, -scale, scale)
    lin_b = jax.random.uniform(k6, (1, output_dim), jnp.float32, -scale, scale)
    return gru_params, lin_w, lin_b


def pack_params(gru_params, lin_w, lin_b, compute_dtype=jnp.bfloat16):
    H = gru_params[0][1].shape[-1]
    O = lin_w.shape[-1]
    Hp = _round_up(H, LANE)
    Op = _round_up(O, LANE)

    def pad_w(w, rows_p):                 # (rows, H) -> (rows_p, Hp)
        return jnp.pad(w, ((0, rows_p - w.shape[0]), (0, Hp - H)))

    def pad_b(b):                         # (1, H) -> (1, Hp)
        return jnp.pad(b, ((0, 0), (0, Hp - H)))

    layers = []
    # ---- layer 0: gate-fused (Dp,3Hp) x-proj + (Hp,3Hp) h-proj -------------
    wih0, whh0, bih0, bhh0 = gru_params[0]
    Din0 = wih0.shape[1]
    Dp = _round_up(Din0, LANE)
    layers.append(dict(
        wih=jnp.concatenate([pad_w(wih0[g], Dp) for g in range(3)],
                            axis=1).astype(compute_dtype),
        whh=jnp.concatenate([pad_w(whh0[g], Hp) for g in range(3)],
                            axis=1).astype(compute_dtype),
        bih=jnp.concatenate([pad_b(bih0[g]) for g in range(3)],
                            axis=1).astype(jnp.float32),
        bhh=jnp.concatenate([pad_b(bhh0[g]) for g in range(3)],
                            axis=1).astype(jnp.float32),
    ))
    # ---- upper layers: one (2Hp, 4Hp) matmul per step.
    # Columns = [pre_r | pre_z | gi_n | gh_n]; rows = [x-part ; h-part].
    zeros_w = jnp.zeros((Hp, Hp), jnp.float32)
    for (wih, whh, bih, bhh) in gru_params[1:]:
        x_rows = jnp.concatenate(
            [pad_w(wih[0], Hp), pad_w(wih[1], Hp), pad_w(wih[2], Hp), zeros_w],
            axis=1)
        h_rows = jnp.concatenate(
            [pad_w(whh[0], Hp), pad_w(whh[1], Hp), zeros_w, pad_w(whh[2], Hp)],
            axis=1)
        w = jnp.concatenate([x_rows, h_rows], axis=0).astype(compute_dtype)
        b = jnp.concatenate(
            [pad_b(bih[0] + bhh[0]), pad_b(bih[1] + bhh[1]),
             pad_b(bih[2]), pad_b(bhh[2])], axis=1).astype(jnp.float32)
        layers.append(dict(w=w, b=b))

    lin_w_p = jnp.pad(lin_w, ((0, Hp - H), (0, Op - O))).astype(compute_dtype)
    lin_b_p = jnp.pad(lin_b, ((0, 0), (0, Op - O))).astype(jnp.float32)
    return dict(layers=layers, lin_w=lin_w_p, lin_b=lin_b_p,
                H=H, O=O, Hp=Hp, Op=Op, Dp=Dp, dtype=compute_dtype)


def build_forward(packed, time_chunk=32):
    layers = packed["layers"]
    lin_w, lin_b = packed["lin_w"], packed["lin_b"]
    O, Hp, Op, Dp = packed["O"], packed["Hp"], packed["Op"], packed["Dp"]
    cdt = packed["dtype"]

    @jax.jit
    def forward(x, lengths):
        B, T, Din = x.shape
        Bp = _round_up(max(B, SUBLANE), SUBLANE)
        tc = min(time_chunk, T)
        Tp = _round_up(T, tc)
        # batch-first -> time-major, zero-pad, stream in bf16 (no gi0 HBM trip).
        x_seq = jnp.transpose(x, (1, 0, 2)).astype(jnp.float32)
        x_seq = jnp.pad(x_seq, ((0, Tp - T), (0, Bp - B), (0, Dp - Din)))
        x_seq = x_seq.astype(cdt)
        # lengths must be >= 1 (as in PyTorch); clamp against T for safety.
        last = jnp.clip(lengths.astype(jnp.int32) - 1, 0, T - 1)
        last_t = jnp.pad(last, (0, Bp - B)).reshape(Bp, 1)
        out_p = _gru_stack(last_t, x_seq, layers, lin_w, lin_b,
                           time_chunk=tc, Hp=Hp, Op=Op, cdt=cdt)
        return out_p[:B, :O]

    return forward


# ----------------------------------------------------------------------------
# Pure-JAX reference (lax.scan GRU) with the same bf16-matmul / f32-gate math.
# ----------------------------------------------------------------------------
def reference_forward(x, lengths, gru_params, lin_w, lin_b, compute_dtype):
    cdt = compute_dtype
    x_seq = jnp.transpose(x, (1, 0, 2)).astype(jnp.float32)
    h_seq = x_seq
    for (wih, whh, bih, bhh) in gru_params:
        B = h_seq.shape[1]
        H = whh.shape[-1]

        def step(h, x_t, wih=wih, whh=whh, bih=bih, bhh=bhh):
            def gi(g):
                return jnp.dot(x_t.astype(cdt), wih[g].astype(cdt),
                               preferred_element_type=jnp.float32) + bih[g]

            def gh(g):
                return jnp.dot(h.astype(cdt), whh[g].astype(cdt),
                               preferred_element_type=jnp.float32) + bhh[g]

            r = jax.nn.sigmoid(gi(0) + gh(0))
            z = jax.nn.sigmoid(gi(1) + gh(1))
            n = jnp.tanh(gi(2) + r * gh(2))
            h_new = (1.0 - z) * n + z * h
            return h_new, h_new

        _, h_seq = jax.lax.scan(step, jnp.zeros((B, H), jnp.float32), h_seq)

    B = x.shape[0]
    decoded = h_seq[lengths - 1, jnp.arange(B), :]
    return (jnp.dot(decoded.astype(cdt), lin_w.astype(cdt),
                    preferred_element_type=jnp.float32) + lin_b)


if __name__ == "__main__":
    input_dim, hidden_dim, output_dim, num_layers = 16, 32, 8, 2
    B, T = 2, 8

    key = jax.random.PRNGKey(0)
    key, kx = jax.random.split(key)
    x = jax.random.normal(kx, (B, T, input_dim), jnp.float32)
    lengths = jnp.array([8, 5], dtype=jnp.int32)   # must be >= 1 (as in PyTorch)

    gru_params, lin_w, lin_b = init_params(
        key, input_dim, hidden_dim, output_dim, num_layers)

    compute_dtype = jnp.bfloat16   # MXU inputs; gates/accumulation stay f32
    packed = pack_params(gru_params, lin_w, lin_b, compute_dtype)
    forward = build_forward(packed, time_chunk=32)

    out = jax.block_until_ready(forward(x, lengths))
    ref = jax.block_until_ready(
        reference_forward(x, lengths, gru_params, lin_w, lin_b, compute_dtype))

    assert out.shape == (B, output_dim), out.shape
    np.testing.assert_allclose(np.asarray(out), np.asarray(ref),
                               rtol=1e-2, atol=1e-2)
    print("KERNEL_OK")
</pallas_src>

<mosaic_0001>
module attributes {stable_mosaic.version = 11 : i64} {
  func.func @kernel(%arg0: i32, %arg1: i32, %arg2: memref<1xi32, #tpu.memory_space<smem>>, %arg3: memref<8x1xi32, #tpu.memory_space<vmem>>, %arg4: memref<8x8x128xbf16, #tpu.memory_space<vmem>>, %arg5: memref<128x384xbf16, #tpu.memory_space<vmem>>, %arg6: memref<1x384xf32, #tpu.memory_space<vmem>>, %arg7: memref<128x384xbf16, #tpu.memory_space<vmem>>, %arg8: memref<1x384xf32, #tpu.memory_space<vmem>>, %arg9: memref<256x512xbf16, #tpu.memory_space<vmem>>, %arg10: memref<1x512xf32, #tpu.memory_space<vmem>>, %arg11: memref<128x128xbf16, #tpu.memory_space<vmem>>, %arg12: memref<1x128xf32, #tpu.memory_space<vmem>>, %arg13: memref<8x128xf32, #tpu.memory_space<vmem>>, %arg14: memref<2x8x128xf32, #tpu.memory_space<vmem>>, %arg15: memref<8x128xf32, #tpu.memory_space<vmem>>, %arg16: memref<64x384xf32, #tpu.memory_space<vmem>>) attributes {dimension_semantics = [#tpu.dimension_semantics<parallel>, #tpu.dimension_semantics<arbitrary>], iteration_bounds = array<i64: 1, 1>, scalar_prefetch = 1 : i64, scratch_operands = 3 : i64, tpu.core_type = #tpu.core_type<tc>, window_params = [{transform_indices = @transform_0, window_bounds = array<i64: 8, 1>}, {transform_indices = @transform_1, window_bounds = array<i64: 8, 8, 128>}, {pipeline_mode = #tpu.pipeline_mode<synchronous>, transform_indices = @transform_2, window_bounds = array<i64: 128, 384>}, {pipeline_mode = #tpu.pipeline_mode<synchronous>, transform_indices = @transform_3, window_bounds = array<i64: 1, 384>}, {pipeline_mode = #tpu.pipeline_mode<synchronous>, transform_indices = @transform_4, window_bounds = array<i64: 128, 384>}, {pipeline_mode = #tpu.pipeline_mode<synchronous>, transform_indices = @transform_5, window_bounds = array<i64: 1, 384>}, {pipeline_mode = #tpu.pipeline_mode<synchronous>, transform_indices = @transform_6, window_bounds = array<i64: 256, 512>}, {pipeline_mode = #tpu.pipeline_mode<synchronous>, transform_indices = @transform_7, window_bounds = array<i64: 1, 512>}, {pipeline_mode = #tpu.pipeline_mode<synchronous>, transform_indices = @transform_8, window_bounds = array<i64: 128, 128>}, {pipeline_mode = #tpu.pipeline_mode<synchronous>, transform_indices = @transform_9, window_bounds = array<i64: 1, 128>}, {transform_indices = @transform_10, window_bounds = array<i64: 8, 128>}]} {
    %0 = arith.index_cast %arg0 : i32 to index
    %1 = memref.load %arg2[%0] : memref<1xi32, #tpu.memory_space<smem>>
    %c8_i32 = arith.constant 8 : i32
    %2 = arith.muli %arg1, %c8_i32 : i32
    %3 = arith.cmpi sle, %arg1, %1 : i32
    %4 = arith.extui %3 : i1 to i32
    %c0_i32 = arith.constant 0 : i32
    %5 = arith.cmpi ne, %4, %c0_i32 : i32
    scf.if %5 {
      %c0_i32_0 = arith.constant 0 : i32
      %6 = arith.cmpi eq, %arg1, %c0_i32_0 : i32
      %7 = arith.extui %6 : i1 to i32
      %c0_i32_1 = arith.constant 0 : i32
      %8 = arith.cmpi ne, %7, %c0_i32_1 : i32
      scf.if %8 {
        %cst_130 = arith.constant 0.000000e+00 : f32
        %551 = vector.broadcast %cst_130 : f32 to vector<2x8x128xf32>
        %c0_131 = arith.constant 0 : index
        %c0_132 = arith.constant 0 : index
        %c0_133 = arith.constant 0 : index
        %552 = vector.load %arg14[%c0_131, %c0_132, %c0_133] : memref<2x8x128xf32, #tpu.memory_space<vmem>>, vector<2x8x128xf32>
        tpu.vector_store %arg14[%c0_131, %c0_132, %c0_133], %551 {strides = array<i32>} : memref<2x8x128xf32, #tpu.memory_space<vmem>>, vector<2x8x128xf32>,
        %cst_134 = arith.constant 0.000000e+00 : f32
        %553 = vector.broadcast %cst_134 : f32 to vector<8x128xf32>
        %c0_135 = arith.constant 0 : index
        %c0_136 = arith.constant 0 : index
        %554 = vector.load %arg15[%c0_135, %c0_136] : memref<8x128xf32, #tpu.memory_space<vmem>>, vector<8x128xf32>
        tpu.vector_store %arg15[%c0_135, %c0_136], %553 {strides = array<i32>} : memref<8x128xf32, #tpu.memory_space<vmem>>, vector<8x128xf32>,
      } else {
      }
      %c0 = arith.constant 0 : index
      %c0_2 = arith.constant 0 : index
      %c0_3 = arith.constant 0 : index
      %9 = vector.load %arg4[%c0, %c0_2, %c0_3] : memref<8x8x128xbf16, #tpu.memory_space<vmem>>, vector<8x8x128xbf16>
      %10 = vector.shape_cast %9 : vector<8x8x128xbf16> to vector<64x128xbf16>
      %c0_4 = arith.constant 0 : index
      %c0_5 = arith.constant 0 : index
      %11 = vector.load %arg5[%c0_4, %c0_5] : memref<128x384xbf16, #tpu.memory_space<vmem>>, vector<128x384xbf16>
      %cst = arith.constant dense<0.000000e+00> : vector<64x384xf32>
      %12 = tpu.matmul %10, %11, %cst {dimension_numbers = #tpu.dot_dimension_numbers<[1], [0], [0], [1], [0, 0, 1, 1], [], []>} : vector<64x128xbf16>, vector<128x384xbf16>, vector<64x384xf32> -> vector<64x384xf32>
      %c0_6 = arith.constant 0 : index
      %c0_7 = arith.constant 0 : index
      %13 = vector.load %arg6[%c0_6, %c0_7] : memref<1x384xf32, #tpu.memory_space<vmem>>, vector<1x384xf32>
      %14 = vector.broadcast %13 : vector<1x384xf32> to vector<64x384xf32>
      %15 = arith.addf %12, %14 : vector<64x384xf32>
      %c0_8 = arith.constant 0 : index
      %c0_9 = arith.constant 0 : index
      %16 = vector.load %arg16[%c0_8, %c0_9] : memref<64x384xf32, #tpu.memory_space<vmem>>, vector<64x384xf32>
      tpu.vector_store %arg16[%c0_8, %c0_9], %15 {strides = array<i32>} : memref<64x384xf32, #tpu.memory_space<vmem>>, vector<64x384xf32>,
      %c0_10 = arith.constant 0 : index
      %c0_11 = arith.constant 0 : index
      %17 = vector.load %arg8[%c0_10, %c0_11] : memref<1x384xf32, #tpu.memory_space<vmem>>, vector<1x384xf32>
      %18 = vector.shape_cast %17 : vector<1x384xf32> to vector<1x384xf32>
      %19 = vector.broadcast %18 : vector<1x384xf32> to vector<8x384xf32>
      %c0_12 = arith.constant 0 : index
      %c0_13 = arith.constant 0 : index
      %20 = vector.load %arg10[%c0_12, %c0_13] : memref<1x512xf32, #tpu.memory_space<vmem>>, vector<1x512xf32>
      %21 = vector.shape_cast %20 : vector<1x512xf32> to vector<1x512xf32>
      %22 = vector.broadcast %21 : vector<1x512xf32> to vector<8x512xf32>
      %c0_14 = arith.constant 0 : index
      %c0_15 = arith.constant 0 : index
      %23 = vector.load %arg3[%c0_14, %c0_15] : memref<8x1xi32, #tpu.memory_space<vmem>>, vector<8x1xi32>
      %c0_16 = arith.constant 0 : index
      %c0_17 = arith.constant 0 : index
      %c0_18 = arith.constant 0 : index
      %24 = vector.load %arg14[%c0_16, %c0_17, %c0_18] : memref<2x8x128xf32, #tpu.memory_space<vmem>>, vector<1x8x128xf32>
      %25 = vector.shape_cast %24 : vector<1x8x128xf32> to vector<8x128xf32>
      %c1 = arith.constant 1 : index
      %c0_19 = arith.constant 0 : index
      %c0_20 = arith.constant 0 : index
      %26 = vector.load %arg14[%c1, %c0_19, %c0_20] : memref<2x8x128xf32, #tpu.memory_space<vmem>>, vector<1x8x128xf32>
      %27 = vector.shape_cast %26 : vector<1x8x128xf32> to vector<8x128xf32>
      %c0_21 = arith.constant 0 : index
      %c0_22 = arith.constant 0 : index
      %28 = vector.load %arg15[%c0_21, %c0_22] : memref<8x128xf32, #tpu.memory_space<vmem>>, vector<8x128xf32>
      %c0_i32_23 = arith.constant 0 : i32
      %c8_i32_24 = arith.constant 8 : i32
      %29 = arith.muli %c0_i32_23, %c8_i32_24 : i32
      %30 = tpu.assume_multiple %29, 8 : i32
      %31 = arith.index_cast %30 : i32 to index
      %c0_25 = arith.constant 0 : index
      %32 = vector.load %arg16[%31, %c0_25] : memref<64x384xf32, #tpu.memory_space<vmem>>, vector<8x384xf32>
      %33 = arith.truncf %25 : vector<8x128xf32> to vector<8x128xbf16>
      %c0_26 = arith.constant 0 : index
      %c0_27 = arith.constant 0 : index
      %34 = vector.load %arg7[%c0_26, %c0_27] : memref<128x384xbf16, #tpu.memory_space<vmem>>, vector<128x384xbf16>
      %cst_28 = arith.constant dense<0.000000e+00> : vector<8x384xf32>
      %35 = tpu.matmul %33, %34, %cst_28 {dimension_numbers = #tpu.dot_dimension_numbers<[1], [0], [0], [1], [0, 0, 1, 1], [], []>} : vector<8x128xbf16>, vector<128x384xbf16>, vector<8x384xf32> -> vector<8x384xf32>
      %36 = arith.addf %35, %19 : vector<8x384xf32>
      %37 = vector.extract_strided_slice %32 {offsets = [0, 0], sizes = [8, 128], strides = [1, 1]} : vector<8x384xf32> to vector<8x128xf32>
      %38 = vector.extract_strided_slice %36 {offsets = [0, 0], sizes = [8, 128], strides = [1, 1]} : vector<8x384xf32> to vector<8x128xf32>
      %39 = arith.addf %37, %38 : vector<8x128xf32>
      %40 = arith.negf %39 : vector<8x128xf32>
      %41 = math.exp %40 : vector<8x128xf32>
      %cst_29 = arith.constant 1.000000e+00 : f32
      %42 = vector.broadcast %cst_29 : f32 to vector<8x128xf32>
      %43 = arith.addf %42, %41 : vector<8x128xf32>
      %44 = arith.divf %42, %43 : vector<8x128xf32>
      %45 = vector.extract_strided_slice %32 {offsets = [0, 128], sizes = [8, 128], strides = [1, 1]} : vector<8x384xf32> to vector<8x128xf32>
      %46 = vector.extract_strided_slice %36 {offsets = [0, 128], sizes = [8, 128], strides = [1, 1]} : vector<8x384xf32> to vector<8x128xf32>
      %47 = arith.addf %45, %46 : vector<8x128xf32>
      %48 = arith.negf %47 : vector<8x128xf32>
      %49 = math.exp %48 : vector<8x128xf32>
      %cst_30 = arith.constant 1.000000e+00 : f32
      %50 = vector.broadcast %cst_30 : f32 to vector<8x128xf32>
      %51 = arith.addf %50, %49 : vector<8x128xf32>
      %52 = arith.divf %50, %51 : vector<8x128xf32>
      %53 = vector.extract_strided_slice %32 {offsets = [0, 256], sizes = [8, 128], strides = [1, 1]} : vector<8x384xf32> to vector<8x128xf32>
      %54 = vector.extract_strided_slice %36 {offsets = [0, 256], sizes = [8, 128], strides = [1, 1]} : vector<8x384xf32> to vector<8x128xf32>
      %55 = arith.mulf %44, %54 : vector<8x128xf32>
      %56 = arith.addf %53, %55 : vector<8x128xf32>
      %57 = math.tanh %56 : vector<8x128xf32>
      %58 = arith.subf %25, %57 : vector<8x128xf32>
      %59 = arith.mulf %52, %58 : vector<8x128xf32>
      %60 = arith.addf %57, %59 : vector<8x128xf32>
      %61 = arith.truncf %60 : vector<8x128xf32> to vector<8x128xbf16>
      %62 = arith.truncf %27 : vector<8x128xf32> to vector<8x128xbf16>
      %63 = tpu.concatenate %61, %62 in 1 : vector<8x128xbf16>, vector<8x128xbf16> -> vector<8x256xbf16>
      %c0_31 = arith.constant 0 : index
      %c0_32 = arith.constant 0 : index
      %64 = vector.load %arg9[%c0_31, %c0_32] : memref<256x512xbf16, #tpu.memory_space<vmem>>, vector<256x512xbf16>
      %cst_33 = arith.constant dense<0.000000e+00> : vector<8x512xf32>
      %65 = tpu.matmul %63, %64, %cst_33 {dimension_numbers = #tpu.dot_dimension_numbers<[1], [0], [0], [1], [0, 0, 1, 1], [], []>} : vector<8x256xbf16>, vector<256x512xbf16>, vector<8x512xf32> -> vector<8x512xf32>
      %66 = arith.addf %65, %22 : vector<8x512xf32>
      %67 = vector.extract_strided_slice %66 {offsets = [0, 0], sizes = [8, 128], strides = [1, 1]} : vector<8x512xf32> to vector<8x128xf32>
      %68 = arith.negf %67 : vector<8x128xf32>
      %69 = math.exp %68 : vector<8x128xf32>
      %cst_34 = arith.constant 1.000000e+00 : f32
      %70 = vector.broadcast %cst_34 : f32 to vector<8x128xf32>
      %71 = arith.addf %70, %69 : vector<8x128xf32>
      %72 = arith.divf %70, %71 : vector<8x128xf32>
      %73 = vector.extract_strided_slice %66 {offsets = [0, 128], sizes = [8, 128], strides = [1, 1]} : vector<8x512xf32> to vector<8x128xf32>
      %74 = arith.negf %73 : vector<8x128xf32>
      %75 = math.exp %74 : vector<8x128xf32>
      %cst_35 = arith.constant 1.000000e+00 : f32
      %76 = vector.broadcast %cst_35 : f32 to vector<8x128xf32>
      %77 = arith.addf %76, %75 : vector<8x128xf32>
      %78 = arith.divf %76, %77 : vector<8x128xf32>
      %79 = vector.extract_strided_slice %66 {offsets = [0, 256], sizes = [8, 128], strides = [1, 1]} : vector<8x512xf32> to vector<8x128xf32>
      %80 = vector.extract_strided_slice %66 {offsets = [0, 384], sizes = [8, 128], strides = [1, 1]} : vector<8x512xf32> to vector<8x128xf32>
      %81 = arith.mulf %72, %80 : vector<8x128xf32>
      %82 = arith.addf %79, %81 : vector<8x128xf32>
      %83 = math.tanh %82 : vector<8x128xf32>
      %84 = arith.subf %27, %83 : vector<8x128xf32>
      %85 = arith.mulf %78, %84 : vector<8x128xf32>
      %86 = arith.addf %83, %85 : vector<8x128xf32>
      %87 = arith.addi %2, %c0_i32_23 : i32
      %88 = vector.broadcast %87 : i32 to vector<8x1xi32>
      %89 = arith.cmpi eq, %23, %88 : vector<8x1xi32>
      %90 = vector.shape_cast %89 : vector<8x1xi1> to vector<8x1xi1>
      %91 = vector.broadcast %90 : vector<8x1xi1> to vector<8x128xi1>
      %92 = arith.select %91, %86, %28 : vector<8x128xi1>, vector<8x128xf32>
      %c1_i32 = arith.constant 1 : i32
      %c8_i32_36 = arith.constant 8 : i32
      %93 = arith.muli %c1_i32, %c8_i32_36 : i32
      %94 = tpu.assume_multiple %93, 8 : i32
      %95 = arith.index_cast %94 : i32 to index
      %c0_37 = arith.constant 0 : index
      %96 = vector.load %arg16[%95, %c0_37] : memref<64x384xf32, #tpu.memory_space<vmem>>, vector<8x384xf32>
      %97 = arith.truncf %60 : vector<8x128xf32> to vector<8x128xbf16>
      %c0_38 = arith.constant 0 : index
      %c0_39 = arith.constant 0 : index
      %98 = vector.load %arg7[%c0_38, %c0_39] : memref<128x384xbf16, #tpu.memory_space<vmem>>, vector<128x384xbf16>
      %cst_40 = arith.constant dense<0.000000e+00> : vector<8x384xf32>
      %99 = tpu.matmul %97, %98, %cst_40 {dimension_numbers = #tpu.dot_dimension_numbers<[1], [0], [0], [1], [0, 0, 1, 1], [], []>} : vector<8x128xbf16>, vector<128x384xbf16>, vector<8x384xf32> -> vector<8x384xf32>
      %100 = arith.addf %99, %19 : vector<8x384xf32>
      %101 = vector.extract_strided_slice %96 {offsets = [0, 0], sizes = [8, 128], strides = [1, 1]} : vector<8x384xf32> to vector<8x128xf32>
      %102 = vector.extract_strided_slice %100 {offsets = [0, 0], sizes = [8, 128], strides = [1, 1]} : vector<8x384xf32> to vector<8x128xf32>
      %103 = arith.addf %101, %102 : vector<8x128xf32>
      %104 = arith.negf %103 : vector<8x128xf32>
      %105 = math.exp %104 : vector<8x128xf32>
      %cst_41 = arith.constant 1.000000e+00 : f32
      %106 = vector.broadcast %cst_41 : f32 to vector<8x128xf32>
      %107 = arith.addf %106, %105 : vector<8x128xf32>
      %108 = arith.divf %106, %107 : vector<8x128xf32>
      %109 = vector.extract_strided_slice %96 {offsets = [0, 128], sizes = [8, 128], strides = [1, 1]} : vector<8x384xf32> to vector<8x128xf32>
      %110 = vector.extract_strided_slice %100 {offsets = [0, 128], sizes = [8, 128], strides = [1, 1]} : vector<8x384xf32> to vector<8x128xf32>
      %111 = arith.addf %109, %110 : vector<8x128xf32>
      %112 = arith.negf %111 : vector<8x128xf32>
      %113 = math.exp %112 : vector<8x128xf32>
      %cst_42 = arith.constant 1.000000e+00 : f32
      %114 = vector.broadcast %cst_42 : f32 to vector<8x128xf32>
      %115 = arith.addf %114, %113 : vector<8x128xf32>
      %116 = arith.divf %114, %115 : vector<8x128xf32>
      %117 = vector.extract_strided_slice %96 {offsets = [0, 256], sizes = [8, 128], strides = [1, 1]} : vector<8x384xf32> to vector<8x128xf32>
      %118 = vector.extract_strided_slice %100 {offsets = [0, 256], sizes = [8, 128], strides = [1, 1]} : vector<8x384xf32> to vector<8x128xf32>
      %119 = arith.mulf %108, %118 : vector<8x128xf32>
      %120 = arith.addf %117, %119 : vector<8x128xf32>
      %121 = math.tanh %120 : vector<8x128xf32>
      %122 = arith.subf %60, %121 : vector<8x128xf32>
      %123 = arith.mulf %116, %122 : vector<8x128xf32>
      %124 = arith.addf %121, %123 : vector<8x128xf32>
      %125 = arith.truncf %124 : vector<8x128xf32> to vector<8x128xbf16>
      %126 = arith.truncf %86 : vector<8x128xf32> to vector<8x128xbf16>
      %127 = tpu.concatenate %125, %126 in 1 : vector<8x128xbf16>, vector<8x128xbf16> -> vector<8x256xbf16>
      %c0_43 = arith.constant 0 : index
      %c0_44 = arith.constant 0 : index
      %128 = vector.load %arg9[%c0_43, %c0_44] : memref<256x512xbf16, #tpu.memory_space<vmem>>, vector<256x512xbf16>
      %cst_45 = arith.constant dense<0.000000e+00> : vector<8x512xf32>
      %129 = tpu.matmul %127, %128, %cst_45 {dimension_numbers = #tpu.dot_dimension_numbers<[1], [0], [0], [1], [0, 0, 1, 1], [], []>} : vector<8x256xbf16>, vector<256x512xbf16>, vector<8x512xf32> -> vector<8x512xf32>
      %130 = arith.addf %129, %22 : vector<8x512xf32>
      %131 = vector.extract_strided_slice %130 {offsets = [0, 0], sizes = [8, 128], strides = [1, 1]} : vector<8x512xf32> to vector<8x128xf32>
      %132 = arith.negf %131 : vector<8x128xf32>
      %133 = math.exp %132 : vector<8x128xf32>
      %cst_46 = arith.constant 1.000000e+00 : f32
      %134 = vector.broadcast %cst_46 : f32 to vector<8x128xf32>
      %135 = arith.addf %134, %133 : vector<8x128xf32>
      %136 = arith.divf %134, %135 : vector<8x128xf32>
      %137 = vector.extract_strided_slice %130 {offsets = [0, 128], sizes = [8, 128], strides = [1, 1]} : vector<8x512xf32> to vector<8x128xf32>
      %138 = arith.negf %137 : vector<8x128xf32>
      %139 = math.exp %138 : vector<8x128xf32>
      %cst_47 = arith.constant 1.000000e+00 : f32
      %140 = vector.broadcast %cst_47 : f32 to vector<8x128xf32>
      %141 = arith.addf %140, %139 : vector<8x128xf32>
      %142 = arith.divf %140, %141 : vector<8x128xf32>
      %143 = vector.extract_strided_slice %130 {offsets = [0, 256], sizes = [8, 128], strides = [1, 1]} : vector<8x512xf32> to vector<8x128xf32>
      %144 = vector.extract_strided_slice %130 {offsets = [0, 384], sizes = [8, 128], strides = [1, 1]} : vector<8x512xf32> to vector<8x128xf32>
      %145 = arith.mulf %136, %144 : vector<8x128xf32>
      %146 = arith.addf %143, %145 : vector<8x128xf32>
      %147 = math.tanh %146 : vector<8x128xf32>
      %148 = arith.subf %86, %147 : vector<8x128xf32>
      %149 = arith.mulf %142, %148 : vector<8x128xf32>
      %150 = arith.addf %147, %149 : vector<8x128xf32>
      %151 = arith.addi %2, %c1_i32 : i32
      %152 = vector.broadcast %151 : i32 to vector<8x1xi32>
      %153 = arith.cmpi eq, %23, %152 : vector<8x1xi32>
      %154 = vector.shape_cast %153 : vector<8x1xi1> to vector<8x1xi1>
      %155 = vector.broadcast %154 : vector<8x1xi1> to vector<8x128xi1>
      %156 = arith.select %155, %150, %92 : vector<8x128xi1>, vector<8x128xf32>
      %c2_i32 = arith.constant 2 : i32
      %c8_i32_48 = arith.constant 8 : i32
      %157 = arith.muli %c2_i32, %c8_i32_48 : i32
      %158 = tpu.assume_multiple %157, 8 : i32
      %159 = arith.index_cast %158 : i32 to index
      %c0_49 = arith.constant 0 : index
      %160 = vector.load %arg16[%159, %c0_49] : memref<64x384xf32, #tpu.memory_space<vmem>>, vector<8x384xf32>
      %161 = arith.truncf %124 : vector<8x128xf32> to vector<8x128xbf16>
      %c0_50 = arith.constant 0 : index
      %c0_51 = arith.constant 0 : index
      %162 = vector.load %arg7[%c0_50, %c0_51] : memref<128x384xbf16, #tpu.memory_space<vmem>>, vector<128x384xbf16>
      %cst_52 = arith.constant dense<0.000000e+00> : vector<8x384xf32>
      %163 = tpu.matmul %161, %162, %cst_52 {dimension_numbers = #tpu.dot_dimension_numbers<[1], [0], [0], [1], [0, 0, 1, 1], [], []>} : vector<8x128xbf16>, vector<128x384xbf16>, vector<8x384xf32> -> vector<8x384xf32>
      %164 = arith.addf %163, %19 : vector<8x384xf32>
      %165 = vector.extract_strided_slice %160 {offsets = [0, 0], sizes = [8, 128], strides = [1, 1]} : vector<8x384xf32> to vector<8x128xf32>
      %166 = vector.extract_strided_slice %164 {offsets = [0, 0], sizes = [8, 128], strides = [1, 1]} : vector<8x384xf32> to vector<8x128xf32>
      %167 = arith.addf %165, %166 : vector<8x128xf32>
      %168 = arith.negf %167 : vector<8x128xf32>
      %169 = math.exp %168 : vector<8x128xf32>
      %cst_53 = arith.constant 1.000000e+00 : f32
      %170 = vector.broadcast %cst_53 : f32 to vector<8x128xf32>
      %171 = arith.addf %170, %169 : vector<8x128xf32>
      %172 = arith.divf %170, %171 : vector<8x128xf32>
      %173 = vector.extract_strided_slice %160 {offsets = [0, 128], sizes = [8, 128], strides = [1, 1]} : vector<8x384xf32> to vector<8x128xf32>
      %174 = vector.extract_strided_slice %164 {offsets = [0, 128], sizes = [8, 128], strides = [1, 1]} : vector<8x384xf32> to vector<8x128xf32>
      %175 = arith.addf %173, %174 : vector<8x128xf32>
      %176 = arith.negf %175 : vector<8x128xf32>
      %177 = math.exp %176 : vector<8x128xf32>
      %cst_54 = arith.constant 1.000000e+00 : f32
      %178 = vector.broadcast %cst_54 : f32 to vector<8x128xf32>
      %179 = arith.addf %178, %177 : vector<8x128xf32>
      %180 = arith.divf %178, %179 : vector<8x128xf32>
      %181 = vector.extract_strided_slice %160 {offsets = [0, 256], sizes = [8, 128], strides = [1, 1]} : vector<8x384xf32> to vector<8x128xf32>
      %182 = vector.extract_strided_slice %164 {offsets = [0, 256], sizes = [8, 128], strides = [1, 1]} : vector<8x384xf32> to vector<8x128xf32>
      %183 = arith.mulf %172, %182 : vector<8x128xf32>
      %184 = arith.addf %181, %183 : vector<8x128xf32>
      %185 = math.tanh %184 : vector<8x128xf32>
      %186 = arith.subf %124, %185 : vector<8x128xf32>
      %187 = arith.mulf %180, %186 : vector<8x128xf32>
      %188 = arith.addf %185, %187 : vector<8x128xf32>
      %189 = arith.truncf %188 : vector<8x128xf32> to vector<8x128xbf16>
      %190 = arith.truncf %150 : vector<8x128xf32> to vector<8x128xbf16>
      %191 = tpu.concatenate %189, %190 in 1 : vector<8x128xbf16>, vector<8x128xbf16> -> vector<8x256xbf16>
      %c0_55 = arith.constant 0 : index
      %c0_56 = arith.constant 0 : index
      %192 = vector.load %arg9[%c0_55, %c0_56] : memref<256x512xbf16, #tpu.memory_space<vmem>>, vector<256x512xbf16>
      %cst_57 = arith.constant dense<0.000000e+00> : vector<8x512xf32>
      %193 = tpu.matmul %191, %192, %cst_57 {dimension_numbers = #tpu.dot_dimension_numbers<[1], [0], [0], [1], [0, 0, 1, 1], [], []>} : vector<8x256xbf16>, vector<256x512xbf16>, vector<8x512xf32> -> vector<8x512xf32>
      %194 = arith.addf %193, %22 : vector<8x512xf32>
      %195 = vector.extract_strided_slice %194 {offsets = [0, 0], sizes = [8, 128], strides = [1, 1]} : vector<8x512xf32> to vector<8x128xf32>
      %196 = arith.negf %195 : vector<8x128xf32>
      %197 = math.exp %196 : vector<8x128xf32>
      %cst_58 = arith.constant 1.000000e+00 : f32
      %198 = vector.broadcast %cst_58 : f32 to vector<8x128xf32>
      %199 = arith.addf %198, %197 : vector<8x128xf32>
      %200 = arith.divf %198, %199 : vector<8x128xf32>
      %201 = vector.extract_strided_slice %194 {offsets = [0, 128], sizes = [8, 128], strides = [1, 1]} : vector<8x512xf32> to vector<8x128xf32>
      %202 = arith.negf %201 : vector<8x128xf32>
      %203 = math.exp %202 : vector<8x128xf32>
      %cst_59 = arith.constant 1.000000e+00 : f32
      %204 = vector.broadcast %cst_59 : f32 to vector<8x128xf32>
      %205 = arith.addf %204, %203 : vector<8x128xf32>
      %206 = arith.divf %204, %205 : vector<8x128xf32>
      %207 = vector.extract_strided_slice %194 {offsets = [0, 256], sizes = [8, 128], strides = [1, 1]} : vector<8x512xf32> to vector<8x128xf32>
      %208 = vector.extract_strided_slice %194 {offsets = [0, 384], sizes = [8, 128], strides = [1, 1]} : vector<8x512xf32> to vector<8x128xf32>
      %209 = arith.mulf %200, %208 : vector<8x128xf32>
      %210 = arith.addf %207, %209 : vector<8x128xf32>
      %211 = math.tanh %210 : vector<8x128xf32>
      %212 = arith.subf %150, %211 : vector<8x128xf32>
      %213 = arith.mulf %206, %212 : vector<8x128xf32>
      %214 = arith.addf %211, %213 : vector<8x128xf32>
      %215 = arith.addi %2, %c2_i32 : i32
      %216 = vector.broadcast %215 : i32 to vector<8x1xi32>
      %217 = arith.cmpi eq, %23, %216 : vector<8x1xi32>
      %218 = vector.shape_cast %217 : vector<8x1xi1> to vector<8x1xi1>
      %219 = vector.broadcast %218 : vector<8x1xi1> to vector<8x128xi1>
      %220 = arith.select %219, %214, %156 : vector<8x128xi1>, vector<8x128xf32>
      %c3_i32 = arith.constant 3 : i32
      %c8_i32_60 = arith.constant 8 : i32
      %221 = arith.muli %c3_i32, %c8_i32_60 : i32
      %222 = tpu.assume_multiple %221, 8 : i32
      %223 = arith.index_cast %222 : i32 to index
      %c0_61 = arith.constant 0 : index
      %224 = vector.load %arg16[%223, %c0_61] : memref<64x384xf32, #tpu.memory_space<vmem>>, vector<8x384xf32>
      %225 = arith.truncf %188 : vector<8x128xf32> to vector<8x128xbf16>
      %c0_62 = arith.constant 0 : index
      %c0_63 = arith.constant 0 : index
      %226 = vector.load %arg7[%c0_62, %c0_63] : memref<128x384xbf16, #tpu.memory_space<vmem>>, vector<128x384xbf16>
      %cst_64 = arith.constant dense<0.000000e+00> : vector<8x384xf32>
      %227 = tpu.matmul %225, %226, %cst_64 {dimension_numbers = #tpu.dot_dimension_numbers<[1], [0], [0], [1], [0, 0, 1, 1], [], []>} : vector<8x128xbf16>, vector<128x384xbf16>, vector<8x384xf32> -> vector<8x384xf32>
      %228 = arith.addf %227, %19 : vector<8x384xf32>
      %229 = vector.extract_strided_slice %224 {offsets = [0, 0], sizes = [8, 128], strides = [1, 1]} : vector<8x384xf32> to vector<8x128xf32>
      %230 = vector.extract_strided_slice %228 {offsets = [0, 0], sizes = [8, 128], strides = [1, 1]} : vector<8x384xf32> to vector<8x128xf32>
      %231 = arith.addf %229, %230 : vector<8x128xf32>
      %232 = arith.negf %231 : vector<8x128xf32>
      %233 = math.exp %232 : vector<8x128xf32>
      %cst_65 = arith.constant 1.000000e+00 : f32
      %234 = vector.broadcast %cst_65 : f32 to vector<8x128xf32>
      %235 = arith.addf %234, %233 : vector<8x128xf32>
      %236 = arith.divf %234, %235 : vector<8x128xf32>
      %237 = vector.extract_strided_slice %224 {offsets = [0, 128], sizes = [8, 128], strides = [1, 1]} : vector<8x384xf32> to vector<8x128xf32>
      %238 = vector.extract_strided_slice %228 {offsets = [0, 128], sizes = [8, 128], strides = [1, 1]} : vector<8x384xf32> to vector<8x128xf32>
      %239 = arith.addf %237, %238 : vector<8x128xf32>
      %240 = arith.negf %239 : vector<8x128xf32>
      %241 = math.exp %240 : vector<8x128xf32>
      %cst_66 = arith.constant 1.000000e+00 : f32
      %242 = vector.broadcast %cst_66 : f32 to vector<8x128xf32>
      %243 = arith.addf %242, %241 : vector<8x128xf32>
      %244 = arith.divf %242, %243 : vector<8x128xf32>
      %245 = vector.extract_strided_slice %224 {offsets = [0, 256], sizes = [8, 128], strides = [1, 1]} : vector<8x384xf32> to vector<8x128xf32>
      %246 = vector.extract_strided_slice %228 {offsets = [0, 256], sizes = [8, 128], strides = [1, 1]} : vector<8x384xf32> to vector<8x128xf32>
      %247 = arith.mulf %236, %246 : vector<8x128xf32>
      %248 = arith.addf %245, %247 : vector<8x128xf32>
      %249 = math.tanh %248 : vector<8x128xf32>
      %250 = arith.subf %188, %249 : vector<8x128xf32>
      %251 = arith.mulf %244, %250 : vector<8x128xf32>
      %252 = arith.addf %249, %251 : vector<8x128xf32>
      %253 = arith.truncf %252 : vector<8x128xf32> to vector<8x128xbf16>
      %254 = arith.truncf %214 : vector<8x128xf32> to vector<8x128xbf16>
      %255 = tpu.concatenate %253, %254 in 1 : vector<8x128xbf16>, vector<8x128xbf16> -> vector<8x256xbf16>
      %c0_67 = arith.constant 0 : index
      %c0_68 = arith.constant 0 : index
      %256 = vector.load %arg9[%c0_67, %c0_68] : memref<256x512xbf16, #tpu.memory_space<vmem>>, vector<256x512xbf16>
      %cst_69 = arith.constant dense<0.000000e+00> : vector<8x512xf32>
      %257 = tpu.matmul %255, %256, %cst_69 {dimension_numbers = #tpu.dot_dimension_numbers<[1], [0], [0], [1], [0, 0, 1, 1], [], []>} : vector<8x256xbf16>, vector<256x512xbf16>, vector<8x512xf32> -> vector<8x512xf32>
      %258 = arith.addf %257, %22 : vector<8x512xf32>
      %259 = vector.extract_strided_slice %258 {offsets = [0, 0], sizes = [8, 128], strides = [1, 1]} : vector<8x512xf32> to vector<8x128xf32>
      %260 = arith.negf %259 : vector<8x128xf32>
      %261 = math.exp %260 : vector<8x128xf32>
      %cst_70 = arith.constant 1.000000e+00 : f32
      %262 = vector.broadcast %cst_70 : f32 to vector<8x128xf32>
      %263 = arith.addf %262, %261 : vector<8x128xf32>
      %264 = arith.divf %262, %263 : vector<8x128xf32>
      %265 = vector.extract_strided_slice %258 {offsets = [0, 128], sizes = [8, 128], strides = [1, 1]} : vector<8x512xf32> to vector<8x128xf32>
      %266 = arith.negf %265 : vector<8x128xf32>
      %267 = math.exp %266 : vector<8x128xf32>
      %cst_71 = arith.constant 1.000000e+00 : f32
      %268 = vector.broadcast %cst_71 : f32 to vector<8x128xf32>
      %269 = arith.addf %268, %267 : vector<8x128xf32>
      %270 = arith.divf %268, %269 : vector<8x128xf32>
      %271 = vector.extract_strided_slice %258 {offsets = [0, 256], sizes = [8, 128], strides = [1, 1]} : vector<8x512xf32> to vector<8x128xf32>
      %272 = vector.extract_strided_slice %258 {offsets = [0, 384], sizes = [8, 128], strides = [1, 1]} : vector<8x512xf32> to vector<8x128xf32>
      %273 = arith.mulf %264, %272 : vector<8x128xf32>
      %274 = arith.addf %271, %273 : vector<8x128xf32>
      %275 = math.tanh %274 : vector<8x128xf32>
      %276 = arith.subf %214, %275 : vector<8x128xf32>
      %277 = arith.mulf %270, %276 : vector<8x128xf32>
      %278 = arith.addf %275, %277 : vector<8x128xf32>
      %279 = arith.addi %2, %c3_i32 : i32
      %280 = vector.broadcast %279 : i32 to vector<8x1xi32>
      %281 = arith.cmpi eq, %23, %280 : vector<8x1xi32>
      %282 = vector.shape_cast %281 : vector<8x1xi1> to vector<8x1xi1>
      %283 = vector.broadcast %282 : vector<8x1xi1> to vector<8x128xi1>
      %284 = arith.select %283, %278, %220 : vector<8x128xi1>, vector<8x128xf32>
      %c4_i32 = arith.constant 4 : i32
      %c8_i32_72 = arith.constant 8 : i32
      %285 = arith.muli %c4_i32, %c8_i32_72 : i32
      %286 = tpu.assume_multiple %285, 8 : i32
      %287 = arith.index_cast %286 : i32 to index
      %c0_73 = arith.constant 0 : index
      %288 = vector.load %arg16[%287, %c0_73] : memref<64x384xf32, #tpu.memory_space<vmem>>, vector<8x384xf32>
      %289 = arith.truncf %252 : vector<8x128xf32> to vector<8x128xbf16>
      %c0_74 = arith.constant 0 : index
      %c0_75 = arith.constant 0 : index
      %290 = vector.load %arg7[%c0_74, %c0_75] : memref<128x384xbf16, #tpu.memory_space<vmem>>, vector<128x384xbf16>
      %cst_76 = arith.constant dense<0.000000e+00> : vector<8x384xf32>
      %291 = tpu.matmul %289, %290, %cst_76 {dimension_numbers = #tpu.dot_dimension_numbers<[1], [0], [0], [1], [0, 0, 1, 1], [], []>} : vector<8x128xbf16>, vector<128x384xbf16>, vector<8x384xf32> -> vector<8x384xf32>
      %292 = arith.addf %291, %19 : vector<8x384xf32>
      %293 = vector.extract_strided_slice %288 {offsets = [0, 0], sizes = [8, 128], strides = [1, 1]} : vector<8x384xf32> to vector<8x128xf32>
      %294 = vector.extract_strided_slice %292 {offsets = [0, 0], sizes = [8, 128], strides = [1, 1]} : vector<8x384xf32> to vector<8x128xf32>
      %295 = arith.addf %293, %294 : vector<8x128xf32>
      %296 = arith.negf %295 : vector<8x128xf32>
      %297 = math.exp %296 : vector<8x128xf32>
      %cst_77 = arith.constant 1.000000e+00 : f32
      %298 = vector.broadcast %cst_77 : f32 to vector<8x128xf32>
      %299 = arith.addf %298, %297 : vector<8x128xf32>
      %300 = arith.divf %298, %299 : vector<8x128xf32>
      %301 = vector.extract_strided_slice %288 {offsets = [0, 128], sizes = [8, 128], strides = [1, 1]} : vector<8x384xf32> to vector<8x128xf32>
      %302 = vector.extract_strided_slice %292 {offsets = [0, 128], sizes = [8, 128], strides = [1, 1]} : vector<8x384xf32> to vector<8x128xf32>
      %303 = arith.addf %301, %302 : vector<8x128xf32>
      %304 = arith.negf %303 : vector<8x128xf32>
      %305 = math.exp %304 : vector<8x128xf32>
      %cst_78 = arith.constant 1.000000e+00 : f32
      %306 = vector.broadcast %cst_78 : f32 to vector<8x128xf32>
      %307 = arith.addf %306, %305 : vector<8x128xf32>
      %308 = arith.divf %306, %307 : vector<8x128xf32>
      %309 = vector.extract_strided_slice %288 {offsets = [0, 256], sizes = [8, 128], strides = [1, 1]} : vector<8x384xf32> to vector<8x128xf32>
      %310 = vector.extract_strided_slice %292 {offsets = [0, 256], sizes = [8, 128], strides = [1, 1]} : vector<8x384xf32> to vector<8x128xf32>
      %311 = arith.mulf %300, %310 : vector<8x128xf32>
      %312 = arith.addf %309, %311 : vector<8x128xf32>
      %313 = math.tanh %312 : vector<8x128xf32>
      %314 = arith.subf %252, %313 : vector<8x128xf32>
      %315 = arith.mulf %308, %314 : vector<8x128xf32>
      %316 = arith.addf %313, %315 : vector<8x128xf32>
      %317 = arith.truncf %316 : vector<8x128xf32> to vector<8x128xbf16>
      %318 = arith.truncf %278 : vector<8x128xf32> to vector<8x128xbf16>
      %319 = tpu.concatenate %317, %318 in 1 : vector<8x128xbf16>, vector<8x128xbf16> -> vector<8x256xbf16>
      %c0_79 = arith.constant 0 : index
      %c0_80 = arith.constant 0 : index
      %320 = vector.load %arg9[%c0_79, %c0_80] : memref<256x512xbf16, #tpu.memory_space<vmem>>, vector<256x512xbf16>
      %cst_81 = arith.constant dense<0.000000e+00> : vector<8x512xf32>
      %321 = tpu.matmul %319, %320, %cst_81 {dimension_numbers = #tpu.dot_dimension_numbers<[1], [0], [0], [1], [0, 0, 1, 1], [], []>} : vector<8x256xbf16>, vector<256x512xbf16>, vector<8x512xf32> -> vector<8x512xf32>
      %322 = arith.addf %321, %22 : vector<8x512xf32>
      %323 = vector.extract_strided_slice %322 {offsets = [0, 0], sizes = [8, 128], strides = [1, 1]} : vector<8x512xf32> to vector<8x128xf32>
      %324 = arith.negf %323 : vector<8x128xf32>
      %325 = math.exp %324 : vector<8x128xf32>
      %cst_82 = arith.constant 1.000000e+00 : f32
      %326 = vector.broadcast %cst_82 : f32 to vector<8x128xf32>
      %327 = arith.addf %326, %325 : vector<8x128xf32>
      %328 = arith.divf %326, %327 : vector<8x128xf32>
      %329 = vector.extract_strided_slice %322 {offsets = [0, 128], sizes = [8, 128], strides = [1, 1]} : vector<8x512xf32> to vector<8x128xf32>
      %330 = arith.negf %329 : vector<8x128xf32>
      %331 = math.exp %330 : vector<8x128xf32>
      %cst_83 = arith.constant 1.000000e+00 : f32
      %332 = vector.broadcast %cst_83 : f32 to vector<8x128xf32>
      %333 = arith.addf %332, %331 : vector<8x128xf32>
      %334 = arith.divf %332, %333 : vector<8x128xf32>
      %335 = vector.extract_strided_slice %322 {offsets = [0, 256], sizes = [8, 128], strides = [1, 1]} : vector<8x512xf32> to vector<8x128xf32>
      %336 = vector.extract_strided_slice %322 {offsets = [0, 384], sizes = [8, 128], strides = [1, 1]} : vector<8x512xf32> to vector<8x128xf32>
      %337 = arith.mulf %328, %336 : vector<8x128xf32>
      %338 = arith.addf %335, %337 : vector<8x128xf32>
      %339 = math.tanh %338 : vector<8x128xf32>
      %340 = arith.subf %278, %339 : vector<8x128xf32>
      %341 = arith.mulf %334, %340 : vector<8x128xf32>
      %342 = arith.addf %339, %341 : vector<8x128xf32>
      %343 = arith.addi %2, %c4_i32 : i32
      %344 = vector.broadcast %343 : i32 to vector<8x1xi32>
      %345 = arith.cmpi eq, %23, %344 : vector<8x1xi32>
      %346 = vector.shape_cast %345 : vector<8x1xi1> to vector<8x1xi1>
      %347 = vector.broadcast %346 : vector<8x1xi1> to vector<8x128xi1>
      %348 = arith.select %347, %342, %284 : vector<8x128xi1>, vector<8x128xf32>
      %c5_i32 = arith.constant 5 : i32
      %c8_i32_84 = arith.constant 8 : i32
      %349 = arith.muli %c5_i32, %c8_i32_84 : i32
      %350 = tpu.assume_multiple %349, 8 : i32
      %351 = arith.index_cast %350 : i32 to index
      %c0_85 = arith.constant 0 : index
      %352 = vector.load %arg16[%351, %c0_85] : memref<64x384xf32, #tpu.memory_space<vmem>>, vector<8x384xf32>
      %353 = arith.truncf %316 : vector<8x128xf32> to vector<8x128xbf16>
      %c0_86 = arith.constant 0 : index
      %c0_87 = arith.constant 0 : index
      %354 = vector.load %arg7[%c0_86, %c0_87] : memref<128x384xbf16, #tpu.memory_space<vmem>>, vector<128x384xbf16>
      %cst_88 = arith.constant dense<0.000000e+00> : vector<8x384xf32>
      %355 = tpu.matmul %353, %354, %cst_88 {dimension_numbers = #tpu.dot_dimension_numbers<[1], [0], [0], [1], [0, 0, 1, 1], [], []>} : vector<8x128xbf16>, vector<128x384xbf16>, vector<8x384xf32> -> vector<8x384xf32>
      %356 = arith.addf %355, %19 : vector<8x384xf32>
      %357 = vector.extract_strided_slice %352 {offsets = [0, 0], sizes = [8, 128], strides = [1, 1]} : vector<8x384xf32> to vector<8x128xf32>
      %358 = vector.extract_strided_slice %356 {offsets = [0, 0], sizes = [8, 128], strides = [1, 1]} : vector<8x384xf32> to vector<8x128xf32>
      %359 = arith.addf %357, %358 : vector<8x128xf32>
      %360 = arith.negf %359 : vector<8x128xf32>
      %361 = math.exp %360 : vector<8x128xf32>
      %cst_89 = arith.constant 1.000000e+00 : f32
      %362 = vector.broadcast %cst_89 : f32 to vector<8x128xf32>
      %363 = arith.addf %362, %361 : vector<8x128xf32>
      %364 = arith.divf %362, %363 : vector<8x128xf32>
      %365 = vector.extract_strided_slice %352 {offsets = [0, 128], sizes = [8, 128], strides = [1, 1]} : vector<8x384xf32> to vector<8x128xf32>
      %366 = vector.extract_strided_slice %356 {offsets = [0, 128], sizes = [8, 128], strides = [1, 1]} : vector<8x384xf32> to vector<8x128xf32>
      %367 = arith.addf %365, %366 : vector<8x128xf32>
      %368 = arith.negf %367 : vector<8x128xf32>
      %369 = math.exp %368 : vector<8x128xf32>
      %cst_90 = arith.constant 1.000000e+00 : f32
      %370 = vector.broadcast %cst_90 : f32 to vector<8x128xf32>
      %371 = arith.addf %370, %369 : vector<8x128xf32>
      %372 = arith.divf %370, %371 : vector<8x128xf32>
      %373 = vector.extract_strided_slice %352 {offsets = [0, 256], sizes = [8, 128], strides = [1, 1]} : vector<8x384xf32> to vector<8x128xf32>
      %374 = vector.extract_strided_slice %356 {offsets = [0, 256], sizes = [8, 128], strides = [1, 1]} : vector<8x384xf32> to vector<8x128xf32>
      %375 = arith.mulf %364, %374 : vector<8x128xf32>
      %376 = arith.addf %373, %375 : vector<8x128xf32>
      %377 = math.tanh %376 : vector<8x128xf32>
      %378 = arith.subf %316, %377 : vector<8x128xf32>
      %379 = arith.mulf %372, %378 : vector<8x128xf32>
      %380 = arith.addf %377, %379 : vector<8x128xf32>
      %381 = arith.truncf %380 : vector<8x128xf32> to vector<8x128xbf16>
      %382 = arith.truncf %342 : vector<8x128xf32> to vector<8x128xbf16>
      %383 = tpu.concatenate %381, %382 in 1 : vector<8x128xbf16>, vector<8x128xbf16> -> vector<8x256xbf16>
      %c0_91 = arith.constant 0 : index
      %c0_92 = arith.constant 0 : index
      %384 = vector.load %arg9[%c0_91, %c0_92] : memref<256x512xbf16, #tpu.memory_space<vmem>>, vector<256x512xbf16>
      %cst_93 = arith.constant dense<0.000000e+00> : vector<8x512xf32>
      %385 = tpu.matmul %383, %384, %cst_93 {dimension_numbers = #tpu.dot_dimension_numbers<[1], [0], [0], [1], [0, 0, 1, 1], [], []>} : vector<8x256xbf16>, vector<256x512xbf16>, vector<8x512xf32> -> vector<8x512xf32>
      %386 = arith.addf %385, %22 : vector<8x512xf32>
      %387 = vector.extract_strided_slice %386 {offsets = [0, 0], sizes = [8, 128], strides = [1, 1]} : vector<8x512xf32> to vector<8x128xf32>
      %388 = arith.negf %387 : vector<8x128xf32>
      %389 = math.exp %388 : vector<8x128xf32>
      %cst_94 = arith.constant 1.000000e+00 : f32
      %390 = vector.broadcast %cst_94 : f32 to vector<8x128xf32>
      %391 = arith.addf %390, %389 : vector<8x128xf32>
      %392 = arith.divf %390, %391 : vector<8x128xf32>
      %393 = vector.extract_strided_slice %386 {offsets = [0, 128], sizes = [8, 128], strides = [1, 1]} : vector<8x512xf32> to vector<8x128xf32>
      %394 = arith.negf %393 : vector<8x128xf32>
      %395 = math.exp %394 : vector<8x128xf32>
      %cst_95 = arith.constant 1.000000e+00 : f32
      %396 = vector.broadcast %cst_95 : f32 to vector<8x128xf32>
      %397 = arith.addf %396, %395 : vector<8x128xf32>
      %398 = arith.divf %396, %397 : vector<8x128xf32>
      %399 = vector.extract_strided_slice %386 {offsets = [0, 256], sizes = [8, 128], strides = [1, 1]} : vector<8x512xf32> to vector<8x128xf32>
      %400 = vector.extract_strided_slice %386 {offsets = [0, 384], sizes = [8, 128], strides = [1, 1]} : vector<8x512xf32> to vector<8x128xf32>
      %401 = arith.mulf %392, %400 : vector<8x128xf32>
      %402 = arith.addf %399, %401 : vector<8x128xf32>
      %403 = math.tanh %402 : vector<8x128xf32>
      %404 = arith.subf %342, %403 : vector<8x128xf32>
      %405 = arith.mulf %398, %404 : vector<8x128xf32>
      %406 = arith.addf %403, %405 : vector<8x128xf32>
      %407 = arith.addi %2, %c5_i32 : i32
      %408 = vector.broadcast %407 : i32 to vector<8x1xi32>
      %409 = arith.cmpi eq, %23, %408 : vector<8x1xi32>
      %410 = vector.shape_cast %409 : vector<8x1xi1> to vector<8x1xi1>
      %411 = vector.broadcast %410 : vector<8x1xi1> to vector<8x128xi1>
      %412 = arith.select %411, %406, %348 : vector<8x128xi1>, vector<8x128xf32>
      %c6_i32 = arith.constant 6 : i32
      %c8_i32_96 = arith.constant 8 : i32
      %413 = arith.muli %c6_i32, %c8_i32_96 : i32
      %414 = tpu.assume_multiple %413, 8 : i32
      %415 = arith.index_cast %414 : i32 to index
      %c0_97 = arith.constant 0 : index
      %416 = vector.load %arg16[%415, %c0_97] : memref<64x384xf32, #tpu.memory_space<vmem>>, vector<8x384xf32>
      %417 = arith.truncf %380 : vector<8x128xf32> to vector<8x128xbf16>
      %c0_98 = arith.constant 0 : index
      %c0_99 = arith.constant 0 : index
      %418 = vector.load %arg7[%c0_98, %c0_99] : memref<128x384xbf16, #tpu.memory_space<vmem>>, vector<128x384xbf16>
      %cst_100 = arith.constant dense<0.000000e+00> : vector<8x384xf32>
      %419 = tpu.matmul %417, %418, %cst_100 {dimension_numbers = #tpu.dot_dimension_numbers<[1], [0], [0], [1], [0, 0, 1, 1], [], []>} : vector<8x128xbf16>, vector<128x384xbf16>, vector<8x384xf32> -> vector<8x384xf32>
      %420 = arith.addf %419, %19 : vector<8x384xf32>
      %421 = vector.extract_strided_slice %416 {offsets = [0, 0], sizes = [8, 128], strides = [1, 1]} : vector<8x384xf32> to vector<8x128xf32>
      %422 = vector.extract_strided_slice %420 {offsets = [0, 0], sizes = [8, 128], strides = [1, 1]} : vector<8x384xf32> to vector<8x128xf32>
      %423 = arith.addf %421, %422 : vector<8x128xf32>
      %424 = arith.negf %423 : vector<8x128xf32>
      %425 = math.exp %424 : vector<8x128xf32>
      %cst_101 = arith.constant 1.000000e+00 : f32
      %426 = vector.broadcast %cst_101 : f32 to vector<8x128xf32>
      %427 = arith.addf %426, %425 : vector<8x128xf32>
      %428 = arith.divf %426, %427 : vector<8x128xf32>
      %429 = vector.extract_strided_slice %416 {offsets = [0, 128], sizes = [8, 128], strides = [1, 1]} : vector<8x384xf32> to vector<8x128xf32>
      %430 = vector.extract_strided_slice %420 {offsets = [0, 128], sizes = [8, 128], strides = [1, 1]} : vector<8x384xf32> to vector<8x128xf32>
      %431 = arith.addf %429, %430 : vector<8x128xf32>
      %432 = arith.negf %431 : vector<8x128xf32>
      %433 = math.exp %432 : vector<8x128xf32>
      %cst_102 = arith.constant 1.000000e+00 : f32
      %434 = vector.broadcast %cst_102 : f32 to vector<8x128xf32>
      %435 = arith.addf %434, %433 : vector<8x128xf32>
      %436 = arith.divf %434, %435 : vector<8x128xf32>
      %437 = vector.extract_strided_slice %416 {offsets = [0, 256], sizes = [8, 128], strides = [1, 1]} : vector<8x384xf32> to vector<8x128xf32>
      %438 = vector.extract_strided_slice %420 {offsets = [0, 256], sizes = [8, 128], strides = [1, 1]} : vector<8x384xf32> to vector<8x128xf32>
      %439 = arith.mulf %428, %438 : vector<8x128xf32>
      %440 = arith.addf %437, %439 : vector<8x128xf32>
      %441 = math.tanh %440 : vector<8x128xf32>
      %442 = arith.subf %380, %441 : vector<8x128xf32>
      %443 = arith.mulf %436, %442 : vector<8x128xf32>
      %444 = arith.addf %441, %443 : vector<8x128xf32>
      %445 = arith.truncf %444 : vector<8x128xf32> to vector<8x128xbf16>
      %446 = arith.truncf %406 : vector<8x128xf32> to vector<8x128xbf16>
      %447 = tpu.concatenate %445, %446 in 1 : vector<8x128xbf16>, vector<8x128xbf16> -> vector<8x256xbf16>
      %c0_103 = arith.constant 0 : index
      %c0_104 = arith.constant 0 : index
      %448 = vector.load %arg9[%c0_103, %c0_104] : memref<256x512xbf16, #tpu.memory_space<vmem>>, vector<256x512xbf16>
      %cst_105 = arith.constant dense<0.000000e+00> : vector<8x512xf32>
      %449 = tpu.matmul %447, %448, %cst_105 {dimension_numbers = #tpu.dot_dimension_numbers<[1], [0], [0], [1], [0, 0, 1, 1], [], []>} : vector<8x256xbf16>, vector<256x512xbf16>, vector<8x512xf32> -> vector<8x512xf32>
      %450 = arith.addf %449, %22 : vector<8x512xf32>
      %451 = vector.extract_strided_slice %450 {offsets = [0, 0], sizes = [8, 128], strides = [1, 1]} : vector<8x512xf32> to vector<8x128xf32>
      %452 = arith.negf %451 : vector<8x128xf32>
      %453 = math.exp %452 : vector<8x128xf32>
      %cst_106 = arith.constant 1.000000e+00 : f32
      %454 = vector.broadcast %cst_106 : f32 to vector<8x128xf32>
      %455 = arith.addf %454, %453 : vector<8x128xf32>
      %456 = arith.divf %454, %455 : vector<8x128xf32>
      %457 = vector.extract_strided_slice %450 {offsets = [0, 128], sizes = [8, 128], strides = [1, 1]} : vector<8x512xf32> to vector<8x128xf32>
      %458 = arith.negf %457 : vector<8x128xf32>
      %459 = math.exp %458 : vector<8x128xf32>
      %cst_107 = arith.constant 1.000000e+00 : f32
      %460 = vector.broadcast %cst_107 : f32 to vector<8x128xf32>
      %461 = arith.addf %460, %459 : vector<8x128xf32>
      %462 = arith.divf %460, %461 : vector<8x128xf32>
      %463 = vector.extract_strided_slice %450 {offsets = [0, 256], sizes = [8, 128], strides = [1, 1]} : vector<8x512xf32> to vector<8x128xf32>
      %464 = vector.extract_strided_slice %450 {offsets = [0, 384], sizes = [8, 128], strides = [1, 1]} : vector<8x512xf32> to vector<8x128xf32>
      %465 = arith.mulf %456, %464 : vector<8x128xf32>
      %466 = arith.addf %463, %465 : vector<8x128xf32>
      %467 = math.tanh %466 : vector<8x128xf32>
      %468 = arith.subf %406, %467 : vector<8x128xf32>
      %469 = arith.mulf %462, %468 : vector<8x128xf32>
      %470 = arith.addf %467, %469 : vector<8x128xf32>
      %471 = arith.addi %2, %c6_i32 : i32
      %472 = vector.broadcast %471 : i32 to vector<8x1xi32>
      %473 = arith.cmpi eq, %23, %472 : vector<8x1xi32>
      %474 = vector.shape_cast %473 : vector<8x1xi1> to vector<8x1xi1>
      %475 = vector.broadcast %474 : vector<8x1xi1> to vector<8x128xi1>
      %476 = arith.select %475, %470, %412 : vector<8x128xi1>, vector<8x128xf32>
      %c7_i32 = arith.constant 7 : i32
      %c8_i32_108 = arith.constant 8 : i32
      %477 = arith.muli %c7_i32, %c8_i32_108 : i32
      %478 = tpu.assume_multiple %477, 8 : i32
      %479 = arith.index_cast %478 : i32 to index
      %c0_109 = arith.constant 0 : index
      %480 = vector.load %arg16[%479, %c0_109] : memref<64x384xf32, #tpu.memory_space<vmem>>, vector<8x384xf32>
      %481 = arith.truncf %444 : vector<8x128xf32> to vector<8x128xbf16>
      %c0_110 = arith.constant 0 : index
      %c0_111 = arith.constant 0 : index
      %482 = vector.load %arg7[%c0_110, %c0_111] : memref<128x384xbf16, #tpu.memory_space<vmem>>, vector<128x384xbf16>
      %cst_112 = arith.constant dense<0.000000e+00> : vector<8x384xf32>
      %483 = tpu.matmul %481, %482, %cst_112 {dimension_numbers = #tpu.dot_dimension_numbers<[1], [0], [0], [1], [0, 0, 1, 1], [], []>} : vector<8x128xbf16>, vector<128x384xbf16>, vector<8x384xf32> -> vector<8x384xf32>
      %484 = arith.addf %483, %19 : vector<8x384xf32>
      %485 = vector.extract_strided_slice %480 {offsets = [0, 0], sizes = [8, 128], strides = [1, 1]} : vector<8x384xf32> to vector<8x128xf32>
      %486 = vector.extract_strided_slice %484 {offsets = [0, 0], sizes = [8, 128], strides = [1, 1]} : vector<8x384xf32> to vector<8x128xf32>
      %487 = arith.addf %485, %486 : vector<8x128xf32>
      %488 = arith.negf %487 : vector<8x128xf32>
      %489 = math.exp %488 : vector<8x128xf32>
      %cst_113 = arith.constant 1.000000e+00 : f32
      %490 = vector.broadcast %cst_113 : f32 to vector<8x128xf32>
      %491 = arith.addf %490, %489 : vector<8x128xf32>
      %492 = arith.divf %490, %491 : vector<8x128xf32>
      %493 = vector.extract_strided_slice %480 {offsets = [0, 128], sizes = [8, 128], strides = [1, 1]} : vector<8x384xf32> to vector<8x128xf32>
      %494 = vector.extract_strided_slice %484 {offsets = [0, 128], sizes = [8, 128], strides = [1, 1]} : vector<8x384xf32> to vector<8x128xf32>
      %495 = arith.addf %493, %494 : vector<8x128xf32>
      %496 = arith.negf %495 : vector<8x128xf32>
      %497 = math.exp %496 : vector<8x128xf32>
      %cst_114 = arith.constant 1.000000e+00 : f32
      %498 = vector.broadcast %cst_114 : f32 to vector<8x128xf32>
      %499 = arith.addf %498, %497 : vector<8x128xf32>
      %500 = arith.divf %498, %499 : vector<8x128xf32>
      %501 = vector.extract_strided_slice %480 {offsets = [0, 256], sizes = [8, 128], strides = [1, 1]} : vector<8x384xf32> to vector<8x128xf32>
      %502 = vector.extract_strided_slice %484 {offsets = [0, 256], sizes = [8, 128], strides = [1, 1]} : vector<8x384xf32> to vector<8x128xf32>
      %503 = arith.mulf %492, %502 : vector<8x128xf32>
      %504 = arith.addf %501, %503 : vector<8x128xf32>
      %505 = math.tanh %504 : vector<8x128xf32>
      %506 = arith.subf %444, %505 : vector<8x128xf32>
      %507 = arith.mulf %500, %506 : vector<8x128xf32>
      %508 = arith.addf %505, %507 : vector<8x128xf32>
      %509 = arith.truncf %508 : vector<8x128xf32> to vector<8x128xbf16>
      %510 = arith.truncf %470 : vector<8x128xf32> to vector<8x128xbf16>
      %511 = tpu.concatenate %509, %510 in 1 : vector<8x128xbf16>, vector<8x128xbf16> -> vector<8x256xbf16>
      %c0_115 = arith.constant 0 : index
      %c0_116 = arith.constant 0 : index
      %512 = vector.load %arg9[%c0_115, %c0_116] : memref<256x512xbf16, #tpu.memory_space<vmem>>, vector<256x512xbf16>
      %cst_117 = arith.constant dense<0.000000e+00> : vector<8x512xf32>
      %513 = tpu.matmul %511, %512, %cst_117 {dimension_numbers = #tpu.dot_dimension_numbers<[1], [0], [0], [1], [0, 0, 1, 1], [], []>} : vector<8x256xbf16>, vector<256x512xbf16>, vector<8x512xf32> -> vector<8x512xf32>
      %514 = arith.addf %513, %22 : vector<8x512xf32>
      %515 = vector.extract_strided_slice %514 {offsets = [0, 0], sizes = [8, 128], strides = [1, 1]} : vector<8x512xf32> to vector<8x128xf32>
      %516 = arith.negf %515 : vector<8x128xf32>
      %517 = math.exp %516 : vector<8x128xf32>
      %cst_118 = arith.constant 1.000000e+00 : f32
      %518 = vector.broadcast %cst_118 : f32 to vector<8x128xf32>
      %519 = arith.addf %518, %517 : vector<8x128xf32>
      %520 = arith.divf %518, %519 : vector<8x128xf32>
      %521 = vector.extract_strided_slice %514 {offsets = [0, 128], sizes = [8, 128], strides = [1, 1]} : vector<8x512xf32> to vector<8x128xf32>
      %522 = arith.negf %521 : vector<8x128xf32>
      %523 = math.exp %522 : vector<8x128xf32>
      %cst_119 = arith.constant 1.000000e+00 : f32
      %524 = vector.broadcast %cst_119 : f32 to vector<8x128xf32>
      %525 = arith.addf %524, %523 : vector<8x128xf32>
      %526 = arith.divf %524, %525 : vector<8x128xf32>
      %527 = vector.extract_strided_slice %514 {offsets = [0, 256], sizes = [8, 128], strides = [1, 1]} : vector<8x512xf32> to vector<8x128xf32>
      %528 = vector.extract_strided_slice %514 {offsets = [0, 384], sizes = [8, 128], strides = [1, 1]} : vector<8x512xf32> to vector<8x128xf32>
      %529 = arith.mulf %520, %528 : vector<8x128xf32>
      %530 = arith.addf %527, %529 : vector<8x128xf32>
      %531 = math.tanh %530 : vector<8x128xf32>
      %532 = arith.subf %470, %531 : vector<8x128xf32>
      %533 = arith.mulf %526, %532 : vector<8x128xf32>
      %534 = arith.addf %531, %533 : vector<8x128xf32>
      %535 = arith.addi %2, %c7_i32 : i32
      %536 = vector.broadcast %535 : i32 to vector<8x1xi32>
      %537 = arith.cmpi eq, %23, %536 : vector<8x1xi32>
      %538 = vector.shape_cast %537 : vector<8x1xi1> to vector<8x1xi1>
      %539 = vector.broadcast %538 : vector<8x1xi1> to vector<8x128xi1>
      %540 = arith.select %539, %534, %476 : vector<8x128xi1>, vector<8x128xf32>
      %c8_i32_120 = arith.constant 8 : i32
      %c0_121 = arith.constant 0 : index
      %c0_122 = arith.constant 0 : index
      %c0_123 = arith.constant 0 : index
      %541 = vector.load %arg14[%c0_121, %c0_122, %c0_123] : memref<2x8x128xf32, #tpu.memory_space<vmem>>, vector<1x8x128xf32>
      %542 = vector.shape_cast %541 : vector<1x8x128xf32> to vector<8x128xf32>
      %543 = vector.shape_cast %508 : vector<8x128xf32> to vector<1x8x128xf32>
      tpu.vector_store %arg14[%c0_121, %c0_122, %c0_123], %543 {strides = array<i32>} : memref<2x8x128xf32, #tpu.memory_space<vmem>>, vector<1x8x128xf32>,
      %c1_124 = arith.constant 1 : index
      %c0_125 = arith.constant 0 : index
      %c0_126 = arith.constant 0 : index
      %544 = vector.load %arg14[%c1_124, %c0_125, %c0_126] : memref<2x8x128xf32, #tpu.memory_space<vmem>>, vector<1x8x128xf32>
      %545 = vector.shape_cast %544 : vector<1x8x128xf32> to vector<8x128xf32>
      %546 = vector.shape_cast %534 : vector<8x128xf32> to vector<1x8x128xf32>
      tpu.vector_store %arg14[%c1_124, %c0_125, %c0_126], %546 {strides = array<i32>} : memref<2x8x128xf32, #tpu.memory_space<vmem>>, vector<1x8x128xf32>,
      %c0_127 = arith.constant 0 : index
      %c0_128 = arith.constant 0 : index
      %547 = vector.load %arg15[%c0_127, %c0_128] : memref<8x128xf32, #tpu.memory_space<vmem>>, vector<8x128xf32>
      tpu.vector_store %arg15[%c0_127, %c0_128], %540 {strides = array<i32>} : memref<8x128xf32, #tpu.memory_space<vmem>>, vector<8x128xf32>,
      %548 = arith.cmpi eq, %arg1, %1 : i32
      %549 = arith.extui %548 : i1 to i32
      %c0_i32_129 = arith.constant 0 : i32
      %550 = arith.cmpi ne, %549, %c0_i32_129 : i32
      scf.if %550 {
        %551 = arith.truncf %540 : vector<8x128xf32> to vector<8x128xbf16>
        %c0_130 = arith.constant 0 : index
        %c0_131 = arith.constant 0 : index
        %552 = vector.load %arg11[%c0_130, %c0_131] : memref<128x128xbf16, #tpu.memory_space<vmem>>, vector<128x128xbf16>
        %cst_132 = arith.constant dense<0.000000e+00> : vector<8x128xf32>
        %553 = tpu.matmul %551, %552, %cst_132 {dimension_numbers = #tpu.dot_dimension_numbers<[1], [0], [0], [1], [0, 0, 1, 1], [], []>} : vector<8x128xbf16>, vector<128x128xbf16>, vector<8x128xf32> -> vector<8x128xf32>
        %c0_133 = arith.constant 0 : index
        %c0_134 = arith.constant 0 : index
        %554 = vector.load %arg12[%c0_133, %c0_134] : memref<1x128xf32, #tpu.memory_space<vmem>>, vector<1x128xf32>
        %555 = vector.broadcast %554 : vector<1x128xf32> to vector<8x128xf32>
        %556 = arith.addf %553, %555 : vector<8x128xf32>
        %c0_135 = arith.constant 0 : index
        %c0_136 = arith.constant 0 : index
        %557 = vector.load %arg13[%c0_135, %c0_136] : memref<8x128xf32, #tpu.memory_space<vmem>>, vector<8x128xf32>
        tpu.vector_store %arg13[%c0_135, %c0_136], %556 {strides = array<i32>} : memref<8x128xf32, #tpu.memory_space<vmem>>, vector<8x128xf32>,
      } else {
      }
    } else {
    }
    return
  }
  func.func @transform_0(%arg0: i32, %arg1: i32, %arg2: memref<1xi32, #tpu.memory_space<smem>>) -> (i32, i32) {
    %c0_i32 = arith.constant 0 : i32
    %c0_i32_0 = arith.constant 0 : i32
    return %arg0, %c0_i32 : i32, i32
  }
  func.func @transform_1(%arg0: i32, %arg1: i32, %arg2: memref<1xi32, #tpu.memory_space<smem>>) -> (i32, i32, i32) {
    %0 = arith.index_cast %arg0 : i32 to index
    %1 = memref.load %arg2[%0] : memref<1xi32, #tpu.memory_space<smem>>
    %2 = arith.minsi %arg1, %1 : i32
    %c0_i32 = arith.constant 0 : i32
    %c0_i32_0 = arith.constant 0 : i32
    return %2, %arg0, %c0_i32 : i32, i32, i32
  }
  func.func @transform_2(%arg0: i32, %arg1: i32, %arg2: memref<1xi32, #tpu.memory_space<smem>>) -> (i32, i32) {
    %c0_i32 = arith.constant 0 : i32
    %c0_i32_0 = arith.constant 0 : i32
    %c0_i32_1 = arith.constant 0 : i32
    return %c0_i32, %c0_i32_0 : i32, i32
  }
  func.func @transform_3(%arg0: i32, %arg1: i32, %arg2: memref<1xi32, #tpu.memory_space<smem>>) -> (i32, i32) {
    %c0_i32 = arith.constant 0 : i32
    %c0_i32_0 = arith.constant 0 : i32
    %c0_i32_1 = arith.constant 0 : i32
    return %c0_i32, %c0_i32_0 : i32, i32
  }
  func.func @transform_4(%arg0: i32, %arg1: i32, %arg2: memref<1xi32, #tpu.memory_space<smem>>) -> (i32, i32) {
    %c0_i32 = arith.constant 0 : i32
    %c0_i32_0 = arith.constant 0 : i32
    %c0_i32_1 = arith.constant 0 : i32
    return %c0_i32, %c0_i32_0 : i32, i32
  }
  func.func @transform_5(%arg0: i32, %arg1: i32, %arg2: memref<1xi32, #tpu.memory_space<smem>>) -> (i32, i32) {
    %c0_i32 = arith.constant 0 : i32
    %c0_i32_0 = arith.constant 0 : i32
    %c0_i32_1 = arith.constant 0 : i32
    return %c0_i32, %c0_i32_0 : i32, i32
  }
  func.func @transform_6(%arg0: i32, %arg1: i32, %arg2: memref<1xi32, #tpu.memory_space<smem>>) -> (i32, i32) {
    %c0_i32 = arith.constant 0 : i32
    %c0_i32_0 = arith.constant 0 : i32
    %c0_i32_1 = arith.constant 0 : i32
    return %c0_i32, %c0_i32_0 : i32, i32
  }
  func.func @transform_7(%arg0: i32, %arg1: i32, %arg2: memref<1xi32, #tpu.memory_space<smem>>) -> (i32, i32) {
    %c0_i32 = arith.constant 0 : i32
    %c0_i32_0 = arith.constant 0 : i32
    %c0_i32_1 = arith.constant 0 : i32
    return %c0_i32, %c0_i32_0 : i32, i32
  }
  func.func @transform_8(%arg0: i32, %arg1: i32, %arg2: memref<1xi32, #tpu.memory_space<smem>>) -> (i32, i32) {
    %c0_i32 = arith.constant 0 : i32
    %c0_i32_0 = arith.constant 0 : i32
    %c0_i32_1 = arith.constant 0 : i32
    return %c0_i32, %c0_i32_0 : i32, i32
  }
  func.func @transform_9(%arg0: i32, %arg1: i32, %arg2: memref<1xi32, #tpu.memory_space<smem>>) -> (i32, i32) {
    %c0_i32 = arith.constant 0 : i32
    %c0_i32_0 = arith.constant 0 : i32
    %c0_i32_1 = arith.constant 0 : i32
    return %c0_i32, %c0_i32_0 : i32, i32
  }
  func.func @transform_10(%arg0: i32, %arg1: i32, %arg2: memref<1xi32, #tpu.memory_space<smem>>) -> (i32, i32) {
    %c0_i32 = arith.constant 0 : i32
    %c0_i32_0 = arith.constant 0 : i32
    return %arg0, %c0_i32 : i32, i32
  }
}

</mosaic_0001>

<bundles_post_ra>
// kernel: forward.1
= control target key start
LH: loop header
LB: loop body
LE: loop exit
PB: predicated region body
PF: predicated region fallthrough
CT: control target
= control target key end

     0   :  { %17 = vsyncpa [#allocation8], 0  ;;  %s5759_s0 = inlined_call_operand.<no memory space> [shape: s32[1], index: 0, kind: input, shape index: {}]   ;;  %s5760_s1 = inlined_call_operand.vmem [shape: s32[8,1], index: 1, kind: input, shape index: {}]   ;;  %s5761_s2 = inlined_call_operand.vmem [shape: bf16[8,8,128], index: 2, kind: input, shape index: {}]   ;;  %s5762_s3 = inlined_call_operand.hbm [shape: bf16[128,384], index: 3, kind: input, shape index: {}]   ;;  %s5763_s4 = inlined_call_operand.vmem [shape: f32[1,384], index: 4, kind: input, shape index: {}]   ;;  %s5764_s5 = inlined_call_operand.hbm [shape: bf16[128,384], index: 5, kind: input, shape index: {}]   ;;  %s5765_s6 = inlined_call_operand.vmem [shape: f32[1,384], index: 6, kind: input, shape index: {}]   ;;  %s5766_s7 = inlined_call_operand.hbm [shape: bf16[256,512], index: 7, kind: input, shape index: {}]   ;;  %s5767_s8 = inlined_call_operand.vmem [shape: f32[1,512], index: 8, kind: input, shape index: {}]   ;;  %s5768_s9 = inlined_call_operand.vmem [shape: bf16[128,128], index: 9, kind: input, shape index: {}]   ;;  %s5769_s10 = inlined_call_operand.vmem [shape: f32[1,128], index: 10, kind: input, shape index: {}]   ;;  %s5770_s11 = inlined_call_operand.vmem [shape: f32[8,128], index: 11, kind: output, shape index: {}]  }
   0x1   :  { %18 = vsyncpa [#allocation10], 0  ;;  %s4016_s17 = smov [#allocation9]   ;;  %s4017_s19 = smov [#allocation7]  }
   0x2   :  { %s54_s18 = sshll.u32 %s4016_s17, 4  ;;  %s40_s20 = sshll.u32 %s4017_s19, 4  ;;  %s55_s18 = int_to_ptr.vmem [resolvable:$true] %s54_s18  ;;  %s41_s20 = int_to_ptr.vmem [resolvable:$true] %s40_s20 }
   0x3   :  { %s3960_s21 = scalar_lea.vmem %s55_s18, 3072  ;;  %p3965_p1 = scmp.lt.s32.totalorder %s55_s18, %s55_s18 }
   0x4   :  { %p3961_p0 = scmp.ne.s32.totalorder %s55_s18, %s3960_s21  ;;  %p3966_p2 = scmp.lt.s32.totalorder %s3960_s21, %s3960_s21 }
   0x6   :  { %p3967_p3 = por %p3966_p2, %p3965_p1 }
   0x8   :  { %p3968_p4 = pnand %p3967_p3, %p3961_p0 }
   0xa   :  { %3971 = shalt.err (!%p3968_p4)
}
   0xb   :  { %s4018_s22 = smov 192   ;;  %s4019_s23 = smov 12  }
   0xc   :  { %60 = dma.hbm_to_vmem [thread:$0]  %s5764_s5, 3072, %s55_s18, [#allocation10], %s4018_s22, %s4018_s22, %s4019_s23  }
   0xd   :  { %s3980_s26 = scalar_lea.vmem %s41_s20, 3072  ;;  %p3985_p6 = scmp.lt.s32.totalorder %s41_s20, %s41_s20 }
   0xe   :  { %p3981_p5 = scmp.ne.s32.totalorder %s41_s20, %s3980_s26  ;;  %p3986_p7 = scmp.lt.s32.totalorder %s3980_s26, %s3980_s26 }
  0x10   :  { %p3987_p8 = por %p3986_p7, %p3985_p6 }
  0x12   :  { %p3988_p9 = pnand %p3987_p8, %p3981_p5 }
  0x14   :  { %3991 = shalt.err (!%p3988_p9)
}
  0x15   :  { %46 = dma.hbm_to_vmem [thread:$0]  %s5762_s3, 3072, %s41_s20, [#allocation8], %s4018_s22, %s4018_s22, %s4019_s23  }
  0x16   :  { %s4020_s29 = smov [#allocation11]  }
  0x17   :  { %s68_s30 = sshll.u32 %s4020_s29, 4  ;;  %s69_s30 = int_to_ptr.vmem [resolvable:$true] %s68_s30 }
  0x18   :  { %s4000_s12 = scalar_lea.vmem %s69_s30, 8192  ;;  %p4005_p11 = scmp.lt.s32.totalorder %s69_s30, %s69_s30 }
  0x19   :  { %p4001_p10 = scmp.ne.s32.totalorder %s69_s30, %s4000_s12  ;;  %p4006_p12 = scmp.lt.s32.totalorder %s4000_s12, %s4000_s12 }
  0x1b   :  { %p4007_p13 = por %p4006_p12, %p4005_p11 }
  0x1d   :  { %p4008_p0 = pnand %p4007_p13, %p4001_p10 }
  0x1f   :  { %4011 = shalt.err (!%p4008_p0)
}
  0x20   :  { %s4021_s5 = smov 256   ;;  %s4022_s13 = smov 16  }
  0x21   :  { %74 = dma.hbm_to_vmem [thread:$0]  %s5766_s7, 8192, %s69_s30, [#allocation10], %s4021_s5, %s4021_s5, %s4022_s13  }
  0x22   :  { %4012 = dma.done.wait [#allocation8], 3072  }
  0x23   :  { %4013 = vsyncadd [#allocation8], 4294964224 }
  0x24   :  { %4014 = dma.done.wait [#allocation10], 11264  }
  0x25   :  { %4015 = vsyncadd [#allocation10], 4294956032  ;;  %p2966_p1 = scmp.gt.s32.totalorder %s5759_s0, 0  ;;  %p2970_p3 = scmp.lt.s32.totalorder %s5759_s0, 0 }
  0x27   :  { %s100_s19 = scalar_select %p2966_p1, 0, %s5759_s0 }
  0x29   :  { %s2967_s20 = sshll.u32 %s100_s19, 3 }
  0x2a   :  { %p102_p2 = scmp.lt.s32.totalorder %s2967_s20, 7  ;;  %116 = sbr.rel (%p2970_p3) target bundleno = 2868 (0xb34), region = 57 }
  0x2c   :  { %s6544_s20 = smov (!%p102_p2, %s2967_s20), 7 }
  0x2d   :  { %s2968_s21 = sshll.u32 %s6544_s20, 2 }
  0x2e   :  { %s4107_s7 = scalar_lea.vmem %s5761_s2, %s2968_s21 }
  0x2f   :  { %v3442_v0 = vld [vmem:[#allocation7 + $0xac] ss:$12 sps:$4 sm:$0xff]   ;;  %v3444_v1 = vld [vmem:[#allocation7 + $0xa8] ss:$12 sps:$4 sm:$0xff]   ;;  %v5771_v2 = vmov 0   ;;  %v3467_v11 = vld [vmem:[%s4107_s7] sm:$0xff]  }
  0x30   :  { %365 = vmatprep.mubr.bf16.mxu0 %v5771_v2  ;;  %3440 = vset.pattern.permute.xlu0 %v5771_v2  ;;  %v3445_v3 = vld [vmem:[#allocation7 + $0x94] ss:$12 sps:$4 sm:$0xff]   ;;  %v3447_v4 = vld [vmem:[#allocation7 + $0x90] ss:$12 sps:$4 sm:$0xff]   ;;  %v3450_v6 = vld [vmem:[#allocation7 + $0x78] ss:$12 sps:$4 sm:$0xff]  }
  0x31   :  { %333 = vmatprep.subr.bf16.mxu0 %v3442_v0  ;;  %3441 = vset.pattern.permute.xlu1 %v5771_v2  ;;  %v3448_v5 = vld [vmem:[#allocation7 + $0x7c] ss:$12 sps:$4 sm:$0xff]   ;;  %v3451_v7 = vld [vmem:[#allocation7 + $0x64] ss:$12 sps:$4 sm:$0xff]   ;;  %v3453_v8 = vld [vmem:[#allocation7 + $0x60] ss:$12 sps:$4 sm:$0xff]  }
  0x32   :  { %334 = vmatpush1.bf16.msra.mxu0 %v3444_v1  ;;  %v3454_v9 = vld [vmem:[#allocation7 + $0x4c] ss:$12 sps:$4 sm:$0xff]   ;;  %v3466_v10 = vld [vmem:[#allocation7 + $0xb0] ss:$12 sps:$4 sm:$0xff]   ;;  %v3456_v12 = vld [vmem:[#allocation7 + $0x48] ss:$12 sps:$4 sm:$0xff]   ;;  %3239 = vmatprep.mubr.bf16.mxu1 %v3467_v11 }
  0x33   :  { %335 = vmatprep.subr.bf16.mxu0 %v3445_v3  ;;  %3223 = vmatprep.subr.bf16.mxu1 %v3466_v10  ;;  %v3470_v13 = vld [vmem:[#allocation7 + $0x98] ss:$12 sps:$4 sm:$0xff]   ;;  %v3457_v14 = vld [vmem:[#allocation7 + $0x34] ss:$12 sps:$4 sm:$0xff]   ;;  %v3459_v16 = vld [vmem:[#allocation7 + $0x30] ss:$12 sps:$4 sm:$0xff]  }
  0x34   :  { %3224 = vmatpush3.bf16.msra.mxu1 %v3466_v10  ;;  %v3474_v15 = vld [vmem:[#allocation7 + $0x80] ss:$12 sps:$4 sm:$0xff]   ;;  %v3460_v17 = vld [vmem:[#allocation7 + $0x1c] ss:$12 sps:$4 sm:$0xff]   ;;  %v3462_v19 = vld [vmem:[#allocation7 + $0x18] ss:$12 sps:$4 sm:$0xff]  }
  0x35   :  { %3225 = vmatprep.subr.bf16.mxu1 %v3470_v13  ;;  %v3479_v18 = vld [vmem:[#allocation7 + $0x68] ss:$12 sps:$4 sm:$0xff]   ;;  %v3483_v20 = vld [vmem:[#allocation7 + $0x50] ss:$12 sps:$4 sm:$0xff]   ;;  %v3465_v22 = vld [vmem:[#allocation7] ss:$12 sps:$4 sm:$0xff]  }
  0x36   :  { %336 = vmatpush1.bf16.msra.mxu0 %v3447_v4  ;;  %v3463_v21 = vld [vmem:[#allocation7 + $0x4] ss:$12 sps:$4 sm:$0xff]   ;;  %v4116_v24 = vld [vmem:[#allocation9 + $0xac] ss:$12 sps:$4 sm:$0xff]   ;;  %v4118_v25 = vld [vmem:[#allocation9 + $0xa8] ss:$12 sps:$4 sm:$0xff]  }
  0x37   :  { %337 = vmatprep.subr.bf16.mxu0 %v3448_v5  ;;  %v3488_v23 = vld [vmem:[#allocation7 + $0x38] ss:$12 sps:$4 sm:$0xff]   ;;  %6063 = vst [vmem:[#allocation14_spill] sm:$0xff] %v4116_v24  ;;  %v4120_v26 = vld [vmem:[#allocation9 + $0x94] ss:$12 sps:$4 sm:$0xff]   ;;  %v3476_v31 = vld [vmem:[%s4107_s7 + $0x8] sm:$0xff]  }
  0x38   :  { %3226 = vmatpush3.bf16.msra.mxu1 %v3470_v13  ;;  %v3492_v27 = vld [vmem:[#allocation7 + $0x20] ss:$12 sps:$4 sm:$0xff]   ;;  %v4123_v28 = vld [vmem:[#allocation9 + $0x90] ss:$12 sps:$4 sm:$0xff]   ;;  %v3497_v29 = vld [vmem:[#allocation7 + $0x8] ss:$12 sps:$4 sm:$0xff]  }
  0x39   :  { %3227 = vmatprep.subr.bf16.mxu1 %v3474_v15  ;;  %v4128_v30 = vld [vmem:[#allocation9 + $0x7c] ss:$12 sps:$4 sm:$0xff]   ;;  %v4132_v32 = vld [vmem:[#allocation9 + $0x78] ss:$12 sps:$4 sm:$0xff]   ;;  %v4137_v34 = vld [vmem:[#allocation9 + $0x60] ss:$12 sps:$4 sm:$0xff]  }
  0x3a   :  { %338 = vmatpush1.bf16.msra.mxu0 %v3450_v6  ;;  %v4135_v33 = vld [vmem:[#allocation9 + $0x64] ss:$12 sps:$4 sm:$0xff]   ;;  %v4142_v37 = vld [vmem:[#allocation9 + $0x4c] ss:$12 sps:$4 sm:$0xff]   ;;  %v5773_v38 = vmov 0.0   ;;  %vm4025_vm0 = vmmov 0  }
  0x3b   :  { %339 = vmatprep.subr.bf16.mxu0 %v3451_v7  ;;  %v4139_v35 = vld [vmem:[#allocation9 + $0xb0] ss:$12 sps:$4 sm:$0xff]   ;;  %v4148_v39 = vld [vmem:[#allocation9 + $0x98] ss:$12 sps:$4 sm:$0xff]   ;;  %v4150_v40 = vld [vmem:[#allocation9 + $0x48] ss:$12 sps:$4 sm:$0xff]  }
  0x3c   :  { %3228 = vmatpush3.bf16.msra.mxu1 %v3474_v15  ;;  %v3485_v36 = vld [vmem:[%s4107_s7 + $0x10] sm:$0xff]   ;;  %v4158_v42 = vld [vmem:[#allocation9 + $0x80] ss:$12 sps:$4 sm:$0xff]   ;;  %v3494_v44 = vld [vmem:[%s4107_s7 + $0x18] sm:$0xff]   ;;  %v4026_v52 = vmov 0.0|0.0   ;;  %p3120_p4 = scmp.ne.s32.totalorder %s5759_s0, 0 }
  0x3d   :  { %3229 = vmatprep.subr.bf16.mxu1 %v3479_v18  ;;  %v4152_v41 = vld [vmem:[#allocation9 + $0x34] ss:$12 sps:$4 sm:$0xff]   ;;  %v4160_v43 = vld [vmem:[#allocation9 + $0x30] ss:$12 sps:$4 sm:$0xff]   ;;  %v4172_v47 = vld [vmem:[#allocation9 + $0x18] ss:$12 sps:$4 sm:$0xff]  }
  0x3e   :  { %340 = vmatpush1.bf16.msra.mxu0 %v3453_v8  ;;  %v4163_v45 = vld [vmem:[#allocation9 + $0x1c] ss:$12 sps:$4 sm:$0xff]   ;;  %v4174_v48 = vld [vmem:[#allocation9 + $0x4] ss:$12 sps:$4 sm:$0xff]   ;;  %v4184_v50 = vld [vmem:[#allocation9] ss:$12 sps:$4 sm:$0xff]  }
  0x3f   :  { %341 = vmatprep.subr.bf16.mxu0 %v3454_v9  ;;  %v4170_v46 = vld [vmem:[#allocation9 + $0x68] ss:$12 sps:$4 sm:$0xff]   ;;  %v4182_v49 = vld [vmem:[#allocation9 + $0x50] ss:$12 sps:$4 sm:$0xff]   ;;  %v4191_v51 = vld [vmem:[#allocation9 + $0x38] ss:$12 sps:$4 sm:$0xff]  }
  0x40   :  { %3230 = vmatpush3.bf16.msra.mxu1 %v3479_v18  ;;  %v4197_v53 = vld [vmem:[#allocation9 + $0x20] ss:$12 sps:$4 sm:$0xff]   ;;  %v4201_v54 = vld [vmem:[#allocation9 + $0x8] ss:$12 sps:$4 sm:$0xff]  }
  0x41   :  { %3231 = vmatprep.subr.bf16.mxu1 %v3483_v20  ;;  %v4205_v55 = vld [vmem:[#allocation11 + $0xe4] ss:$16 sps:$4 sm:$0xff]   ;;  %v4207_v56 = vld [vmem:[#allocation11 + $0xec] ss:$16 sps:$4 sm:$0xff]   ;;  %v4209_v57 = vld [vmem:[#allocation11 + $0xe0] ss:$16 sps:$4 sm:$0xff]  }
  0x42   :  { %342 = vmatpush1.bf16.msra.mxu0 %v3456_v12  ;;  %v4211_v58 = vld [vmem:[#allocation11 + $0xe8] ss:$16 sps:$4 sm:$0xff]   ;;  %v4217_v59 = vld [vmem:[#allocation11 + $0xc4] ss:$16 sps:$4 sm:$0xff]   ;;  %v4219_v60 = vld [vmem:[#allocation11 + $0xcc] ss:$16 sps:$4 sm:$0xff]  }
  0x43   :  { %343 = vmatprep.subr.bf16.mxu0 %v3457_v14  ;;  %v4221_v61 = vld [vmem:[#allocation11 + $0xc0] ss:$16 sps:$4 sm:$0xff]   ;;  %v4223_v62 = vld [vmem:[#allocation11 + $0xc8] ss:$16 sps:$4 sm:$0xff]   ;;  %v4229_v63 = vld [vmem:[#allocation11 + $0xa4] ss:$16 sps:$4 sm:$0xff]  }
  0x44   :  { %3232 = vmatpush3.bf16.msra.mxu1 %v3483_v20  ;;  %v4231_v0 = vld [vmem:[#allocation11 + $0xac] ss:$16 sps:$4 sm:$0xff]   ;;  %v4233_v1 = vld [vmem:[#allocation11 + $0xa0] ss:$16 sps:$4 sm:$0xff]   ;;  %v4235_v3 = vld [vmem:[#allocation11 + $0xa8] ss:$16 sps:$4 sm:$0xff]  }
  0x45   :  { %3233 = vmatprep.subr.bf16.mxu1 %v3488_v23  ;;  %v4241_v4 = vld [vmem:[#allocation11 + $0x84] ss:$16 sps:$4 sm:$0xff]   ;;  %v4243_v5 = vld [vmem:[#allocation11 + $0x8c] ss:$16 sps:$4 sm:$0xff]   ;;  %v4245_v6 = vld [vmem:[#allocation11 + $0x80] ss:$16 sps:$4 sm:$0xff]  }
  0x46   :  { %344 = vmatpush1.bf16.msra.mxu0 %v3459_v16  ;;  %6064 = vst [vmem:[#allocation15_spill] sm:$0xff] %v4245_v6  ;;  %v4247_v7 = vld [vmem:[#allocation11 + $0x88] ss:$16 sps:$4 sm:$0xff]   ;;  %v4253_v8 = vld [vmem:[#allocation11 + $0x64] ss:$16 sps:$4 sm:$0xff]  }
  0x47   :  { %345 = vmatprep.subr.bf16.mxu0 %v3460_v17  ;;  %6065 = vst [vmem:[#allocation16_spill] sm:$0xff] %v4247_v7  ;;  %6066 = vst [vmem:[#allocation17_spill] sm:$0xff] %v4253_v8  ;;  %v4255_v9 = vld [vmem:[#allocation11 + $0x6c] ss:$16 sps:$4 sm:$0xff]   ;;  %v4257_v10 = vld [vmem:[#allocation11 + $0x60] ss:$16 sps:$4 sm:$0xff]  }
  0x48   :  { %3234 = vmatpush3.bf16.msra.mxu1 %v3488_v23  ;;  %6067 = vst [vmem:[#allocation18_spill] sm:$0xff] %v4255_v9  ;;  %6068 = vst [vmem:[#allocation19_spill] sm:$0xff] %v4257_v10  ;;  %v4265_v12 = vld [vmem:[#allocation11 + $0x44] ss:$16 sps:$4 sm:$0xff]   ;;  %v4267_v13 = vld [vmem:[#allocation11 + $0x4c] ss:$16 sps:$4 sm:$0xff]  }
  0x49   :  { %3235 = vmatprep.subr.bf16.mxu1 %v3492_v27  ;;  %6070 = vst [vmem:[#allocation21_spill] sm:$0xff] %v4265_v12  ;;  %6071 = vst [vmem:[#allocation22_spill] sm:$0xff] %v4267_v13  ;;  %v4269_v14 = vld [vmem:[#allocation11 + $0x40] ss:$16 sps:$4 sm:$0xff]   ;;  %v4271_v15 = vld [vmem:[#allocation11 + $0x48] ss:$16 sps:$4 sm:$0xff]  }
  0x4a   :  { %346 = vmatpush1.bf16.msra.mxu0 %v3462_v19  ;;  %6072 = vst [vmem:[#allocation23_spill] sm:$0xff] %v4269_v14  ;;  %6073 = vst [vmem:[#allocation24_spill] sm:$0xff] %v4271_v15  ;;  %v4277_v16 = vld [vmem:[#allocation11 + $0x24] ss:$16 sps:$4 sm:$0xff]   ;;  %v4279_v17 = vld [vmem:[#allocation11 + $0x2c] ss:$16 sps:$4 sm:$0xff]  }
  0x4b   :  { %347 = vmatprep.subr.bf16.mxu0 %v3463_v21  ;;  %6074 = vst [vmem:[#allocation25_spill] sm:$0xff] %v4277_v16  ;;  %6075 = vst [vmem:[#allocation26_spill] sm:$0xff] %v4279_v17  ;;  %v4281_v18 = vld [vmem:[#allocation11 + $0x20] ss:$16 sps:$4 sm:$0xff]   ;;  %v4283_v19 = vld [vmem:[#allocation11 + $0x28] ss:$16 sps:$4 sm:$0xff]  }
  0x4c   :  { %3236 = vmatpush3.bf16.msra.mxu1 %v3492_v27  ;;  %6076 = vst [vmem:[#allocation27_spill] sm:$0xff] %v4281_v18  ;;  %6077 = vst [vmem:[#allocation28_spill] sm:$0xff] %v4283_v19  ;;  %v4289_v20 = vld [vmem:[#allocation11 + $0x4] ss:$16 sps:$4 sm:$0xff]   ;;  %v4291_v21 = vld [vmem:[#allocation11 + $0xc] ss:$16 sps:$4 sm:$0xff]  }
  0x4d   :  { %3237 = vmatprep.subr.bf16.mxu1 %v3497_v29  ;;  %6078 = vst [vmem:[#allocation29_spill] sm:$0xff] %v4289_v20  ;;  %6079 = vst [vmem:[#allocation30_spill] sm:$0xff] %v4291_v21  ;;  %v4295_v23 = vld [vmem:[#allocation11 + $0x8] ss:$16 sps:$4 sm:$0xff]   ;;  %v4301_v27 = vld [vmem:[#allocation11 + $0x1e4] ss:$16 sps:$4 sm:$0xff]  }
  0x4e   :  { %348 = vmatpush1.bf16.msra.mxu0 %v3465_v22  ;;  %v4293_v22 = vld [vmem:[#allocation11] ss:$16 sps:$4 sm:$0xff]   ;;  %6081 = vst [vmem:[#allocation32_spill] sm:$0xff] %v4295_v23  ;;  %6082 = vst [vmem:[#allocation33_spill] sm:$0xff] %v4301_v27 }
  0x4f   :  { %706 = vmatprep.subr.bf16.mxu0 %v4116_v24  ;;  %6080 = vst [vmem:[#allocation31_spill] sm:$0xff] %v4293_v22 }
  0x50   :  { %3238 = vmatpush3.bf16.msra.mxu1 %v3497_v29  ;;  %v4303_v29 = vld [vmem:[#allocation11 + $0x1ec] ss:$16 sps:$4 sm:$0xff]  }
  0x51   :  { %366 = vmatmul.mubr.bf16.vlgmr.msra.gmra.mxu0 %v3467_v11  ;;  %3247 = vmatprep.subr.bf16.mxu1 %v5773_v38  ;;  %v4259_v11 = vld [vmem:[#allocation11 + $0x68] ss:$16 sps:$4 sm:$0xff]   ;;  %6083 = vst [vmem:[#allocation34_spill] sm:$0xff] %v4303_v29 }
  0x52   :  { %707 = vmatpush1.bf16.msra.mxu0 %v4118_v25  ;;  %375 = vmatprep.mubr.bf16.mxu0 %v5771_v2  ;;  %6069 = vst [vmem:[#allocation20_spill] sm:$0xff] %v4259_v11 }
  0x53   :  { %708 = vmatprep.subr.bf16.mxu0 %v4120_v26  ;;  %3240 = vmatmul.mubr.bf16.vlgmr.msra.gmra.mxu1 %v3476_v31 }
  0x54   :  { %3248 = vmatpush3.bf16.msra.mxu1 %v4139_v35  ;;  %3243 = vmatprep.mubr.bf16.mxu1 %v3485_v36 }
  0x55   :  { %3249 = vmatprep.subr.bf16.mxu1 %v5773_v38 }
  0x56   :  { %709 = vmatpush1.bf16.msra.mxu0 %v4123_v28 }
  0x57   :  { %710 = vmatprep.subr.bf16.mxu0 %v4128_v30 }
  0x58   :  { %3250 = vmatpush3.bf16.msra.mxu1 %v4148_v39 }
  0x59   :  { %376 = vmatmul.mubr.bf16.gmra.mxu0 %v3476_v31  ;;  %3251 = vmatprep.subr.bf16.mxu1 %v5773_v38  ;;  %v4305_v31 = vld [vmem:[#allocation11 + $0x1e0] ss:$16 sps:$4 sm:$0xff]  }
  0x5a   :  { %711 = vmatpush1.bf16.msra.mxu0 %v4132_v32  ;;  %385 = vmatprep.mubr.bf16.mxu0 %v5771_v2  ;;  %6084 = vst [vmem:[#allocation35_spill] sm:$0xff] %v4305_v31 }
  0x5b   :  { %712 = vmatprep.subr.bf16.mxu0 %v4135_v33  ;;  %3244 = vmatmul.mubr.bf16.gmra.mxu1 %v3494_v44 }
  0x5c   :  { %3252 = vmatpush3.bf16.msra.mxu1 %v4158_v42  ;;  %3263 = vmatprep.mubr.msk.bf16.mxu1 %vm4025_vm0, %v5773_v38 }
  0x5d   :  { %3253 = vmatprep.subr.bf16.mxu1 %v5773_v38 }
  0x5e   :  { %713 = vmatpush1.bf16.msra.mxu0 %v4137_v34 }
  0x5f   :  { %714 = vmatprep.subr.bf16.mxu0 %v4142_v37 }
  0x60   :  { %3254 = vmatpush3.bf16.msra.mxu1 %v4170_v46 }
  0x61   :  { %386 = vmatmul.mubr.bf16.gmra.mxu0 %v3485_v36  ;;  %3255 = vmatprep.subr.bf16.mxu1 %v5773_v38  ;;  %v4307_v36 = vld [vmem:[#allocation11 + $0x1e8] ss:$16 sps:$4 sm:$0xff]  }
  0x62   :  { %715 = vmatpush1.bf16.msra.mxu0 %v4150_v40  ;;  %395 = vmatprep.mubr.bf16.mxu0 %v5771_v2  ;;  %6085 = vst [vmem:[#allocation36_spill] sm:$0xff] %v4307_v36 }
  0x63   :  { %716 = vmatprep.subr.bf16.mxu0 %v4152_v41 }
  0x64   :  { %3256 = vmatpush3.bf16.msra.mxu1 %v4182_v49 }
  0x65   :  { %3257 = vmatprep.subr.bf16.mxu1 %v5773_v38 }
  0x66   :  { %717 = vmatpush1.bf16.msra.mxu0 %v4160_v43 }
  0x67   :  { %718 = vmatprep.subr.bf16.mxu0 %v4163_v45 }
  0x68   :  { %3258 = vmatpush3.bf16.msra.mxu1 %v4191_v51 }
  0x69   :  { %396 = vmatmul.mubr.bf16.gmra.mxu0 %v3494_v44  ;;  %3259 = vmatprep.subr.bf16.mxu1 %v5773_v38  ;;  %v4313_v44 = vld [vmem:[#allocation11 + $0x1c4] ss:$16 sps:$4 sm:$0xff]  }
  0x6a   :  { %719 = vmatpush1.bf16.msra.mxu0 %v4172_v47  ;;  %738 = vmatprep.mubr.bf16.mxu0 %v5771_v2  ;;  %6086 = vst [vmem:[#allocation37_spill] sm:$0xff] %v4313_v44  ;;  %v4317_v2 = vld [vmem:[#allocation11 + $0x1c0] ss:$16 sps:$4 sm:$0xff]  }
  0x6b   :  { %720 = vmatprep.subr.bf16.mxu0 %v4174_v48  ;;  %6088 = vst [vmem:[#allocation39_spill] sm:$0xff] %v4317_v2 }
  0x6c   :  { %3260 = vmatpush3.bf16.msra.mxu1 %v4197_v53 }
  0x6d   :  { %3261 = vmatprep.subr.bf16.mxu1 %v5773_v38  ;;  %v4319_v38 = vld [vmem:[#allocation11 + $0x1c8] ss:$16 sps:$4 sm:$0xff]  }
  0x6e   :  { %721 = vmatpush1.bf16.msra.mxu0 %v4184_v50  ;;  %6089 = vst [vmem:[#allocation40_spill] sm:$0xff] %v4319_v38 }
  0x6f   :  { %1193 = vmatprep.subr.bf16.mxu0 %v4205_v55 }
  0x70   :  { %3262 = vmatpush3.bf16.msra.mxu1 %v4201_v54 }
  0x71   :  { %739 = vmatmul.mubr.bf16.vlgmr.msra.gmra.mxu0 %v4026_v52  ;;  %1234 = vmatprep.subr.bf16.mxu1 %v4207_v56 }
  0x72   :  { %1225 = vmatprep.mubr.bf16.mxu0 %v4026_v52  ;;  %1194 = vmatpush1.bf16.msra.mxu0 %v4209_v57 }
  0x73   :  { %3264 = vmatmul.mubr.bf16.vlgmr.msra.gmra.mxu1 %v4026_v52  ;;  %1195 = vmatprep.subr.bf16.mxu0 %v4217_v59 }
  0x74   :  { %1266 = vmatprep.mubr.bf16.mxu1 %v4026_v52  ;;  %1235 = vmatpush1.bf16.msra.mxu1 %v4211_v58  ;;  %v4315_v52 = vld [vmem:[#allocation11 + $0x1cc] ss:$16 sps:$4 sm:$0xff]  }
  0x75   :  { %1236 = vmatprep.subr.bf16.mxu1 %v4219_v60  ;;  %6087 = vst [vmem:[#allocation38_spill] sm:$0xff] %v4315_v52 }
  0x76   :  { %1196 = vmatpush1.bf16.msra.mxu0 %v4221_v61 }
  0x77   :  { %1197 = vmatprep.subr.bf16.mxu0 %v4229_v63 }
  0x78   :  { %1237 = vmatpush1.bf16.msra.mxu1 %v4223_v62 }
  0x79   :  { %1238 = vmatprep.subr.bf16.mxu1 %v4231_v0 }
  0x7a   :  { %1198 = vmatpush1.bf16.msra.mxu0 %v4233_v1 }
  0x7b   :  { %1199 = vmatprep.subr.bf16.mxu0 %v4241_v4 }
  0x7c   :  { %1239 = vmatpush1.bf16.msra.mxu1 %v4235_v3 }
  0x7d   :  { %1240 = vmatprep.subr.bf16.mxu1 %v4243_v5 }
  0x7e   :  { %1200 = vmatpush1.bf16.msra.mxu0 %v4245_v6 }
  0x7f   :  { %1201 = vmatprep.subr.bf16.mxu0 %v4253_v8 }
  0x80   :  { %1241 = vmatpush1.bf16.msra.mxu1 %v4247_v7 }
  0x81   :  { %1242 = vmatprep.subr.bf16.mxu1 %v4255_v9 }
  0x82   :  { %1202 = vmatpush1.bf16.msra.mxu0 %v4257_v10 }
  0x83   :  { %1203 = vmatprep.subr.bf16.mxu0 %v4265_v12 }
  0x84   :  { %1243 = vmatpush1.bf16.msra.mxu1 %v4259_v11 }
  0x85   :  { %1244 = vmatprep.subr.bf16.mxu1 %v4267_v13 }
  0x86   :  { %1204 = vmatpush1.bf16.msra.mxu0 %v4269_v14 }
  0x87   :  { %1205 = vmatprep.subr.bf16.mxu0 %v4277_v16 }
  0x88   :  { %1245 = vmatpush1.bf16.msra.mxu1 %v4271_v15 }
  0x89   :  { %1246 = vmatprep.subr.bf16.mxu1 %v4279_v17 }
  0x8a   :  { %1206 = vmatpush1.bf16.msra.mxu0 %v4281_v18 }
  0x8b   :  { %1207 = vmatprep.subr.bf16.mxu0 %v4289_v20 }
  0x8c   :  { %1247 = vmatpush1.bf16.msra.mxu1 %v4283_v19 }
  0x8d   :  { %1248 = vmatprep.subr.bf16.mxu1 %v4291_v21 }
  0x8e   :  { %1208 = vmatpush1.bf16.msra.mxu0 %v4293_v22  ;;  %v4361_v22 = vld [vmem:[#allocation11 + $0x14c] ss:$16 sps:$4 sm:$0xff]  }
  0x8f   :  { %1209 = vmatprep.subr.bf16.mxu0 %v4301_v27  ;;  %v4331_v27 = vld [vmem:[#allocation11 + $0x1a8] ss:$16 sps:$4 sm:$0xff]   ;;  %6103 = vst [vmem:[#allocation54_spill] sm:$0xff] %v4361_v22 }
  0x90   :  { %1249 = vmatpush1.bf16.msra.mxu1 %v4295_v23  ;;  %6093 = vst [vmem:[#allocation44_spill] sm:$0xff] %v4331_v27  ;;  %v4345_v23 = vld [vmem:[#allocation11 + $0x164] ss:$16 sps:$4 sm:$0xff]  }
  0x91   :  { %1250 = vmatprep.subr.bf16.mxu1 %v4303_v29  ;;  %v4325_v29 = vld [vmem:[#allocation11 + $0x1a4] ss:$16 sps:$4 sm:$0xff]   ;;  %6098 = vst [vmem:[#allocation49_spill] sm:$0xff] %v4345_v23 }
  0x92   :  { %1210 = vmatpush2.bf16.msra.mxu0 %v4305_v31  ;;  %6090 = vst [vmem:[#allocation41_spill] sm:$0xff] %v4325_v29  ;;  %v4327_v31 = vld [vmem:[#allocation11 + $0x1ac] ss:$16 sps:$4 sm:$0xff]  }
  0x93   :  { %1211 = vmatprep.subr.bf16.mxu0 %v4313_v44  ;;  %6091 = vst [vmem:[#allocation42_spill] sm:$0xff] %v4327_v31  ;;  %v4343_v44 = vld [vmem:[#allocation11 + $0x188] ss:$16 sps:$4 sm:$0xff]  }
  0x94   :  { %1251 = vmatpush2.bf16.msra.mxu1 %v4307_v36  ;;  %v4329_v36 = vld [vmem:[#allocation11 + $0x1a0] ss:$16 sps:$4 sm:$0xff]   ;;  %6097 = vst [vmem:[#allocation48_spill] sm:$0xff] %v4343_v44 }
  0x95   :  { %1252 = vmatprep.subr.bf16.mxu1 %v4315_v52  ;;  %6092 = vst [vmem:[#allocation43_spill] sm:$0xff] %v4329_v36  ;;  %v4337_v52 = vld [vmem:[#allocation11 + $0x184] ss:$16 sps:$4 sm:$0xff]  }
  0x96   :  { %1212 = vmatpush2.bf16.msra.mxu0 %v4317_v2  ;;  %6094 = vst [vmem:[#allocation45_spill] sm:$0xff] %v4337_v52  ;;  %v4339_v2 = vld [vmem:[#allocation11 + $0x18c] ss:$16 sps:$4 sm:$0xff]  }
  0x97   :  { %1213 = vmatprep.subr.bf16.mxu0 %v4325_v29  ;;  %6095 = vst [vmem:[#allocation46_spill] sm:$0xff] %v4339_v2  ;;  %v4349_v29 = vld [vmem:[#allocation11 + $0x16c] ss:$16 sps:$4 sm:$0xff]  }
  0x98   :  { %1253 = vmatpush2.bf16.msra.mxu1 %v4319_v38  ;;  %v4341_v38 = vld [vmem:[#allocation11 + $0x180] ss:$16 sps:$4 sm:$0xff]   ;;  %6099 = vst [vmem:[#allocation50_spill] sm:$0xff] %v4349_v29 }
  0x99   :  { %1254 = vmatprep.subr.bf16.mxu1 %v4327_v31  ;;  %6096 = vst [vmem:[#allocation47_spill] sm:$0xff] %v4341_v38  ;;  %v4359_v31 = vld [vmem:[#allocation11 + $0x144] ss:$16 sps:$4 sm:$0xff]  }
  0x9a   :  { %1214 = vmatpush2.bf16.msra.mxu0 %v4329_v36  ;;  %v4355_v36 = vld [vmem:[#allocation11 + $0x168] ss:$16 sps:$4 sm:$0xff]   ;;  %6102 = vst [vmem:[#allocation53_spill] sm:$0xff] %v4359_v31 }
  0x9b   :  { %1215 = vmatprep.subr.bf16.mxu0 %v4337_v52  ;;  %6101 = vst [vmem:[#allocation52_spill] sm:$0xff] %v4355_v36 }
  0x9c   :  { %1255 = vmatpush2.bf16.msra.mxu1 %v4331_v27  ;;  %v4353_v27 = vld [vmem:[#allocation11 + $0x160] ss:$16 sps:$4 sm:$0xff]  }
  0x9d   :  { %1256 = vmatprep.subr.bf16.mxu1 %v4339_v2  ;;  %6100 = vst [vmem:[#allocation51_spill] sm:$0xff] %v4353_v27  ;;  %v4365_v2 = vld [vmem:[#allocation11 + $0x140] ss:$16 sps:$4 sm:$0xff]  }
  0x9e   :  { %1216 = vmatpush2.bf16.msra.mxu0 %v4341_v38  ;;  %6104 = vst [vmem:[#allocation55_spill] sm:$0xff] %v4365_v2  ;;  %v4367_v38 = vld [vmem:[#allocation11 + $0x148] ss:$16 sps:$4 sm:$0xff]  }
  0x9f   :  { %1217 = vmatprep.subr.bf16.mxu0 %v4345_v23  ;;  %6105 = vst [vmem:[#allocation56_spill] sm:$0xff] %v4367_v38  ;;  %v4373_v23 = vld [vmem:[#allocation11 + $0x12c] ss:$16 sps:$4 sm:$0xff]  }
  0xa0   :  { %1257 = vmatpush2.bf16.msra.mxu1 %v4343_v44  ;;  %v4371_v44 = vld [vmem:[#allocation11 + $0x124] ss:$16 sps:$4 sm:$0xff]   ;;  %6107 = vst [vmem:[#allocation58_spill] sm:$0xff] %v4373_v23 }
  0xa1   :  { %1258 = vmatprep.subr.bf16.mxu1 %v4349_v29  ;;  %6106 = vst [vmem:[#allocation57_spill] sm:$0xff] %v4371_v44  ;;  %v4377_v29 = vld [vmem:[#allocation11 + $0x120] ss:$16 sps:$4 sm:$0xff]  }
  0xa2   :  { %1218 = vmatpush2.bf16.msra.mxu0 %v4353_v27  ;;  %6108 = vst [vmem:[#allocation59_spill] sm:$0xff] %v4377_v29  ;;  %v4379_v27 = vld [vmem:[#allocation11 + $0x128] ss:$16 sps:$4 sm:$0xff]  }
  0xa3   :  { %1219 = vmatprep.subr.bf16.mxu0 %v4359_v31  ;;  %6109 = vst [vmem:[#allocation60_spill] sm:$0xff] %v4379_v27  ;;  %v4385_v31 = vld [vmem:[#allocation11 + $0x10c] ss:$16 sps:$4 sm:$0xff]  }
  0xa4   :  { %1259 = vmatpush2.bf16.msra.mxu1 %v4355_v36  ;;  %v4383_v36 = vld [vmem:[#allocation11 + $0x104] ss:$16 sps:$4 sm:$0xff]   ;;  %6111 = vst [vmem:[#allocation62_spill] sm:$0xff] %v4385_v31 }
  0xa5   :  { %1260 = vmatprep.subr.bf16.mxu1 %v4361_v22  ;;  %6110 = vst [vmem:[#allocation61_spill] sm:$0xff] %v4383_v36  ;;  %v4389_v22 = vld [vmem:[#allocation11 + $0x100] ss:$16 sps:$4 sm:$0xff]  }
  0xa6   :  { %1220 = vmatpush2.bf16.msra.mxu0 %v4365_v2  ;;  %6112 = vst [vmem:[#allocation63_spill] sm:$0xff] %v4389_v22  ;;  %v4391_v2 = vld [vmem:[#allocation11 + $0x108] ss:$16 sps:$4 sm:$0xff]  }
  0xa7   :  { %1221 = vmatprep.subr.bf16.mxu0 %v4371_v44  ;;  %6113 = vst [vmem:[#allocation64_spill] sm:$0xff] %v4391_v2  ;;  %v166_v44 = vlaneseq }
  0xa8   :  { %1261 = vmatpush2.bf16.msra.mxu1 %v4367_v38 }
  0xa9   :  { %1262 = vmatprep.subr.bf16.mxu1 %v4373_v23  ;;  %v6114_v23 = vmov 0.0  }
  0xaa   :  { %1222 = vmatpush2.bf16.msra.mxu0 %v4377_v29  ;;  %v4399_v29 = vshrl.u32 %v166_v44, 7  ;;  %v6118_v44 = vmov 0  }
  0xab   :  { %1223 = vmatprep.subr.bf16.mxu0 %v4383_v36  ;;  %v4407_v36 = vld [vmem:[%s5760_s1] sm:$0xff] }
  0xac   :  { %1263 = vmatpush2.bf16.msra.mxu1 %v4379_v27  ;;  %6115 = vst [vmem:[#allocation65_spill] sm:$0xff] %v4399_v29  ;;  %v4402_v27 = vsub.s32 0, %v4399_v29  ;;  %6117 = vst [vmem:[#allocation67_spill] sm:$0xff] %v4407_v36  ;;  %vm1294_vm1 = vcmp.eq.s32.totalorder %v4407_v36, 0  ;;  %v4421_v20 = vsub.s32 2, %v4399_v29 }
  0xad   :  { %1264 = vmatprep.subr.bf16.mxu1 %v4385_v31  ;;  %v1295_v31 = vsel %vm1294_vm1, 1, %v6118_v44 }
  0xae   :  { %1224 = vmatpush2.bf16.msra.mxu0 %v4389_v22  ;;  %6116 = vst [vmem:[#allocation66_spill] sm:$0xff] %v4402_v27  ;;  %v164_v22 = vld [vmem:[%s5763_s4] sm:$0x7]  ;;  %1297 = vperm.xlu0 %3440, %v1295_v31  }
  0xaf   :  { %1307 = vmatprep.subr.bf16.mxu0 %v4116_v24  ;;  %v4414_v24 = vsub.s32 1, %v4399_v29  ;;  %v169_v52 = vrot.slane %v164_v22, %v4402_v27  ;;  %v4429_v15 = vrot.slane %v164_v22, %v4421_v20 }
  0xb0   :  { %1265 = vmatpush2.bf16.msra.mxu1 %v4391_v2 }
  0xb1   :  { %3267 = vmatprep.subr.bf16.mxu1 %v6114_v23  ;;  %v173_v19 = vrot.slane %v164_v22, %v4414_v24 }
 0x111   :  { %v367_v2 = vpop.f32.mrf.mxu0 }
 0x113   :  { %v4417_v38 = vpop.f32.mrf.mxu0  ;;  %v3241_v12 = vpop.f32.mrf.mxu1 }
 0x114   :  { %v4436_v29 = vadd.f32 %v3241_v12, %v4429_v15 }
 0x115   :  { %v371_v21 = vpop.f32.mrf.mxu0 }
 0x116   :  { %v4424_v18 = vadd.f32 %v371_v21, %v169_v52  ;;  %6123 = vst [vmem:[#allocation72_spill] sm:$0xff] %v4436_v29  ;;  %v440_v21 = vpop.f32.mrf.mxu1 }
 0x117   :  { %v373_v17 = vpop.f32.mrf.mxu0 }
 0x118   :  { %6119 = vst [vmem:[#allocation68_spill] sm:$0xff] %v4424_v18  ;;  %v4426_v36 = vadd.f32 %v373_v17, %v173_v19 }
 0x119   :  { %v377_v16 = vpop.f32.mrf.mxu0 }
 0x11a   :  { %6120 = vst [vmem:[#allocation69_spill] sm:$0xff] %v4426_v36  ;;  %v4431_v14 = vadd.f32 %v377_v16, %v169_v52  ;;  %v3242_v36 = vpop.f32.mrf.mxu1 }
 0x11b   :  { %v379_v31 = vpop.f32.mrf.mxu0  ;;  %v4443_v22 = vadd.f32 %v3242_v36, %v4429_v15 }
 0x11c   :  { %6121 = vst [vmem:[#allocation70_spill] sm:$0xff] %v4431_v14  ;;  %v4433_v13 = vadd.f32 %v379_v31, %v173_v19  ;;  %v443_v31 = vpop.f32.mrf.mxu1 }
 0x11d   :  { %v381_v11 = vpop.f32.mrf.mxu0  ;;  %6126 = vst [vmem:[#allocation75_spill] sm:$0xff] %v4443_v22  ;;  %v4448_v14 = vadd.f32 %v443_v31, %v4429_v15 }
 0x11e   :  { %6122 = vst [vmem:[#allocation71_spill] sm:$0xff] %v4433_v13  ;;  %v4438_v10 = vadd.f32 %v381_v11, %v169_v52  ;;  %v3245_v11 = vpop.f32.mrf.mxu1 }
 0x11f   :  { %v383_v18 = vpop.f32.mrf.mxu0  ;;  %6128 = vst [vmem:[#allocation77_spill] sm:$0xff] %v4448_v14  ;;  %v4453_v29 = vadd.f32 %v3245_v11, %v4429_v15 }
 0x120   :  { %6124 = vst [vmem:[#allocation73_spill] sm:$0xff] %v4438_v10  ;;  %v4440_v17 = vadd.f32 %v383_v18, %v173_v19 }
 0x121   :  { %v387_v9 = vpop.f32.mrf.mxu0  ;;  %6130 = vst [vmem:[#allocation79_spill] sm:$0xff] %v4453_v29 }
 0x122   :  { %6125 = vst [vmem:[#allocation74_spill] sm:$0xff] %v4440_v17  ;;  %v4445_v16 = vadd.f32 %v387_v9, %v169_v52  ;;  %v456_v17 = vpop.f32.mrf.mxu1 }
 0x123   :  { %v389_v13 = vpop.f32.mrf.mxu0  ;;  %v4458_v36 = vadd.f32 %v456_v17, %v4429_v15 }
 0x124   :  { %6127 = vst [vmem:[#allocation76_spill] sm:$0xff] %v4445_v16  ;;  %v4450_v12 = vadd.f32 %v389_v13, %v173_v19  ;;  %v3246_v16 = vpop.f32.mrf.mxu1 }
 0x125   :  { %v391_v10 = vpop.f32.mrf.mxu0  ;;  %6132 = vst [vmem:[#allocation81_spill] sm:$0xff] %v4458_v36  ;;  %v4463_v31 = vadd.f32 %v3246_v16, %v4429_v15 }
 0x126   :  { %6129 = vst [vmem:[#allocation78_spill] sm:$0xff] %v4450_v12  ;;  %v4455_v18 = vadd.f32 %v391_v10, %v169_v52  ;;  %v459_v12 = vpop.f32.mrf.mxu1  ;;  %v495_v10 = vld [vmem:[%s5765_s6] sm:$0x7] }
 0x127   :  { %v393_v8 = vpop.f32.mrf.mxu0  ;;  %6134 = vst [vmem:[#allocation83_spill] sm:$0xff] %v4463_v31  ;;  %v4471_v11 = vadd.f32 %v459_v12, %v4429_v15 }
 0x128   :  { %6131 = vst [vmem:[#allocation80_spill] sm:$0xff] %v4455_v18  ;;  %v4460_v9 = vadd.f32 %v393_v8, %v173_v19 }
 0x129   :  { %v397_v22 = vpop.f32.mrf.mxu0  ;;  %6136 = vst [vmem:[#allocation85_spill] sm:$0xff] %v4471_v11  ;;  %v370_v11 = vadd.f32 %v4417_v38, %v173_v19 }
 0x12a   :  { %6133 = vst [vmem:[#allocation82_spill] sm:$0xff] %v4460_v9  ;;  %v4465_v13 = vadd.f32 %v397_v22, %v169_v52  ;;  %v4478_v9 = vrot.slane %v495_v10, %v4402_v27 }
 0x12b   :  { %v399_v14 = vpop.f32.mrf.mxu0 }
 0x12c   :  { %6135 = vst [vmem:[#allocation84_spill] sm:$0xff] %v4465_v13  ;;  %v4473_v17 = vadd.f32 %v399_v14, %v173_v19  ;;  %6139 = vst [vmem:[#allocation88_spill] sm:$0xff] %v4478_v9  ;;  %v368_v13 = vadd.f32 %v367_v2, %v169_v52  ;;  %v4484_v14 = vrot.slane %v495_v10, %v4414_v24 }
 0x12d   :  { %v401_v8 = vpop.f32.mrf.mxu0 }
 0x12e   :  { %6137 = vst [vmem:[#allocation86_spill] sm:$0xff] %v4473_v17  ;;  %v4475_v29 = vadd.f32 %v401_v8, %v169_v52 }
 0x12f   :  { %v403_v16 = vpop.f32.mrf.mxu0 }
 0x130   :  { %6138 = vst [vmem:[#allocation87_spill] sm:$0xff] %v4475_v29  ;;  %v4480_v22 = vadd.f32 %v403_v16, %v173_v19 }
 0x131   :  { %v740_v31 = vpop.f32.mrf.mxu0 }
 0x132   :  { %6140 = vst [vmem:[#allocation89_spill] sm:$0xff] %v4480_v22  ;;  %v741_v18 = vadd.f32 %v740_v31, %v4478_v9 }
 0x133   :  { %v742_v36 = vpop.f32.mrf.mxu0  ;;  %v781_v29 = vpop.f32.mrf.mxu1 }
 0x134   :  { %v787_v7 = vadd.f32 %v741_v18, %v368_v13  ;;  %v743_v8 = vadd.f32 %v742_v36, %v4484_v14  ;;  %v441_v36 = vadd.f32 %v440_v21, %v4429_v15  ;;  %v6154_v15 = vld [vmem:[#allocation28_spill] sm:$0xff]  ;;  %v6156_v21 = vld [vmem:[#allocation30_spill] sm:$0xff] }
 0x135   :  { %v744_v6 = vpop.f32.mrf.mxu0  ;;  %v3265_v16 = vpop.f32.mrf.mxu1 }
 0x136   :  { %v3023_v12 = vmul.f32 -1.442695, %v787_v7  ;;  %v794_v22 = vadd.f32 %v743_v8, %v370_v11  ;;  %v4489_v6 = vrot.slane %v495_v10, %v4421_v20  ;;  %v6157_v10 = vld [vmem:[#allocation31_spill] sm:$0xff]  ;;  %v6158_v16 = vld [vmem:[#allocation32_spill] sm:$0xff] }
 0x137   :  { %v745_v17 = vpop.f32.mrf.mxu0  ;;  %v784_v27 = vpop.f32.mrf.mxu1 }
 0x138   :  { %3606 = vpow2.f32 %v3023_v12  ;;  %v3024_v52 = vmul.f32 -1.442695, %v794_v22  ;;  %v782_v7 = vadd.f32 %v781_v29, %v4489_v6  ;;  %v6155_v29 = vld [vmem:[#allocation29_spill] sm:$0xff] }
 0x139   :  { %v3266_v2 = vpop.f32.mrf.mxu1 }
 0x13a   :  { %3608 = vpow2.f32 %v3024_v52  ;;  %v6159_v2 = vld [vmem:[#allocation33_spill] sm:$0xff]  ;;  %v6160_v52 = vld [vmem:[#allocation34_spill] sm:$0xff] }
 0x145   :  { %v3607_v31 = vpop.eup %3606 }
 0x146   :  { %v791_v9 = vadd.f32 1.0, %v3607_v31  ;;  %v6161_v31 = vld [vmem:[#allocation35_spill] sm:$0xff] }
 0x147   :  { %v3609_v18 = vpop.eup %3608 }
 0x148   :  { %3610 = vrcp.f32 %v791_v9  ;;  %v798_v38 = vadd.f32 1.0, %v3609_v18  ;;  %v6163_v18 = vld [vmem:[#allocation37_spill] sm:$0xff] }
 0x155   :  { %v3611_v13 = vpop.eup %3610 }
 0x156   :  { %v801_v17 = vmul.f32 %v3611_v13, %v782_v7  ;;  %v6162_v7 = vld [vmem:[#allocation36_spill] sm:$0xff]  ;;  %v6164_v13 = vld [vmem:[#allocation38_spill] sm:$0xff] }
 0x158   :  { %v802_v19 = vadd.f32 %v801_v17, %v441_v36  ;;  %v6165_v36 = vld [vmem:[#allocation39_spill] sm:$0xff]  ;;  %v6166_v17 = vld [vmem:[#allocation40_spill] sm:$0xff] }
 0x15a   :  { %3612 = vtanh.f32 %v802_v19  ;;  %v6168_v19 = vld [vmem:[#allocation42_spill] sm:$0xff] }
 0x15b   :  { %3614 = vrcp.f32 %v798_v38  ;;  %v6167_v38 = vld [vmem:[#allocation41_spill] sm:$0xff] }
 0x167   :  { %v3613_v27 = vpop.eup %3612 }
 0x168   :  { %v804_v11 = vsub.f32 0.0, %v3613_v27  ;;  %v3615_v22 = vpop.eup %3614 }
 0x16a   :  { %v805_v12 = vmul.f32 %v3615_v22, %v804_v11  ;;  %v6170_v11 = vld [vmem:[#allocation44_spill] sm:$0xff]  ;;  %v6171_v22 = vld [vmem:[#allocation45_spill] sm:$0xff] }
 0x16c   :  { %v4493_v8 = vadd.f32 %v3613_v27, %v805_v12  ;;  %v6169_v27 = vld [vmem:[#allocation43_spill] sm:$0xff]  ;;  %v6172_v12 = vld [vmem:[#allocation46_spill] sm:$0xff] }
 0x16e   :  { %v807_v9 = vpack.c.bf16 %v4493_v8, %v4493_v8 }
 0x170   :  { %1226 = vmatmul.mubr.bf16.vlgmr.msra.gmra.mxu0 %v807_v9  ;;  %1267 = vmatmul.mubr.bf16.vlgmr.msra.gmra.mxu1 %v807_v9 }
 0x171   :  { %1308 = vmatpush1.bf16.msra.mxu0 %v4118_v25  ;;  %3268 = vmatpush3.bf16.msra.mxu1 %v4139_v35  ;;  %v6141_v25 = vld [vmem:[#allocation15_spill] sm:$0xff]  ;;  %v6148_v35 = vld [vmem:[#allocation22_spill] sm:$0xff] }
 0x172   :  { %1309 = vmatprep.subr.bf16.mxu0 %v4120_v26  ;;  %3269 = vmatprep.subr.bf16.mxu1 %v6114_v23  ;;  %v6142_v26 = vld [vmem:[#allocation16_spill] sm:$0xff] }
 0x173   :  { %1339 = vmatprep.mubr.bf16.mxu0 %v6118_v44  ;;  %3283 = vmatprep.mubr.msk.bf16.mxu1 %vm4025_vm0, %v6114_v23 }
 0x175   :  { %1310 = vmatpush1.bf16.msra.mxu0 %v4123_v28  ;;  %3270 = vmatpush3.bf16.msra.mxu1 %v4148_v39  ;;  %v6143_v28 = vld [vmem:[#allocation17_spill] sm:$0xff]  ;;  %v6150_v39 = vld [vmem:[#allocation24_spill] sm:$0xff] }
 0x176   :  { %1311 = vmatprep.subr.bf16.mxu0 %v4128_v30  ;;  %3271 = vmatprep.subr.bf16.mxu1 %v6114_v23  ;;  %v6144_v30 = vld [vmem:[#allocation18_spill] sm:$0xff] }
 0x179   :  { %1312 = vmatpush1.bf16.msra.mxu0 %v4132_v32  ;;  %3272 = vmatpush3.bf16.msra.mxu1 %v4158_v42  ;;  %v6145_v32 = vld [vmem:[#allocation19_spill] sm:$0xff] }
 0x17a   :  { %1313 = vmatprep.subr.bf16.mxu0 %v4135_v33  ;;  %3273 = vmatprep.subr.bf16.mxu1 %v6114_v23  ;;  %v6146_v33 = vld [vmem:[#allocation20_spill] sm:$0xff] }
 0x17d   :  { %1314 = vmatpush1.bf16.msra.mxu0 %v4137_v34  ;;  %3274 = vmatpush3.bf16.msra.mxu1 %v4170_v46  ;;  %v6147_v34 = vld [vmem:[#allocation21_spill] sm:$0xff] }
 0x17e   :  { %1315 = vmatprep.subr.bf16.mxu0 %v4142_v37  ;;  %3275 = vmatprep.subr.bf16.mxu1 %v6114_v23  ;;  %v6149_v37 = vld [vmem:[#allocation23_spill] sm:$0xff] }
 0x181   :  { %1316 = vmatpush1.bf16.msra.mxu0 %v4150_v40  ;;  %3276 = vmatpush3.bf16.msra.mxu1 %v4182_v49  ;;  %v6151_v40 = vld [vmem:[#allocation25_spill] sm:$0xff] }
 0x182   :  { %1317 = vmatprep.subr.bf16.mxu0 %v4152_v41  ;;  %3277 = vmatprep.subr.bf16.mxu1 %v6114_v23  ;;  %v6152_v41 = vld [vmem:[#allocation26_spill] sm:$0xff] }
 0x185   :  { %1318 = vmatpush1.bf16.msra.mxu0 %v4160_v43  ;;  %3278 = vmatpush3.bf16.msra.mxu1 %v4191_v51  ;;  %v6153_v43 = vld [vmem:[#allocation27_spill] sm:$0xff] }
 0x186   :  { %1319 = vmatprep.subr.bf16.mxu0 %v4163_v45  ;;  %3279 = vmatprep.subr.bf16.mxu1 %v6114_v23 }
 0x189   :  { %1320 = vmatpush1.bf16.msra.mxu0 %v4172_v47  ;;  %3280 = vmatpush3.bf16.msra.mxu1 %v4197_v53 }
 0x18a   :  { %1321 = vmatprep.subr.bf16.mxu0 %v4174_v48  ;;  %3281 = vmatprep.subr.bf16.mxu1 %v6114_v23 }
 0x18d   :  { %1322 = vmatpush1.bf16.msra.mxu0 %v4184_v50  ;;  %3282 = vmatpush3.bf16.msra.mxu1 %v4201_v54 }
 0x18e   :  { %1410 = vmatprep.subr.bf16.mxu0 %v4205_v55  ;;  %1451 = vmatprep.subr.bf16.mxu1 %v4207_v56 }
 0x190   :  { %1340 = vmatmul.mubr.bf16.vlgmr.msra.gmra.mxu0 %v807_v9  ;;  %3284 = vmatmul.mubr.bf16.vlgmr.msra.gmra.mxu1 %v807_v9  ;;  %v6173_v9 = vld [vmem:[#allocation47_spill] sm:$0xff] }
 0x191   :  { %1411 = vmatpush1.bf16.msra.mxu0 %v4209_v57  ;;  %1452 = vmatpush1.bf16.msra.mxu1 %v4211_v58 }
 0x192   :  { %1412 = vmatprep.subr.bf16.mxu0 %v4217_v59  ;;  %1453 = vmatprep.subr.bf16.mxu1 %v4219_v60 }
 0x195   :  { %1413 = vmatpush1.bf16.msra.mxu0 %v4221_v61  ;;  %1454 = vmatpush1.bf16.msra.mxu1 %v4223_v62 }
 0x196   :  { %1414 = vmatprep.subr.bf16.mxu0 %v4229_v63  ;;  %1455 = vmatprep.subr.bf16.mxu1 %v4231_v0 }
 0x199   :  { %1415 = vmatpush1.bf16.msra.mxu0 %v4233_v1  ;;  %1456 = vmatpush1.bf16.msra.mxu1 %v4235_v3 }
 0x19a   :  { %1416 = vmatprep.subr.bf16.mxu0 %v4241_v4  ;;  %1457 = vmatprep.subr.bf16.mxu1 %v4243_v5 }
 0x19d   :  { %1417 = vmatpush1.bf16.msra.mxu0 %v6141_v25  ;;  %1458 = vmatpush1.bf16.msra.mxu1 %v6142_v26 }
 0x19e   :  { %1418 = vmatprep.subr.bf16.mxu0 %v6143_v28  ;;  %1459 = vmatprep.subr.bf16.mxu1 %v6144_v30 }
 0x1a1   :  { %1419 = vmatpush1.bf16.msra.mxu0 %v6145_v32  ;;  %1460 = vmatpush1.bf16.msra.mxu1 %v6146_v33 }
 0x1a2   :  { %1420 = vmatprep.subr.bf16.mxu0 %v6147_v34  ;;  %1461 = vmatprep.subr.bf16.mxu1 %v6148_v35 }
 0x1a5   :  { %1421 = vmatpush1.bf16.msra.mxu0 %v6149_v37  ;;  %1462 = vmatpush1.bf16.msra.mxu1 %v6150_v39 }
 0x1a6   :  { %1422 = vmatprep.subr.bf16.mxu0 %v6151_v40  ;;  %1463 = vmatprep.subr.bf16.mxu1 %v6152_v41 }
 0x1a9   :  { %1423 = vmatpush1.bf16.msra.mxu0 %v6153_v43  ;;  %1464 = vmatpush1.bf16.msra.mxu1 %v6154_v15 }
 0x1aa   :  { %1424 = vmatprep.subr.bf16.mxu0 %v6155_v29  ;;  %1465 = vmatprep.subr.bf16.mxu1 %v6156_v21 }
 0x1ad   :  { %1425 = vmatpush1.bf16.msra.mxu0 %v6157_v10  ;;  %1466 = vmatpush1.bf16.msra.mxu1 %v6158_v16 }
 0x1ae   :  { %1426 = vmatprep.subr.bf16.mxu0 %v6159_v2  ;;  %1467 = vmatprep.subr.bf16.mxu1 %v6160_v52 }
 0x1b1   :  { %1427 = vmatpush2.bf16.msra.mxu0 %v6161_v31  ;;  %1468 = vmatpush2.bf16.msra.mxu1 %v6162_v7 }
 0x1b2   :  { %1428 = vmatprep.subr.bf16.mxu0 %v6163_v18  ;;  %1469 = vmatprep.subr.bf16.mxu1 %v6164_v13  ;;  %v6174_v18 = vld [vmem:[#allocation48_spill] sm:$0xff]  ;;  %v6175_v13 = vld [vmem:[#allocation49_spill] sm:$0xff] }
 0x1b5   :  { %1429 = vmatpush2.bf16.msra.mxu0 %v6165_v36  ;;  %1470 = vmatpush2.bf16.msra.mxu1 %v6166_v17  ;;  %v6176_v36 = vld [vmem:[#allocation50_spill] sm:$0xff]  ;;  %v6177_v17 = vld [vmem:[#allocation51_spill] sm:$0xff] }
 0x1b6   :  { %1430 = vmatprep.subr.bf16.mxu0 %v6167_v38  ;;  %1471 = vmatprep.subr.bf16.mxu1 %v6168_v19  ;;  %v6178_v38 = vld [vmem:[#allocation52_spill] sm:$0xff]  ;;  %v6179_v19 = vld [vmem:[#allocation53_spill] sm:$0xff] }
 0x1b9   :  { %1431 = vmatpush2.bf16.msra.mxu0 %v6169_v27  ;;  %1472 = vmatpush2.bf16.msra.mxu1 %v6170_v11  ;;  %v6180_v27 = vld [vmem:[#allocation54_spill] sm:$0xff]  ;;  %v6181_v11 = vld [vmem:[#allocation55_spill] sm:$0xff] }
 0x1ba   :  { %1432 = vmatprep.subr.bf16.mxu0 %v6171_v22  ;;  %1473 = vmatprep.subr.bf16.mxu1 %v6172_v12  ;;  %v6182_v22 = vld [vmem:[#allocation56_spill] sm:$0xff]  ;;  %v6183_v12 = vld [vmem:[#allocation57_spill] sm:$0xff] }
 0x1bd   :  { %1433 = vmatpush2.bf16.msra.mxu0 %v6173_v9  ;;  %1474 = vmatpush2.bf16.msra.mxu1 %v6174_v18  ;;  %v6184_v9 = vld [vmem:[#allocation58_spill] sm:$0xff]  ;;  %v6185_v18 = vld [vmem:[#allocation59_spill] sm:$0xff] }
 0x1be   :  { %1434 = vmatprep.subr.bf16.mxu0 %v6175_v13  ;;  %1475 = vmatprep.subr.bf16.mxu1 %v6176_v36  ;;  %v6186_v13 = vld [vmem:[#allocation60_spill] sm:$0xff]  ;;  %v6187_v36 = vld [vmem:[#allocation61_spill] sm:$0xff] }
 0x1c1   :  { %1435 = vmatpush2.bf16.msra.mxu0 %v6177_v17  ;;  %1476 = vmatpush2.bf16.msra.mxu1 %v6178_v38  ;;  %v6188_v17 = vld [vmem:[#allocation62_spill] sm:$0xff]  ;;  %v6189_v38 = vld [vmem:[#allocation63_spill] sm:$0xff] }
 0x1c2   :  { %1436 = vmatprep.subr.bf16.mxu0 %v6179_v19  ;;  %1477 = vmatprep.subr.bf16.mxu1 %v6180_v27  ;;  %v6190_v19 = vld [vmem:[#allocation64_spill] sm:$0xff]  ;;  %v6191_v27 = vld [vmem:[#allocation14_spill] sm:$0xff] }
 0x1c5   :  { %1437 = vmatpush2.bf16.msra.mxu0 %v6181_v11  ;;  %1478 = vmatpush2.bf16.msra.mxu1 %v6182_v22 }
 0x1c6   :  { %1438 = vmatprep.subr.bf16.mxu0 %v6183_v12  ;;  %1479 = vmatprep.subr.bf16.mxu1 %v6184_v9  ;;  %v512_v9 = vld [vmem:[%s5767_s8] sm:$0xf] }
 0x1c7   :  { %v6192_v12 = vld [vmem:[#allocation66_spill] sm:$0xff] }
 0x1c9   :  { %1439 = vmatpush2.bf16.msra.mxu0 %v6185_v18  ;;  %1480 = vmatpush2.bf16.msra.mxu1 %v6186_v13  ;;  %v4600_v18 = vrot.slane %v512_v9, %v6192_v12  ;;  %v4606_v12 = vrot.slane %v512_v9, %v4414_v24 }
 0x1ca   :  { %1440 = vmatprep.subr.bf16.mxu0 %v6187_v36  ;;  %1481 = vmatprep.subr.bf16.mxu1 %v6188_v17  ;;  %v6194_v36 = vld [vmem:[#allocation67_spill] sm:$0xff] }
 0x1cb   :  { %6193 = vst [vmem:[#allocation15_spill] sm:$0xff] %v4600_v18  ;;  %vm1512_vm2 = vcmp.eq.s32.totalorder %v6194_v36, 1  ;;  %6195 = vst [vmem:[#allocation16_spill] sm:$0xff] %v4606_v12 }
 0x1cd   :  { %1441 = vmatpush2.bf16.msra.mxu0 %v6189_v38  ;;  %1482 = vmatpush2.bf16.msra.mxu1 %v6190_v19  ;;  %v1513_v38 = vsel %vm1512_vm2, 1, %v6118_v44 }
 0x1ce   :  { %1525 = vmatprep.subr.bf16.mxu0 %v6191_v27  ;;  %3287 = vmatprep.subr.bf16.mxu1 %v6114_v23 }
 0x1cf   :  { %1515 = vperm.xlu0 %3440, %v1513_v38  }
 0x230   :  { %v1227_v13 = vpop.f32.mrf.mxu0  ;;  %v1268_v22 = vpop.f32.mrf.mxu1 }
 0x231   :  { %v1228_v17 = vadd.f32 %v1227_v13, %v4600_v18  ;;  %v6196_v13 = vld [vmem:[#allocation65_spill] sm:$0xff] }
 0x232   :  { %v1229_v19 = vpop.f32.mrf.mxu0  ;;  %v1270_v11 = vpop.f32.mrf.mxu1  ;;  %v528_v18 = vsub.s32 3, %v6196_v13 }
 0x233   :  { %v3089_v27 = vmul.f32 -1.442695, %v1228_v17  ;;  %v1230_v16 = vadd.f32 %v1229_v19, %v4606_v12  ;;  %v6198_v17 = vld [vmem:[#allocation88_spill] sm:$0xff] }
 0x234   :  { %v1231_v7 = vpop.f32.mrf.mxu0  ;;  %v1272_v31 = vpop.f32.mrf.mxu1  ;;  %v4610_v29 = vrot.slane %v512_v9, %v528_v18 }
 0x235   :  { %3616 = vpow2.f32 %v3089_v27  ;;  %v3090_v10 = vmul.f32 -1.442695, %v1230_v16  ;;  %v4613_v7 = vrot.slane %v512_v9, %v4421_v20 }
 0x236   :  { %v1232_v52 = vpop.f32.mrf.mxu0  ;;  %v1273_v2 = vpop.f32.mrf.mxu1  ;;  %6197 = vst [vmem:[#allocation17_spill] sm:$0xff] %v4610_v29  ;;  %v1271_v24 = vadd.f32 %v1270_v11, %v4610_v29 }
 0x237   :  { %3618 = vpow2.f32 %v3090_v10  ;;  %v1269_v10 = vadd.f32 %v1268_v22, %v4613_v7 }
 0x242   :  { %v3617_v36 = vpop.eup %3616 }
 0x243   :  { %v1278_v21 = vadd.f32 1.0, %v3617_v36  ;;  %v6199_v36 = vld [vmem:[#allocation68_spill] sm:$0xff] }
 0x244   :  { %v3619_v2 = vpop.eup %3618 }
 0x245   :  { %3620 = vrcp.f32 %v1278_v21  ;;  %v1284_v15 = vadd.f32 1.0, %v3619_v2 }
 0x250   :  { %v1341_v31 = vpop.f32.mrf.mxu0  ;;  %v1382_v52 = vpop.f32.mrf.mxu1 }
 0x251   :  { %v1342_v38 = vadd.f32 %v1341_v31, %v6198_v17  ;;  %v6200_v31 = vld [vmem:[#allocation69_spill] sm:$0xff] }
 0x252   :  { %v3621_v19 = vpop.eup %3620  ;;  %v1343_v16 = vpop.f32.mrf.mxu0 }
 0x253   :  { %v3285_v27 = vpop.f32.mrf.mxu1  ;;  %v1287_v21 = vmul.f32 %v3621_v19, %v1271_v24  ;;  %v1388_v13 = vadd.f32 %v1342_v38, %v6199_v36  ;;  %v1344_v11 = vadd.f32 %v1343_v16, %v4484_v14 }
 0x254   :  { %v1345_v18 = vpop.f32.mrf.mxu0 }
 0x255   :  { %v1385_v12 = vpop.f32.mrf.mxu1  ;;  %v1288_v20 = vadd.f32 %v1287_v21, %v1269_v10  ;;  %v3091_v9 = vmul.f32 -1.442695, %v1388_v13  ;;  %v1395_v17 = vadd.f32 %v1344_v11, %v6200_v31  ;;  %v6202_v10 = vld [vmem:[#allocation77_spill] sm:$0xff] }
 0x256   :  { %v1346_v43 = vpop.f32.mrf.mxu0  ;;  %v4635_v31 = vld [vmem:[#allocation9 + $0xb0] ss:$12 sps:$4 sm:$0xff]  }
 0x257   :  { %v3286_v41 = vpop.f32.mrf.mxu1  ;;  %3622 = vtanh.f32 %v1288_v20  ;;  %v3092_v27 = vmul.f32 -1.442695, %v1395_v17 }
 0x258   :  { %3624 = vpow2.f32 %v3091_v9 }
 0x259   :  { %3626 = vrcp.f32 %v1284_v15  ;;  %v1383_v15 = vadd.f32 %v1382_v52, %v4489_v6  ;;  %v4632_v52 = vld [vmem:[#allocation9 + $0xa8] ss:$12 sps:$4 sm:$0xff]  }
 0x25a   :  { %3628 = vpow2.f32 %v3092_v27  ;;  %v4638_v27 = vld [vmem:[#allocation9 + $0x94] ss:$12 sps:$4 sm:$0xff]  }
 0x264   :  { %v3623_v29 = vpop.eup %3622 }
 0x265   :  { %v3625_v22 = vpop.eup %3624  ;;  %v1290_v24 = vsub.f32 0.0, %v3623_v29 }
 0x266   :  { %v3627_v19 = vpop.eup %3626  ;;  %v1392_v38 = vadd.f32 1.0, %v3625_v22  ;;  %v4648_v22 = vld [vmem:[#allocation9 + $0x98] ss:$12 sps:$4 sm:$0xff]  }
 0x267   :  { %v1291_v12 = vmul.f32 %v3627_v19, %v1290_v24  ;;  %v3629_v43 = vpop.eup %3628  ;;  %v4651_v24 = vld [vmem:[#allocation9 + $0x7c] ss:$12 sps:$4 sm:$0xff]   ;;  %v4655_v19 = vld [vmem:[#allocation9 + $0x78] ss:$12 sps:$4 sm:$0xff]  }
 0x268   :  { %3630 = vrcp.f32 %v1392_v38  ;;  %v1399_v36 = vadd.f32 1.0, %v3629_v43  ;;  %v4659_v38 = vld [vmem:[#allocation9 + $0x64] ss:$12 sps:$4 sm:$0xff]   ;;  %v4671_v43 = vld [vmem:[#allocation9 + $0x48] ss:$12 sps:$4 sm:$0xff]  }
 0x269   :  { %v4621_v2 = vadd.f32 %v3623_v29, %v1291_v12  ;;  %v4663_v12 = vld [vmem:[#allocation9 + $0x60] ss:$12 sps:$4 sm:$0xff]  }
 0x26b   :  { %6201 = vst [vmem:[#allocation18_spill] sm:$0xff] %v4621_v2  ;;  %v1409_v41 = vpack.c.bf16 %v4621_v2, %v4621_v2 }
 0x26d   :  { %1442 = vmatprep.mubr.bf16.mxu0 %v1409_v41  ;;  %1483 = vmatprep.mubr.bf16.mxu1 %v1409_v41  ;;  %v4667_v41 = vld [vmem:[#allocation9 + $0x4c] ss:$12 sps:$4 sm:$0xff]  }
 0x275   :  { %v3631_v16 = vpop.eup %3630 }
 0x276   :  { %v1402_v17 = vmul.f32 %v3631_v16, %v1383_v15  ;;  %v4679_v15 = vld [vmem:[#allocation9 + $0x30] ss:$12 sps:$4 sm:$0xff]  }
 0x277   :  { %v6237_v16 = vld [vmem:[#allocation60_spill] sm:$0xff] }
 0x278   :  { %v1403_v21 = vadd.f32 %v1402_v17, %v6202_v10  ;;  %v6238_v17 = vld [vmem:[#allocation61_spill] sm:$0xff]  ;;  %v6239_v10 = vld [vmem:[#allocation62_spill] sm:$0xff] }
 0x27a   :  { %3632 = vtanh.f32 %v1403_v21  ;;  %v6240_v21 = vld [vmem:[#allocation63_spill] sm:$0xff] }
 0x27b   :  { %3634 = vrcp.f32 %v1399_v36  ;;  %v6241_v36 = vld [vmem:[#allocation64_spill] sm:$0xff] }
 0x287   :  { %v3633_v13 = vpop.eup %3632 }
 0x288   :  { %v1405_v18 = vsub.f32 %v4493_v8, %v3633_v13  ;;  %v3635_v29 = vpop.eup %3634  ;;  %v4645_v8 = vld [vmem:[#allocation9 + $0x90] ss:$12 sps:$4 sm:$0xff]  }
 0x28a   :  { %v1406_v20 = vmul.f32 %v3635_v29, %v1405_v18 }
 0x28c   :  { %v4628_v9 = vadd.f32 %v3633_v13, %v1406_v20  ;;  %v4755_v13 = vld [vmem:[#allocation9 + $0xac] ss:$12 sps:$4 sm:$0xff]  }
 0x28d   :  { %6242 = vst [vmem:[#allocation19_spill] sm:$0xff] %v4755_v13  ;;  %v6243_v20 = vld [vmem:[#allocation67_spill] sm:$0xff] }
 0x28e   :  { %v1408_v11 = vpack.c.bf16 %v4628_v9, %v4628_v9  ;;  %vm1730_vm3 = vcmp.eq.s32.totalorder %v6243_v20, 2 }
 0x290   :  { %1443 = vmatmul.mubr.bf16.vlgmr.msra.gmra.mxu0 %v1408_v11  ;;  %1484 = vmatmul.mubr.bf16.vlgmr.msra.gmra.mxu1 %v1408_v11 }
 0x291   :  { %1526 = vmatpush1.bf16.msra.mxu0 %v4632_v52  ;;  %3288 = vmatpush3.bf16.msra.mxu1 %v4635_v31 }
 0x292   :  { %1527 = vmatprep.subr.bf16.mxu0 %v4638_v27  ;;  %3289 = vmatprep.subr.bf16.mxu1 %v6114_v23 }
 0x293   :  { %1557 = vmatprep.mubr.bf16.mxu0 %v6118_v44  ;;  %3303 = vmatprep.mubr.msk.bf16.mxu1 %vm4025_vm0, %v6114_v23 }
 0x295   :  { %1528 = vmatpush1.bf16.msra.mxu0 %v4645_v8  ;;  %3290 = vmatpush3.bf16.msra.mxu1 %v4648_v22 }
 0x296   :  { %1529 = vmatprep.subr.bf16.mxu0 %v4651_v24  ;;  %3291 = vmatprep.subr.bf16.mxu1 %v6114_v23 }
 0x299   :  { %1530 = vmatpush1.bf16.msra.mxu0 %v4655_v19  ;;  %3292 = vmatpush3.bf16.msra.mxu1 %v4158_v42  ;;  %v4675_v42 = vld [vmem:[#allocation9 + $0x34] ss:$12 sps:$4 sm:$0xff]  }
 0x29a   :  { %1531 = vmatprep.subr.bf16.mxu0 %v4659_v38  ;;  %3293 = vmatprep.subr.bf16.mxu1 %v6114_v23 }
 0x29d   :  { %1532 = vmatpush1.bf16.msra.mxu0 %v4663_v12  ;;  %3294 = vmatpush3.bf16.msra.mxu1 %v4170_v46  ;;  %v6204_v46 = vld [vmem:[#allocation27_spill] sm:$0xff] }
 0x29e   :  { %1533 = vmatprep.subr.bf16.mxu0 %v4667_v41  ;;  %3295 = vmatprep.subr.bf16.mxu1 %v6114_v23 }
 0x2a1   :  { %1534 = vmatpush1.bf16.msra.mxu0 %v4671_v43  ;;  %3296 = vmatpush3.bf16.msra.mxu1 %v4182_v49  ;;  %v6207_v49 = vld [vmem:[#allocation30_spill] sm:$0xff] }
 0x2a2   :  { %1535 = vmatprep.subr.bf16.mxu0 %v4675_v42  ;;  %3297 = vmatprep.subr.bf16.mxu1 %v6114_v23 }
 0x2a5   :  { %1536 = vmatpush1.bf16.msra.mxu0 %v4679_v15  ;;  %3298 = vmatpush3.bf16.msra.mxu1 %v4191_v51  ;;  %v6209_v51 = vld [vmem:[#allocation32_spill] sm:$0xff] }
 0x2a6   :  { %1537 = vmatprep.subr.bf16.mxu0 %v4163_v45  ;;  %3299 = vmatprep.subr.bf16.mxu1 %v6114_v23  ;;  %v6203_v45 = vld [vmem:[#allocation26_spill] sm:$0xff] }
 0x2a9   :  { %1538 = vmatpush1.bf16.msra.mxu0 %v4172_v47  ;;  %3300 = vmatpush3.bf16.msra.mxu1 %v4197_v53  ;;  %v6205_v47 = vld [vmem:[#allocation28_spill] sm:$0xff]  ;;  %v6210_v53 = vld [vmem:[#allocation33_spill] sm:$0xff] }
 0x2aa   :  { %1539 = vmatprep.subr.bf16.mxu0 %v4174_v48  ;;  %3301 = vmatprep.subr.bf16.mxu1 %v6114_v23  ;;  %v6206_v48 = vld [vmem:[#allocation29_spill] sm:$0xff] }
 0x2ad   :  { %1540 = vmatpush1.bf16.msra.mxu0 %v4184_v50  ;;  %3302 = vmatpush3.bf16.msra.mxu1 %v4201_v54  ;;  %v6208_v50 = vld [vmem:[#allocation31_spill] sm:$0xff]  ;;  %v6211_v54 = vld [vmem:[#allocation34_spill] sm:$0xff] }
 0x2ae   :  { %1628 = vmatprep.subr.bf16.mxu0 %v4205_v55  ;;  %1669 = vmatprep.subr.bf16.mxu1 %v4207_v56  ;;  %v6212_v55 = vld [vmem:[#allocation35_spill] sm:$0xff]  ;;  %v6213_v56 = vld [vmem:[#allocation36_spill] sm:$0xff] }
 0x2b0   :  { %1558 = vmatmul.mubr.bf16.vlgmr.msra.gmra.mxu0 %v1408_v11  ;;  %3304 = vmatmul.mubr.bf16.vlgmr.msra.gmra.mxu1 %v1408_v11  ;;  %v6244_v11 = vld [vmem:[#allocation15_spill] sm:$0xff] }
 0x2b1   :  { %1629 = vmatpush1.bf16.msra.mxu0 %v4209_v57  ;;  %1670 = vmatpush1.bf16.msra.mxu1 %v4211_v58  ;;  %v6214_v57 = vld [vmem:[#allocation37_spill] sm:$0xff]  ;;  %v6215_v58 = vld [vmem:[#allocation38_spill] sm:$0xff] }
 0x2b2   :  { %1630 = vmatprep.subr.bf16.mxu0 %v4217_v59  ;;  %1671 = vmatprep.subr.bf16.mxu1 %v4219_v60  ;;  %v6216_v59 = vld [vmem:[#allocation39_spill] sm:$0xff]  ;;  %v6217_v60 = vld [vmem:[#allocation40_spill] sm:$0xff] }
 0x2b5   :  { %1631 = vmatpush1.bf16.msra.mxu0 %v4221_v61  ;;  %1672 = vmatpush1.bf16.msra.mxu1 %v4223_v62  ;;  %v6218_v61 = vld [vmem:[#allocation41_spill] sm:$0xff]  ;;  %v6219_v62 = vld [vmem:[#allocation42_spill] sm:$0xff] }
 0x2b6   :  { %1632 = vmatprep.subr.bf16.mxu0 %v4229_v63  ;;  %1673 = vmatprep.subr.bf16.mxu1 %v4231_v0  ;;  %v6220_v63 = vld [vmem:[#allocation43_spill] sm:$0xff]  ;;  %v6221_v0 = vld [vmem:[#allocation44_spill] sm:$0xff] }
 0x2b9   :  { %1633 = vmatpush1.bf16.msra.mxu0 %v4233_v1  ;;  %1674 = vmatpush1.bf16.msra.mxu1 %v4235_v3  ;;  %v6222_v1 = vld [vmem:[#allocation45_spill] sm:$0xff]  ;;  %v6223_v3 = vld [vmem:[#allocation46_spill] sm:$0xff] }
 0x2ba   :  { %1634 = vmatprep.subr.bf16.mxu0 %v4241_v4  ;;  %1675 = vmatprep.subr.bf16.mxu1 %v4243_v5  ;;  %v6224_v4 = vld [vmem:[#allocation47_spill] sm:$0xff]  ;;  %v6225_v5 = vld [vmem:[#allocation48_spill] sm:$0xff] }
 0x2bd   :  { %1635 = vmatpush1.bf16.msra.mxu0 %v6141_v25  ;;  %1676 = vmatpush1.bf16.msra.mxu1 %v6142_v26  ;;  %v6226_v25 = vld [vmem:[#allocation49_spill] sm:$0xff]  ;;  %v6227_v26 = vld [vmem:[#allocation50_spill] sm:$0xff] }
 0x2be   :  { %1636 = vmatprep.subr.bf16.mxu0 %v6143_v28  ;;  %1677 = vmatprep.subr.bf16.mxu1 %v6144_v30  ;;  %v6228_v28 = vld [vmem:[#allocation51_spill] sm:$0xff]  ;;  %v6229_v30 = vld [vmem:[#allocation52_spill] sm:$0xff] }
 0x2c1   :  { %1637 = vmatpush1.bf16.msra.mxu0 %v6145_v32  ;;  %1678 = vmatpush1.bf16.msra.mxu1 %v6146_v33  ;;  %v6230_v32 = vld [vmem:[#allocation53_spill] sm:$0xff]  ;;  %v6231_v33 = vld [vmem:[#allocation54_spill] sm:$0xff] }
 0x2c2   :  { %1638 = vmatprep.subr.bf16.mxu0 %v6147_v34  ;;  %1679 = vmatprep.subr.bf16.mxu1 %v6148_v35  ;;  %v6232_v34 = vld [vmem:[#allocation55_spill] sm:$0xff]  ;;  %v6233_v35 = vld [vmem:[#allocation56_spill] sm:$0xff] }
 0x2c5   :  { %1639 = vmatpush1.bf16.msra.mxu0 %v6149_v37  ;;  %1680 = vmatpush1.bf16.msra.mxu1 %v6150_v39  ;;  %v6234_v37 = vld [vmem:[#allocation57_spill] sm:$0xff]  ;;  %v6235_v39 = vld [vmem:[#allocation58_spill] sm:$0xff] }
 0x2c6   :  { %1640 = vmatprep.subr.bf16.mxu0 %v6151_v40  ;;  %1681 = vmatprep.subr.bf16.mxu1 %v6203_v45  ;;  %v6236_v40 = vld [vmem:[#allocation59_spill] sm:$0xff] }
 0x2c9   :  { %1641 = vmatpush1.bf16.msra.mxu0 %v6204_v46  ;;  %1682 = vmatpush1.bf16.msra.mxu1 %v6205_v47  ;;  %v1731_v46 = vsel %vm1730_vm3, 1, %v6118_v44 }
 0x2ca   :  { %1642 = vmatprep.subr.bf16.mxu0 %v6206_v48  ;;  %1683 = vmatprep.subr.bf16.mxu1 %v6207_v49 }
 0x2cb   :  { %1733 = vperm.xlu1 %3441, %v1731_v46  }
 0x2cd   :  { %1643 = vmatpush1.bf16.msra.mxu0 %v6208_v50  ;;  %1684 = vmatpush1.bf16.msra.mxu1 %v6209_v51 }
 0x2ce   :  { %1644 = vmatprep.subr.bf16.mxu0 %v6210_v53  ;;  %1685 = vmatprep.subr.bf16.mxu1 %v6211_v54 }
 0x2d1   :  { %1645 = vmatpush2.bf16.msra.mxu0 %v6212_v55  ;;  %1686 = vmatpush2.bf16.msra.mxu1 %v6213_v56  ;;  %v6245_v55 = vld [vmem:[#allocation16_spill] sm:$0xff] }
 0x2d2   :  { %1646 = vmatprep.subr.bf16.mxu0 %v6214_v57  ;;  %1687 = vmatprep.subr.bf16.mxu1 %v6215_v58 }
 0x2d5   :  { %1647 = vmatpush2.bf16.msra.mxu0 %v6216_v59  ;;  %1688 = vmatpush2.bf16.msra.mxu1 %v6217_v60 }
 0x2d6   :  { %1648 = vmatprep.subr.bf16.mxu0 %v6218_v61  ;;  %1689 = vmatprep.subr.bf16.mxu1 %v6219_v62 }
 0x2d9   :  { %1649 = vmatpush2.bf16.msra.mxu0 %v6220_v63  ;;  %1690 = vmatpush2.bf16.msra.mxu1 %v6221_v0  ;;  %v6246_v63 = vld [vmem:[#allocation17_spill] sm:$0xff] }
 0x2da   :  { %1650 = vmatprep.subr.bf16.mxu0 %v6222_v1  ;;  %1691 = vmatprep.subr.bf16.mxu1 %v6223_v3  ;;  %v6247_v1 = vld [vmem:[#allocation88_spill] sm:$0xff] }
 0x2dd   :  { %1651 = vmatpush2.bf16.msra.mxu0 %v6224_v4  ;;  %1692 = vmatpush2.bf16.msra.mxu1 %v6225_v5 }
 0x2de   :  { %1652 = vmatprep.subr.bf16.mxu0 %v6226_v25  ;;  %1693 = vmatprep.subr.bf16.mxu1 %v6227_v26 }
 0x2e1   :  { %1653 = vmatpush2.bf16.msra.mxu0 %v6228_v28  ;;  %1694 = vmatpush2.bf16.msra.mxu1 %v6229_v30  ;;  %v6248_v30 = vld [vmem:[#allocation70_spill] sm:$0xff] }
 0x2e2   :  { %1654 = vmatprep.subr.bf16.mxu0 %v6230_v32  ;;  %1695 = vmatprep.subr.bf16.mxu1 %v6231_v33 }
 0x2e5   :  { %1655 = vmatpush2.bf16.msra.mxu0 %v6232_v34  ;;  %1696 = vmatpush2.bf16.msra.mxu1 %v6233_v35 }
 0x2e6   :  { %1656 = vmatprep.subr.bf16.mxu0 %v6234_v37  ;;  %1697 = vmatprep.subr.bf16.mxu1 %v6235_v39 }
 0x2e9   :  { %1657 = vmatpush2.bf16.msra.mxu0 %v6236_v40  ;;  %1698 = vmatpush2.bf16.msra.mxu1 %v6237_v16 }
 0x2ea   :  { %1658 = vmatprep.subr.bf16.mxu0 %v6238_v17  ;;  %1699 = vmatprep.subr.bf16.mxu1 %v6239_v10  ;;  %v6249_v10 = vld [vmem:[#allocation71_spill] sm:$0xff] }
 0x2ed   :  { %1659 = vmatpush2.bf16.msra.mxu0 %v6240_v21  ;;  %1700 = vmatpush2.bf16.msra.mxu1 %v6241_v36 }
 0x2ee   :  { %1743 = vmatprep.subr.bf16.mxu0 %v4755_v13  ;;  %3307 = vmatprep.subr.bf16.mxu1 %v6114_v23 }
 0x350   :  { %v1444_v18 = vpop.f32.mrf.mxu0  ;;  %v1485_v29 = vpop.f32.mrf.mxu1 }
 0x351   :  { %v1445_v45 = vadd.f32 %v1444_v18, %v6244_v11  ;;  %v1486_v26 = vadd.f32 %v1485_v29, %v4613_v7 }
 0x352   :  { %v1446_v47 = vpop.f32.mrf.mxu0  ;;  %v1487_v48 = vpop.f32.mrf.mxu1 }
 0x353   :  { %v3093_v49 = vmul.f32 -1.442695, %v1445_v45  ;;  %v1447_v56 = vadd.f32 %v1446_v47, %v6245_v55  ;;  %v1488_v0 = vadd.f32 %v1487_v48, %v6246_v63 }
 0x354   :  { %v1448_v50 = vpop.f32.mrf.mxu0  ;;  %v1489_v51 = vpop.f32.mrf.mxu1 }
 0x355   :  { %3636 = vpow2.f32 %v3093_v49  ;;  %v3094_v57 = vmul.f32 -1.442695, %v1447_v56  ;;  %v6251_v56 = vld [vmem:[#allocation72_spill] sm:$0xff] }
 0x356   :  { %v1449_v53 = vpop.f32.mrf.mxu0  ;;  %v1490_v54 = vpop.f32.mrf.mxu1 }
 0x357   :  { %3638 = vpow2.f32 %v3094_v57 }
 0x362   :  { %v3637_v58 = vpop.eup %3636 }
 0x363   :  { %v1495_v59 = vadd.f32 1.0, %v3637_v58 }
 0x364   :  { %v3639_v62 = vpop.eup %3638 }
 0x365   :  { %3640 = vrcp.f32 %v1495_v59  ;;  %v1501_v35 = vadd.f32 1.0, %v3639_v62 }
 0x370   :  { %v1559_v60 = vpop.f32.mrf.mxu0  ;;  %v1600_v61 = vpop.f32.mrf.mxu1 }
 0x371   :  { %v1560_v3 = vadd.f32 %v1559_v60, %v6247_v1  ;;  %v1601_v51 = vadd.f32 %v1600_v61, %v4489_v6  ;;  %v4799_v61 = vld [vmem:[#allocation9 + $0x68] ss:$12 sps:$4 sm:$0xff]  }
 0x372   :  { %v3641_v4 = vpop.eup %3640  ;;  %v1561_v5 = vpop.f32.mrf.mxu0 }
 0x373   :  { %v3305_v25 = vpop.f32.mrf.mxu1  ;;  %v1504_v28 = vmul.f32 %v3641_v4, %v1488_v0  ;;  %v1606_v32 = vadd.f32 %v1560_v3, %v6248_v30  ;;  %v1562_v17 = vadd.f32 %v1561_v5, %v4484_v14  ;;  %v4805_v5 = vld [vmem:[#allocation9 + $0x50] ss:$12 sps:$4 sm:$0xff]   ;;  %v4821_v30 = vld [vmem:[#allocation9 + $0x20] ss:$12 sps:$4 sm:$0xff]  }
 0x374   :  { %v1563_v33 = vpop.f32.mrf.mxu0  ;;  %v4811_v25 = vld [vmem:[#allocation9 + $0x38] ss:$12 sps:$4 sm:$0xff]  }
 0x375   :  { %v1603_v34 = vpop.f32.mrf.mxu1  ;;  %v1505_v37 = vadd.f32 %v1504_v28, %v1486_v26  ;;  %v3095_v39 = vmul.f32 -1.442695, %v1606_v32  ;;  %v1613_v21 = vadd.f32 %v1562_v17, %v6249_v10  ;;  %v4814_v26 = vld [vmem:[#allocation9 + $0x1c] ss:$12 sps:$4 sm:$0xff]   ;;  %v4818_v28 = vld [vmem:[#allocation9 + $0x18] ss:$12 sps:$4 sm:$0xff]  }
 0x376   :  { %v1564_v40 = vpop.f32.mrf.mxu0  ;;  %v4824_v32 = vld [vmem:[#allocation9 + $0x4] ss:$12 sps:$4 sm:$0xff]   ;;  %v4828_v33 = vld [vmem:[#allocation9] ss:$12 sps:$4 sm:$0xff]   ;;  %v4831_v34 = vld [vmem:[#allocation9 + $0x8] ss:$12 sps:$4 sm:$0xff]  }
 0x377   :  { %v3306_v16 = vpop.f32.mrf.mxu1  ;;  %3642 = vtanh.f32 %v1505_v37  ;;  %v3096_v36 = vmul.f32 -1.442695, %v1613_v21  ;;  %v4837_v37 = vld [vmem:[#allocation11 + $0xec] ss:$16 sps:$4 sm:$0xff]   ;;  %v4843_v40 = vld [vmem:[#allocation11 + $0xe8] ss:$16 sps:$4 sm:$0xff]  }
 0x378   :  { %3644 = vpow2.f32 %v3095_v39  ;;  %v4840_v39 = vld [vmem:[#allocation11 + $0xe0] ss:$16 sps:$4 sm:$0xff]   ;;  %v4846_v16 = vld [vmem:[#allocation11 + $0xc4] ss:$16 sps:$4 sm:$0xff]   ;;  %v4849_v17 = vld [vmem:[#allocation11 + $0xcc] ss:$16 sps:$4 sm:$0xff]  }
 0x379   :  { %3646 = vrcp.f32 %v1501_v35  ;;  %v4834_v35 = vld [vmem:[#allocation11 + $0xe4] ss:$16 sps:$4 sm:$0xff]   ;;  %v4852_v10 = vld [vmem:[#allocation11 + $0xc0] ss:$16 sps:$4 sm:$0xff]   ;;  %v4855_v21 = vld [vmem:[#allocation11 + $0xc8] ss:$16 sps:$4 sm:$0xff]  }
 0x37a   :  { %3648 = vpow2.f32 %v3096_v36  ;;  %v4858_v36 = vld [vmem:[#allocation11 + $0xa4] ss:$16 sps:$4 sm:$0xff]  }
 0x384   :  { %v3643_v18 = vpop.eup %3642 }
 0x385   :  { %v3645_v29 = vpop.eup %3644  ;;  %v1507_v20 = vsub.f32 %v4621_v2, %v3643_v18  ;;  %v4918_v2 = vld [vmem:[#allocation11 + $0x4] ss:$16 sps:$4 sm:$0xff]  }
 0x386   :  { %v3647_v45 = vpop.eup %3646  ;;  %v1610_v46 = vadd.f32 1.0, %v3645_v29  ;;  %v4864_v29 = vld [vmem:[#allocation11 + $0xa0] ss:$16 sps:$4 sm:$0xff]   ;;  %6269 = vst [vmem:[#allocation32_spill] sm:$0xff] %v4918_v2 }
 0x387   :  { %v1508_v47 = vmul.f32 %v3647_v45, %v1507_v20  ;;  %v3649_v50 = vpop.eup %3648  ;;  %v4867_v20 = vld [vmem:[#allocation11 + $0xa8] ss:$16 sps:$4 sm:$0xff]   ;;  %v4870_v45 = vld [vmem:[#allocation11 + $0x84] ss:$16 sps:$4 sm:$0xff]  }
 0x388   :  { %3650 = vrcp.f32 %v1610_v46  ;;  %v1617_v58 = vadd.f32 1.0, %v3649_v50  ;;  %6252 = vst [vmem:[#allocation21_spill] sm:$0xff] %v4867_v20  ;;  %6253 = vst [vmem:[#allocation22_spill] sm:$0xff] %v4870_v45  ;;  %v4873_v46 = vld [vmem:[#allocation11 + $0x8c] ss:$16 sps:$4 sm:$0xff]  }
 0x389   :  { %v4770_v48 = vadd.f32 %v3643_v18, %v1508_v47  ;;  %v4861_v18 = vld [vmem:[#allocation11 + $0xac] ss:$16 sps:$4 sm:$0xff]   ;;  %6254 = vst [vmem:[#allocation23_spill] sm:$0xff] %v4873_v46  ;;  %v4876_v47 = vld [vmem:[#allocation11 + $0x80] ss:$16 sps:$4 sm:$0xff]  }
 0x38a   :  { %6255 = vst [vmem:[#allocation24_spill] sm:$0xff] %v4876_v47  ;;  %v4882_v50 = vld [vmem:[#allocation11 + $0x64] ss:$16 sps:$4 sm:$0xff]  }
 0x38b   :  { %6250 = vst [vmem:[#allocation20_spill] sm:$0xff] %v4770_v48  ;;  %v1627_v49 = vpack.c.bf16 %v4770_v48, %v4770_v48  ;;  %6257 = vst [vmem:[#allocation14_spill] sm:$0xff] %v4882_v50 }
 0x38d   :  { %1660 = vmatprep.mubr.bf16.mxu0 %v1627_v49  ;;  %1701 = vmatprep.mubr.bf16.mxu1 %v1627_v49  ;;  %v4879_v49 = vld [vmem:[#allocation11 + $0x88] ss:$16 sps:$4 sm:$0xff]  }
 0x38e   :  { %6256 = vst [vmem:[#allocation25_spill] sm:$0xff] %v4879_v49 }
 0x395   :  { %v3651_v53 = vpop.eup %3650 }
 0x396   :  { %v1620_v54 = vmul.f32 %v3651_v53, %v1601_v51  ;;  %v4885_v51 = vld [vmem:[#allocation11 + $0x6c] ss:$16 sps:$4 sm:$0xff]   ;;  %v4888_v53 = vld [vmem:[#allocation11 + $0x60] ss:$16 sps:$4 sm:$0xff]  }
 0x397   :  { %6258 = vst [vmem:[#allocation66_spill] sm:$0xff] %v4885_v51  ;;  %6259 = vst [vmem:[#allocation65_spill] sm:$0xff] %v4888_v53 }
 0x398   :  { %v1621_v57 = vadd.f32 %v1620_v54, %v6251_v56  ;;  %v4891_v54 = vld [vmem:[#allocation11 + $0x68] ss:$16 sps:$4 sm:$0xff]   ;;  %v4894_v56 = vld [vmem:[#allocation11 + $0x44] ss:$16 sps:$4 sm:$0xff]  }
 0x399   :  { %6260 = vst [vmem:[#allocation68_spill] sm:$0xff] %v4891_v54  ;;  %6261 = vst [vmem:[#allocation69_spill] sm:$0xff] %v4894_v56 }
 0x39a   :  { %3652 = vtanh.f32 %v1621_v57  ;;  %v4897_v57 = vld [vmem:[#allocation11 + $0x4c] ss:$16 sps:$4 sm:$0xff]  }
 0x39b   :  { %3654 = vrcp.f32 %v1617_v58  ;;  %6262 = vst [vmem:[#allocation77_spill] sm:$0xff] %v4897_v57  ;;  %v4900_v58 = vld [vmem:[#allocation11 + $0x40] ss:$16 sps:$4 sm:$0xff]  }
 0x39c   :  { %6263 = vst [vmem:[#allocation26_spill] sm:$0xff] %v4900_v58 }
 0x3a7   :  { %v3653_v59 = vpop.eup %3652 }
 0x3a8   :  { %v1623_v60 = vsub.f32 %v4628_v9, %v3653_v59  ;;  %v3655_v62 = vpop.eup %3654  ;;  %v4793_v9 = vld [vmem:[#allocation9 + $0x80] ss:$12 sps:$4 sm:$0xff]  }
 0x3aa   :  { %v1624_v0 = vmul.f32 %v3655_v62, %v1623_v60  ;;  %v4906_v60 = vld [vmem:[#allocation11 + $0x24] ss:$16 sps:$4 sm:$0xff]   ;;  %v4909_v62 = vld [vmem:[#allocation11 + $0x2c] ss:$16 sps:$4 sm:$0xff]  }
 0x3ab   :  { %6265 = vst [vmem:[#allocation28_spill] sm:$0xff] %v4906_v60  ;;  %6266 = vst [vmem:[#allocation29_spill] sm:$0xff] %v4909_v62 }
 0x3ac   :  { %v4777_v3 = vadd.f32 %v3653_v59, %v1624_v0  ;;  %v4903_v59 = vld [vmem:[#allocation11 + $0x48] ss:$16 sps:$4 sm:$0xff]   ;;  %v4912_v0 = vld [vmem:[#allocation11 + $0x20] ss:$16 sps:$4 sm:$0xff]  }
 0x3ad   :  { %6264 = vst [vmem:[#allocation27_spill] sm:$0xff] %v4903_v59  ;;  %6267 = vst [vmem:[#allocation30_spill] sm:$0xff] %v4912_v0 }
 0x3ae   :  { %v1626_v4 = vpack.c.bf16 %v4777_v3, %v4777_v3 }
 0x3b0   :  { %1661 = vmatmul.mubr.bf16.vlgmr.msra.gmra.mxu0 %v1626_v4  ;;  %1702 = vmatmul.mubr.bf16.vlgmr.msra.gmra.mxu1 %v1626_v4 }
 0x3b1   :  { %1744 = vmatpush1.bf16.msra.mxu0 %v4632_v52  ;;  %3308 = vmatpush3.bf16.msra.mxu1 %v4635_v31 }
 0x3b2   :  { %1745 = vmatprep.subr.bf16.mxu0 %v4638_v27  ;;  %3309 = vmatprep.subr.bf16.mxu1 %v6114_v23 }
 0x3b3   :  { %1775 = vmatprep.mubr.bf16.mxu0 %v6118_v44  ;;  %3323 = vmatprep.mubr.msk.bf16.mxu1 %vm4025_vm0, %v6114_v23 }
 0x3b5   :  { %1746 = vmatpush1.bf16.msra.mxu0 %v4645_v8  ;;  %3310 = vmatpush3.bf16.msra.mxu1 %v4648_v22 }
 0x3b6   :  { %1747 = vmatprep.subr.bf16.mxu0 %v4651_v24  ;;  %3311 = vmatprep.subr.bf16.mxu1 %v6114_v23 }
 0x3b9   :  { %1748 = vmatpush1.bf16.msra.mxu0 %v4655_v19  ;;  %3312 = vmatpush3.bf16.msra.mxu1 %v4793_v9 }
 0x3ba   :  { %1749 = vmatprep.subr.bf16.mxu0 %v4659_v38  ;;  %3313 = vmatprep.subr.bf16.mxu1 %v6114_v23 }
 0x3bd   :  { %1750 = vmatpush1.bf16.msra.mxu0 %v4663_v12  ;;  %3314 = vmatpush3.bf16.msra.mxu1 %v4799_v61 }
 0x3be   :  { %1751 = vmatprep.subr.bf16.mxu0 %v4667_v41  ;;  %3315 = vmatprep.subr.bf16.mxu1 %v6114_v23 }
 0x3c1   :  { %1752 = vmatpush1.bf16.msra.mxu0 %v4671_v43  ;;  %3316 = vmatpush3.bf16.msra.mxu1 %v4805_v5 }
 0x3c2   :  { %1753 = vmatprep.subr.bf16.mxu0 %v4675_v42  ;;  %3317 = vmatprep.subr.bf16.mxu1 %v6114_v23 }
 0x3c5   :  { %1754 = vmatpush1.bf16.msra.mxu0 %v4679_v15  ;;  %3318 = vmatpush3.bf16.msra.mxu1 %v4811_v25 }
 0x3c6   :  { %1755 = vmatprep.subr.bf16.mxu0 %v4814_v26  ;;  %3319 = vmatprep.subr.bf16.mxu1 %v6114_v23 }
 0x3c9   :  { %1756 = vmatpush1.bf16.msra.mxu0 %v4818_v28  ;;  %3320 = vmatpush3.bf16.msra.mxu1 %v4821_v30 }
 0x3ca   :  { %1757 = vmatprep.subr.bf16.mxu0 %v4824_v32  ;;  %3321 = vmatprep.subr.bf16.mxu1 %v6114_v23 }
 0x3cd   :  { %1758 = vmatpush1.bf16.msra.mxu0 %v4828_v33  ;;  %3322 = vmatpush3.bf16.msra.mxu1 %v4831_v34 }
 0x3ce   :  { %1846 = vmatprep.subr.bf16.mxu0 %v4834_v35  ;;  %1887 = vmatprep.subr.bf16.mxu1 %v4837_v37 }
 0x3d0   :  { %1776 = vmatmul.mubr.bf16.vlgmr.msra.gmra.mxu0 %v1626_v4  ;;  %3324 = vmatmul.mubr.bf16.vlgmr.msra.gmra.mxu1 %v1626_v4  ;;  %v4915_v4 = vld [vmem:[#allocation11 + $0x28] ss:$16 sps:$4 sm:$0xff]  }
 0x3d1   :  { %1847 = vmatpush1.bf16.msra.mxu0 %v4840_v39  ;;  %1888 = vmatpush1.bf16.msra.mxu1 %v4843_v40  ;;  %6268 = vst [vmem:[#allocation31_spill] sm:$0xff] %v4915_v4 }
 0x3d2   :  { %1848 = vmatprep.subr.bf16.mxu0 %v4846_v16  ;;  %1889 = vmatprep.subr.bf16.mxu1 %v4849_v17 }
 0x3d5   :  { %1849 = vmatpush1.bf16.msra.mxu0 %v4852_v10  ;;  %1890 = vmatpush1.bf16.msra.mxu1 %v4855_v21 }
 0x3d6   :  { %1850 = vmatprep.subr.bf16.mxu0 %v4858_v36  ;;  %1891 = vmatprep.subr.bf16.mxu1 %v4861_v18 }
 0x3d9   :  { %1851 = vmatpush1.bf16.msra.mxu0 %v4864_v29  ;;  %1892 = vmatpush1.bf16.msra.mxu1 %v4867_v20 }
 0x3da   :  { %1852 = vmatprep.subr.bf16.mxu0 %v4870_v45  ;;  %1893 = vmatprep.subr.bf16.mxu1 %v4873_v46 }
 0x3dd   :  { %1853 = vmatpush1.bf16.msra.mxu0 %v4876_v47  ;;  %1894 = vmatpush1.bf16.msra.mxu1 %v4879_v49 }
 0x3de   :  { %1854 = vmatprep.subr.bf16.mxu0 %v4882_v50  ;;  %1895 = vmatprep.subr.bf16.mxu1 %v4885_v51 }
 0x3e1   :  { %1855 = vmatpush1.bf16.msra.mxu0 %v4888_v53  ;;  %1896 = vmatpush1.bf16.msra.mxu1 %v4891_v54 }
 0x3e2   :  { %1856 = vmatprep.subr.bf16.mxu0 %v4894_v56  ;;  %1897 = vmatprep.subr.bf16.mxu1 %v4897_v57 }
 0x3e5   :  { %1857 = vmatpush1.bf16.msra.mxu0 %v4900_v58  ;;  %1898 = vmatpush1.bf16.msra.mxu1 %v4903_v59  ;;  %v4921_v59 = vld [vmem:[#allocation11 + $0xc] ss:$16 sps:$4 sm:$0xff]  }
 0x3e6   :  { %1858 = vmatprep.subr.bf16.mxu0 %v4906_v60  ;;  %1899 = vmatprep.subr.bf16.mxu1 %v4909_v62  ;;  %6270 = vst [vmem:[#allocation33_spill] sm:$0xff] %v4921_v59  ;;  %v4924_v60 = vld [vmem:[#allocation11] ss:$16 sps:$4 sm:$0xff]   ;;  %v4927_v62 = vld [vmem:[#allocation11 + $0x8] ss:$16 sps:$4 sm:$0xff]  }
 0x3e7   :  { %6271 = vst [vmem:[#allocation34_spill] sm:$0xff] %v4924_v60  ;;  %6272 = vst [vmem:[#allocation35_spill] sm:$0xff] %v4927_v62 }
 0x3e9   :  { %1859 = vmatpush1.bf16.msra.mxu0 %v4912_v0  ;;  %1900 = vmatpush1.bf16.msra.mxu1 %v4915_v4  ;;  %v4930_v0 = vld [vmem:[#allocation11 + $0x1e4] ss:$16 sps:$4 sm:$0xff]   ;;  %v4933_v4 = vld [vmem:[#allocation11 + $0x1ec] ss:$16 sps:$4 sm:$0xff]  }
 0x3ea   :  { %1860 = vmatprep.subr.bf16.mxu0 %v4918_v2  ;;  %1901 = vmatprep.subr.bf16.mxu1 %v4921_v59  ;;  %6273 = vst [vmem:[#allocation36_spill] sm:$0xff] %v4930_v0  ;;  %6274 = vst [vmem:[#allocation37_spill] sm:$0xff] %v4933_v4  ;;  %v4936_v2 = vld [vmem:[#allocation11 + $0x1e0] ss:$16 sps:$4 sm:$0xff]   ;;  %v4939_v59 = vld [vmem:[#allocation11 + $0x1e8] ss:$16 sps:$4 sm:$0xff]  }
 0x3eb   :  { %6275 = vst [vmem:[#allocation38_spill] sm:$0xff] %v4936_v2  ;;  %6276 = vst [vmem:[#allocation39_spill] sm:$0xff] %v4939_v59 }
 0x3ed   :  { %1861 = vmatpush1.bf16.msra.mxu0 %v4924_v60  ;;  %1902 = vmatpush1.bf16.msra.mxu1 %v4927_v62  ;;  %v4942_v60 = vld [vmem:[#allocation11 + $0x1c4] ss:$16 sps:$4 sm:$0xff]   ;;  %v4945_v62 = vld [vmem:[#allocation11 + $0x1cc] ss:$16 sps:$4 sm:$0xff]  }
 0x3ee   :  { %1862 = vmatprep.subr.bf16.mxu0 %v4930_v0  ;;  %1903 = vmatprep.subr.bf16.mxu1 %v4933_v4  ;;  %6277 = vst [vmem:[#allocation40_spill] sm:$0xff] %v4942_v60  ;;  %6278 = vst [vmem:[#allocation41_spill] sm:$0xff] %v4945_v62  ;;  %v4948_v0 = vld [vmem:[#allocation11 + $0x1c0] ss:$16 sps:$4 sm:$0xff]   ;;  %v4951_v4 = vld [vmem:[#allocation11 + $0x1c8] ss:$16 sps:$4 sm:$0xff]  }
 0x3ef   :  { %6279 = vst [vmem:[#allocation42_spill] sm:$0xff] %v4948_v0  ;;  %6280 = vst [vmem:[#allocation43_spill] sm:$0xff] %v4951_v4 }
 0x3f1   :  { %1863 = vmatpush2.bf16.msra.mxu0 %v4936_v2  ;;  %1904 = vmatpush2.bf16.msra.mxu1 %v4939_v59  ;;  %v4954_v2 = vld [vmem:[#allocation11 + $0x1a4] ss:$16 sps:$4 sm:$0xff]   ;;  %v4957_v59 = vld [vmem:[#allocation11 + $0x1ac] ss:$16 sps:$4 sm:$0xff]  }
 0x3f2   :  { %1864 = vmatprep.subr.bf16.mxu0 %v4942_v60  ;;  %1905 = vmatprep.subr.bf16.mxu1 %v4945_v62  ;;  %6281 = vst [vmem:[#allocation44_spill] sm:$0xff] %v4954_v2  ;;  %6282 = vst [vmem:[#allocation45_spill] sm:$0xff] %v4957_v59  ;;  %v4960_v60 = vld [vmem:[#allocation11 + $0x1a0] ss:$16 sps:$4 sm:$0xff]   ;;  %v4963_v62 = vld [vmem:[#allocation11 + $0x1a8] ss:$16 sps:$4 sm:$0xff]  }
 0x3f3   :  { %6283 = vst [vmem:[#allocation46_spill] sm:$0xff] %v4960_v60  ;;  %6284 = vst [vmem:[#allocation47_spill] sm:$0xff] %v4963_v62 }
 0x3f5   :  { %1865 = vmatpush2.bf16.msra.mxu0 %v4948_v0  ;;  %1906 = vmatpush2.bf16.msra.mxu1 %v4951_v4  ;;  %v4966_v0 = vld [vmem:[#allocation11 + $0x184] ss:$16 sps:$4 sm:$0xff]   ;;  %v4969_v4 = vld [vmem:[#allocation11 + $0x18c] ss:$16 sps:$4 sm:$0xff]  }
 0x3f6   :  { %1866 = vmatprep.subr.bf16.mxu0 %v4954_v2  ;;  %1907 = vmatprep.subr.bf16.mxu1 %v4957_v59  ;;  %6285 = vst [vmem:[#allocation48_spill] sm:$0xff] %v4966_v0  ;;  %6286 = vst [vmem:[#allocation49_spill] sm:$0xff] %v4969_v4  ;;  %v4972_v2 = vld [vmem:[#allocation11 + $0x180] ss:$16 sps:$4 sm:$0xff]   ;;  %v4975_v59 = vld [vmem:[#allocation11 + $0x188] ss:$16 sps:$4 sm:$0xff]  }
 0x3f7   :  { %6287 = vst [vmem:[#allocation50_spill] sm:$0xff] %v4972_v2  ;;  %6288 = vst [vmem:[#allocation51_spill] sm:$0xff] %v4975_v59 }
 0x3f9   :  { %1867 = vmatpush2.bf16.msra.mxu0 %v4960_v60  ;;  %1908 = vmatpush2.bf16.msra.mxu1 %v4963_v62  ;;  %v4978_v60 = vld [vmem:[#allocation11 + $0x164] ss:$16 sps:$4 sm:$0xff]   ;;  %v4981_v62 = vld [vmem:[#allocation11 + $0x16c] ss:$16 sps:$4 sm:$0xff]  }
 0x3fa   :  { %1868 = vmatprep.subr.bf16.mxu0 %v4966_v0  ;;  %1909 = vmatprep.subr.bf16.mxu1 %v4969_v4  ;;  %6289 = vst [vmem:[#allocation52_spill] sm:$0xff] %v4978_v60  ;;  %6290 = vst [vmem:[#allocation53_spill] sm:$0xff] %v4981_v62  ;;  %v4984_v0 = vld [vmem:[#allocation11 + $0x160] ss:$16 sps:$4 sm:$0xff]   ;;  %v4987_v4 = vld [vmem:[#allocation11 + $0x168] ss:$16 sps:$4 sm:$0xff]  }
 0x3fb   :  { %6291 = vst [vmem:[#allocation54_spill] sm:$0xff] %v4984_v0  ;;  %6292 = vst [vmem:[#allocation55_spill] sm:$0xff] %v4987_v4 }
 0x3fd   :  { %1869 = vmatpush2.bf16.msra.mxu0 %v4972_v2  ;;  %1910 = vmatpush2.bf16.msra.mxu1 %v4975_v59  ;;  %v4990_v2 = vld [vmem:[#allocation11 + $0x144] ss:$16 sps:$4 sm:$0xff]   ;;  %v4993_v59 = vld [vmem:[#allocation11 + $0x14c] ss:$16 sps:$4 sm:$0xff]  }
 0x3fe   :  { %1870 = vmatprep.subr.bf16.mxu0 %v4978_v60  ;;  %1911 = vmatprep.subr.bf16.mxu1 %v4981_v62  ;;  %6293 = vst [vmem:[#allocation56_spill] sm:$0xff] %v4990_v2  ;;  %6294 = vst [vmem:[#allocation57_spill] sm:$0xff] %v4993_v59  ;;  %v4996_v60 = vld [vmem:[#allocation11 + $0x140] ss:$16 sps:$4 sm:$0xff]   ;;  %v4999_v62 = vld [vmem:[#allocation11 + $0x148] ss:$16 sps:$4 sm:$0xff]  }
 0x3ff   :  { %6295 = vst [vmem:[#allocation58_spill] sm:$0xff] %v4996_v60  ;;  %6296 = vst [vmem:[#allocation59_spill] sm:$0xff] %v4999_v62 }
 0x401   :  { %1871 = vmatpush2.bf16.msra.mxu0 %v4984_v0  ;;  %1912 = vmatpush2.bf16.msra.mxu1 %v4987_v4  ;;  %v5002_v0 = vld [vmem:[#allocation11 + $0x124] ss:$16 sps:$4 sm:$0xff]   ;;  %v5005_v4 = vld [vmem:[#allocation11 + $0x12c] ss:$16 sps:$4 sm:$0xff]  }
 0x402   :  { %1872 = vmatprep.subr.bf16.mxu0 %v4990_v2  ;;  %1913 = vmatprep.subr.bf16.mxu1 %v4993_v59  ;;  %6297 = vst [vmem:[#allocation60_spill] sm:$0xff] %v5002_v0  ;;  %6298 = vst [vmem:[#allocation61_spill] sm:$0xff] %v5005_v4  ;;  %v5008_v2 = vld [vmem:[#allocation11 + $0x120] ss:$16 sps:$4 sm:$0xff]   ;;  %v5011_v59 = vld [vmem:[#allocation11 + $0x128] ss:$16 sps:$4 sm:$0xff]  }
 0x403   :  { %6299 = vst [vmem:[#allocation62_spill] sm:$0xff] %v5008_v2  ;;  %6300 = vst [vmem:[#allocation63_spill] sm:$0xff] %v5011_v59 }
 0x405   :  { %1873 = vmatpush2.bf16.msra.mxu0 %v4996_v60  ;;  %1914 = vmatpush2.bf16.msra.mxu1 %v4999_v62  ;;  %v5014_v60 = vld [vmem:[#allocation11 + $0x104] ss:$16 sps:$4 sm:$0xff]   ;;  %v5017_v62 = vld [vmem:[#allocation11 + $0x10c] ss:$16 sps:$4 sm:$0xff]  }
 0x406   :  { %1874 = vmatprep.subr.bf16.mxu0 %v5002_v0  ;;  %1915 = vmatprep.subr.bf16.mxu1 %v5005_v4  ;;  %6301 = vst [vmem:[#allocation64_spill] sm:$0xff] %v5014_v60  ;;  %6302 = vst [vmem:[#allocation67_spill] sm:$0xff] %v5017_v62  ;;  %v5020_v0 = vld [vmem:[#allocation11 + $0x100] ss:$16 sps:$4 sm:$0xff]   ;;  %v5023_v4 = vld [vmem:[#allocation11 + $0x108] ss:$16 sps:$4 sm:$0xff]  }
 0x407   :  { %6303 = vst [vmem:[#allocation70_spill] sm:$0xff] %v5020_v0  ;;  %6304 = vst [vmem:[#allocation71_spill] sm:$0xff] %v5023_v4 }
 0x409   :  { %1875 = vmatpush2.bf16.msra.mxu0 %v5008_v2  ;;  %1916 = vmatpush2.bf16.msra.mxu1 %v5011_v59 }
 0x40a   :  { %1876 = vmatprep.subr.bf16.mxu0 %v5014_v60  ;;  %1917 = vmatprep.subr.bf16.mxu1 %v5017_v62  ;;  %v5031_v60 = vld [vmem:[%s5760_s1] sm:$0xff] }
 0x40b   :  { %6305 = vst [vmem:[#allocation72_spill] sm:$0xff] %v5031_v60  ;;  %vm1948_vm4 = vcmp.eq.s32.totalorder %v5031_v60, 3 }
 0x40d   :  { %1877 = vmatpush2.bf16.msra.mxu0 %v5020_v0  ;;  %1918 = vmatpush2.bf16.msra.mxu1 %v5023_v4  ;;  %v1949_v0 = vsel %vm1948_vm4, 1, %v6118_v44 }
 0x40e   :  { %1961 = vmatprep.subr.bf16.mxu0 %v4755_v13  ;;  %3327 = vmatprep.subr.bf16.mxu1 %v6114_v23 }
 0x40f   :  { %1951 = vperm.xlu1 %3441, %v1949_v0  }
 0x470   :  { %v1662_v59 = vpop.f32.mrf.mxu0  ;;  %v1703_v2 = vpop.f32.mrf.mxu1 }
 0x471   :  { %v1663_v62 = vadd.f32 %v1662_v59, %v6244_v11 }
 0x472   :  { %v1664_v58 = vpop.f32.mrf.mxu0  ;;  %v1705_v57 = vpop.f32.mrf.mxu1 }
 0x473   :  { %v3097_v4 = vmul.f32 -1.442695, %v1663_v62  ;;  %v1665_v51 = vadd.f32 %v1664_v58, %v6245_v55  ;;  %v1706_v46 = vadd.f32 %v1705_v57, %v6246_v63 }
 0x474   :  { %v1666_v13 = vpop.f32.mrf.mxu0  ;;  %v1707_v56 = vpop.f32.mrf.mxu1 }
 0x475   :  { %3656 = vpow2.f32 %v3097_v4  ;;  %v3098_v50 = vmul.f32 -1.442695, %v1665_v51  ;;  %v6306_v4 = vld [vmem:[#allocation73_spill] sm:$0xff] }
 0x476   :  { %v1667_v54 = vpop.f32.mrf.mxu0  ;;  %v1708_v53 = vpop.f32.mrf.mxu1 }
 0x477   :  { %3658 = vpow2.f32 %v3098_v50  ;;  %v1704_v54 = vadd.f32 %v1703_v2, %v4613_v7 }
 0x482   :  { %v3657_v49 = vpop.eup %3656 }
 0x483   :  { %v1713_v47 = vadd.f32 1.0, %v3657_v49 }
 0x484   :  { %v3659_v11 = vpop.eup %3658 }
 0x485   :  { %3660 = vrcp.f32 %v1713_v47  ;;  %v1719_v49 = vadd.f32 1.0, %v3659_v11 }
 0x490   :  { %v1777_v60 = vpop.f32.mrf.mxu0  ;;  %v1818_v59 = vpop.f32.mrf.mxu1 }
 0x491   :  { %v1778_v0 = vadd.f32 %v1777_v60, %v6247_v1  ;;  %v6307_v60 = vld [vmem:[#allocation74_spill] sm:$0xff] }
 0x492   :  { %v3661_v62 = vpop.eup %3660  ;;  %v1779_v13 = vpop.f32.mrf.mxu0 }
 0x493   :  { %v3325_v56 = vpop.f32.mrf.mxu1  ;;  %v1722_v53 = vmul.f32 %v3661_v62, %v1706_v46  ;;  %v1824_v58 = vadd.f32 %v1778_v0, %v6306_v4  ;;  %v1780_v57 = vadd.f32 %v1779_v13, %v4484_v14  ;;  %v1819_v13 = vadd.f32 %v1818_v59, %v4489_v6  ;;  %v6324_v59 = vld [vmem:[#allocation29_spill] sm:$0xff] }
 0x494   :  { %v1781_v51 = vpop.f32.mrf.mxu0 }
 0x495   :  { %v1821_v55 = vpop.f32.mrf.mxu1  ;;  %v1723_v50 = vadd.f32 %v1722_v53, %v1704_v54  ;;  %v3099_v47 = vmul.f32 -1.442695, %v1824_v58  ;;  %v1831_v1 = vadd.f32 %v1780_v57, %v6307_v60  ;;  %v6309_v53 = vld [vmem:[#allocation75_spill] sm:$0xff]  ;;  %v6325_v60 = vld [vmem:[#allocation30_spill] sm:$0xff] }
 0x496   :  { %v1782_v45 = vpop.f32.mrf.mxu0 }
 0x497   :  { %v3326_v20 = vpop.f32.mrf.mxu1  ;;  %3662 = vtanh.f32 %v1723_v50  ;;  %v3100_v56 = vmul.f32 -1.442695, %v1831_v1 }
 0x498   :  { %3664 = vpow2.f32 %v3099_v47 }
 0x499   :  { %3666 = vrcp.f32 %v1719_v49 }
 0x49a   :  { %3668 = vpow2.f32 %v3100_v56  ;;  %v6326_v56 = vld [vmem:[#allocation31_spill] sm:$0xff] }
 0x4a4   :  { %v3663_v63 = vpop.eup %3662 }
 0x4a5   :  { %v3665_v2 = vpop.eup %3664  ;;  %v1725_v46 = vsub.f32 %v4770_v48, %v3663_v63  ;;  %v6345_v48 = vld [vmem:[#allocation50_spill] sm:$0xff] }
 0x4a6   :  { %v3667_v0 = vpop.eup %3666  ;;  %v1828_v62 = vadd.f32 1.0, %v3665_v2  ;;  %v6327_v2 = vld [vmem:[#allocation32_spill] sm:$0xff] }
 0x4a7   :  { %v1726_v11 = vmul.f32 %v3667_v0, %v1725_v46  ;;  %v3669_v45 = vpop.eup %3668  ;;  %v6328_v46 = vld [vmem:[#allocation33_spill] sm:$0xff]  ;;  %v6329_v0 = vld [vmem:[#allocation34_spill] sm:$0xff] }
 0x4a8   :  { %3670 = vrcp.f32 %v1828_v62  ;;  %v1835_v58 = vadd.f32 1.0, %v3669_v45  ;;  %v6330_v62 = vld [vmem:[#allocation35_spill] sm:$0xff]  ;;  %v6333_v45 = vld [vmem:[#allocation38_spill] sm:$0xff] }
 0x4a9   :  { %v5044_v55 = vadd.f32 %v3663_v63, %v1726_v11  ;;  %v6331_v11 = vld [vmem:[#allocation36_spill] sm:$0xff] }
 0x4ab   :  { %6308 = vst [vmem:[#allocation73_spill] sm:$0xff] %v5044_v55  ;;  %v1845_v20 = vpack.c.bf16 %v5044_v55, %v5044_v55 }
 0x4ad   :  { %1878 = vmatprep.mubr.bf16.mxu0 %v1845_v20  ;;  %1919 = vmatprep.mubr.bf16.mxu1 %v1845_v20  ;;  %v6332_v20 = vld [vmem:[#allocation37_spill] sm:$0xff] }
 0x4b5   :  { %v3671_v1 = vpop.eup %3670 }
 0x4b6   :  { %v1838_v54 = vmul.f32 %v3671_v1, %v1819_v13  ;;  %v6334_v13 = vld [vmem:[#allocation39_spill] sm:$0xff]  ;;  %v6335_v1 = vld [vmem:[#allocation40_spill] sm:$0xff] }
 0x4b8   :  { %v1839_v4 = vadd.f32 %v1838_v54, %v6309_v53  ;;  %v6336_v54 = vld [vmem:[#allocation41_spill] sm:$0xff]  ;;  %v6337_v53 = vld [vmem:[#allocation42_spill] sm:$0xff] }
 0x4ba   :  { %3672 = vtanh.f32 %v1839_v4  ;;  %v6338_v4 = vld [vmem:[#allocation43_spill] sm:$0xff] }
 0x4bb   :  { %3674 = vrcp.f32 %v1835_v58  ;;  %v6339_v58 = vld [vmem:[#allocation44_spill] sm:$0xff] }
 0x4c7   :  { %v3673_v51 = vpop.eup %3672 }
 0x4c8   :  { %v1841_v49 = vsub.f32 %v4777_v3, %v3673_v51  ;;  %v3675_v63 = vpop.eup %3674  ;;  %v6323_v3 = vld [vmem:[#allocation28_spill] sm:$0xff] }
 0x4ca   :  { %v1842_v50 = vmul.f32 %v3675_v63, %v1841_v49  ;;  %v6341_v49 = vld [vmem:[#allocation46_spill] sm:$0xff]  ;;  %v6342_v63 = vld [vmem:[#allocation47_spill] sm:$0xff] }
 0x4cc   :  { %v5051_v47 = vadd.f32 %v3673_v51, %v1842_v50  ;;  %v6340_v51 = vld [vmem:[#allocation45_spill] sm:$0xff]  ;;  %v6343_v50 = vld [vmem:[#allocation48_spill] sm:$0xff] }
 0x4ce   :  { %v1844_v57 = vpack.c.bf16 %v5051_v47, %v5051_v47 }
 0x4d0   :  { %1879 = vmatmul.mubr.bf16.vlgmr.msra.gmra.mxu0 %v1844_v57  ;;  %1920 = vmatmul.mubr.bf16.vlgmr.msra.gmra.mxu1 %v1844_v57 }
 0x4d1   :  { %1962 = vmatpush1.bf16.msra.mxu0 %v4632_v52  ;;  %3328 = vmatpush3.bf16.msra.mxu1 %v4635_v31  ;;  %v6310_v52 = vld [vmem:[#allocation21_spill] sm:$0xff]  ;;  %v6311_v31 = vld [vmem:[#allocation22_spill] sm:$0xff] }
 0x4d2   :  { %1963 = vmatprep.subr.bf16.mxu0 %v4638_v27  ;;  %3329 = vmatprep.subr.bf16.mxu1 %v6114_v23  ;;  %v6312_v27 = vld [vmem:[#allocation23_spill] sm:$0xff] }
 0x4d3   :  { %1993 = vmatprep.mubr.bf16.mxu0 %v6118_v44  ;;  %3343 = vmatprep.mubr.msk.bf16.mxu1 %vm4025_vm0, %v6114_v23 }
 0x4d5   :  { %1964 = vmatpush1.bf16.msra.mxu0 %v4645_v8  ;;  %3330 = vmatpush3.bf16.msra.mxu1 %v4648_v22  ;;  %v6313_v8 = vld [vmem:[#allocation24_spill] sm:$0xff]  ;;  %v6314_v22 = vld [vmem:[#allocation25_spill] sm:$0xff] }
 0x4d6   :  { %1965 = vmatprep.subr.bf16.mxu0 %v4651_v24  ;;  %3331 = vmatprep.subr.bf16.mxu1 %v6114_v23  ;;  %v6315_v24 = vld [vmem:[#allocation14_spill] sm:$0xff] }
 0x4d9   :  { %1966 = vmatpush1.bf16.msra.mxu0 %v4655_v19  ;;  %3332 = vmatpush3.bf16.msra.mxu1 %v4793_v9  ;;  %v6316_v19 = vld [vmem:[#allocation66_spill] sm:$0xff] }
 0x4da   :  { %1967 = vmatprep.subr.bf16.mxu0 %v4659_v38  ;;  %3333 = vmatprep.subr.bf16.mxu1 %v6114_v23  ;;  %v6317_v38 = vld [vmem:[#allocation65_spill] sm:$0xff] }
 0x4dd   :  { %1968 = vmatpush1.bf16.msra.mxu0 %v4663_v12  ;;  %3334 = vmatpush3.bf16.msra.mxu1 %v4799_v61  ;;  %v6318_v12 = vld [vmem:[#allocation68_spill] sm:$0xff] }
 0x4de   :  { %1969 = vmatprep.subr.bf16.mxu0 %v4667_v41  ;;  %3335 = vmatprep.subr.bf16.mxu1 %v6114_v23  ;;  %v6319_v41 = vld [vmem:[#allocation69_spill] sm:$0xff] }
 0x4e1   :  { %1970 = vmatpush1.bf16.msra.mxu0 %v4671_v43  ;;  %3336 = vmatpush3.bf16.msra.mxu1 %v4805_v5  ;;  %v6320_v43 = vld [vmem:[#allocation77_spill] sm:$0xff] }
 0x4e2   :  { %1971 = vmatprep.subr.bf16.mxu0 %v4675_v42  ;;  %3337 = vmatprep.subr.bf16.mxu1 %v6114_v23  ;;  %v6321_v42 = vld [vmem:[#allocation26_spill] sm:$0xff] }
 0x4e5   :  { %1972 = vmatpush1.bf16.msra.mxu0 %v4679_v15  ;;  %3338 = vmatpush3.bf16.msra.mxu1 %v4811_v25  ;;  %v6322_v15 = vld [vmem:[#allocation27_spill] sm:$0xff] }
 0x4e6   :  { %1973 = vmatprep.subr.bf16.mxu0 %v4814_v26  ;;  %3339 = vmatprep.subr.bf16.mxu1 %v6114_v23 }
 0x4e9   :  { %1974 = vmatpush1.bf16.msra.mxu0 %v4818_v28  ;;  %3340 = vmatpush3.bf16.msra.mxu1 %v4821_v30 }
 0x4ea   :  { %1975 = vmatprep.subr.bf16.mxu0 %v4824_v32  ;;  %3341 = vmatprep.subr.bf16.mxu1 %v6114_v23 }
 0x4ed   :  { %1976 = vmatpush1.bf16.msra.mxu0 %v4828_v33  ;;  %3342 = vmatpush3.bf16.msra.mxu1 %v4831_v34 }
 0x4ee   :  { %2064 = vmatprep.subr.bf16.mxu0 %v4834_v35  ;;  %2105 = vmatprep.subr.bf16.mxu1 %v4837_v37 }
 0x4f0   :  { %1994 = vmatmul.mubr.bf16.vlgmr.msra.gmra.mxu0 %v1844_v57  ;;  %3344 = vmatmul.mubr.bf16.vlgmr.msra.gmra.mxu1 %v1844_v57  ;;  %v6344_v57 = vld [vmem:[#allocation49_spill] sm:$0xff] }
 0x4f1   :  { %2065 = vmatpush1.bf16.msra.mxu0 %v4840_v39  ;;  %2106 = vmatpush1.bf16.msra.mxu1 %v4843_v40 }
 0x4f2   :  { %2066 = vmatprep.subr.bf16.mxu0 %v4846_v16  ;;  %2107 = vmatprep.subr.bf16.mxu1 %v4849_v17 }
 0x4f5   :  { %2067 = vmatpush1.bf16.msra.mxu0 %v4852_v10  ;;  %2108 = vmatpush1.bf16.msra.mxu1 %v4855_v21 }
 0x4f6   :  { %2068 = vmatprep.subr.bf16.mxu0 %v4858_v36  ;;  %2109 = vmatprep.subr.bf16.mxu1 %v4861_v18 }
 0x4f9   :  { %2069 = vmatpush1.bf16.msra.mxu0 %v4864_v29  ;;  %2110 = vmatpush1.bf16.msra.mxu1 %v6310_v52 }
 0x4fa   :  { %2070 = vmatprep.subr.bf16.mxu0 %v6311_v31  ;;  %2111 = vmatprep.subr.bf16.mxu1 %v6312_v27 }
 0x4fd   :  { %2071 = vmatpush1.bf16.msra.mxu0 %v6313_v8  ;;  %2112 = vmatpush1.bf16.msra.mxu1 %v6314_v22 }
 0x4fe   :  { %2072 = vmatprep.subr.bf16.mxu0 %v6315_v24  ;;  %2113 = vmatprep.subr.bf16.mxu1 %v6316_v19 }
 0x501   :  { %2073 = vmatpush1.bf16.msra.mxu0 %v6317_v38  ;;  %2114 = vmatpush1.bf16.msra.mxu1 %v6318_v12 }
 0x502   :  { %2074 = vmatprep.subr.bf16.mxu0 %v6319_v41  ;;  %2115 = vmatprep.subr.bf16.mxu1 %v6320_v43 }
 0x505   :  { %2075 = vmatpush1.bf16.msra.mxu0 %v6321_v42  ;;  %2116 = vmatpush1.bf16.msra.mxu1 %v6322_v15 }
 0x506   :  { %2076 = vmatprep.subr.bf16.mxu0 %v6323_v3  ;;  %2117 = vmatprep.subr.bf16.mxu1 %v6324_v59 }
 0x509   :  { %2077 = vmatpush1.bf16.msra.mxu0 %v6325_v60  ;;  %2118 = vmatpush1.bf16.msra.mxu1 %v6326_v56  ;;  %v6368_v60 = vld [vmem:[#allocation88_spill] sm:$0xff] }
 0x50a   :  { %2078 = vmatprep.subr.bf16.mxu0 %v6327_v2  ;;  %2119 = vmatprep.subr.bf16.mxu1 %v6328_v46  ;;  %v6367_v2 = vld [vmem:[#allocation17_spill] sm:$0xff] }
 0x50d   :  { %2079 = vmatpush1.bf16.msra.mxu0 %v6329_v0  ;;  %2120 = vmatpush1.bf16.msra.mxu1 %v6330_v62 }
 0x50e   :  { %2080 = vmatprep.subr.bf16.mxu0 %v6331_v11  ;;  %2121 = vmatprep.subr.bf16.mxu1 %v6332_v20 }
 0x511   :  { %2081 = vmatpush2.bf16.msra.mxu0 %v6333_v45  ;;  %2122 = vmatpush2.bf16.msra.mxu1 %v6334_v13 }
 0x512   :  { %2082 = vmatprep.subr.bf16.mxu0 %v6335_v1  ;;  %2123 = vmatprep.subr.bf16.mxu1 %v6336_v54  ;;  %v6346_v1 = vld [vmem:[#allocation51_spill] sm:$0xff]  ;;  %v6347_v54 = vld [vmem:[#allocation52_spill] sm:$0xff] }
 0x515   :  { %2083 = vmatpush2.bf16.msra.mxu0 %v6337_v53  ;;  %2124 = vmatpush2.bf16.msra.mxu1 %v6338_v4  ;;  %v6348_v53 = vld [vmem:[#allocation53_spill] sm:$0xff]  ;;  %v6349_v4 = vld [vmem:[#allocation54_spill] sm:$0xff] }
 0x516   :  { %2084 = vmatprep.subr.bf16.mxu0 %v6339_v58  ;;  %2125 = vmatprep.subr.bf16.mxu1 %v6340_v51  ;;  %v6350_v58 = vld [vmem:[#allocation55_spill] sm:$0xff]  ;;  %v6351_v51 = vld [vmem:[#allocation56_spill] sm:$0xff] }
 0x519   :  { %2085 = vmatpush2.bf16.msra.mxu0 %v6341_v49  ;;  %2126 = vmatpush2.bf16.msra.mxu1 %v6342_v63  ;;  %v6352_v49 = vld [vmem:[#allocation57_spill] sm:$0xff]  ;;  %v6353_v63 = vld [vmem:[#allocation58_spill] sm:$0xff] }
 0x51a   :  { %2086 = vmatprep.subr.bf16.mxu0 %v6343_v50  ;;  %2127 = vmatprep.subr.bf16.mxu1 %v6344_v57  ;;  %v6354_v50 = vld [vmem:[#allocation59_spill] sm:$0xff]  ;;  %v6355_v57 = vld [vmem:[#allocation60_spill] sm:$0xff] }
 0x51d   :  { %2087 = vmatpush2.bf16.msra.mxu0 %v6345_v48  ;;  %2128 = vmatpush2.bf16.msra.mxu1 %v6346_v1  ;;  %v6356_v48 = vld [vmem:[#allocation61_spill] sm:$0xff]  ;;  %v6357_v1 = vld [vmem:[#allocation62_spill] sm:$0xff] }
 0x51e   :  { %2088 = vmatprep.subr.bf16.mxu0 %v6347_v54  ;;  %2129 = vmatprep.subr.bf16.mxu1 %v6348_v53  ;;  %v6358_v54 = vld [vmem:[#allocation63_spill] sm:$0xff]  ;;  %v6359_v53 = vld [vmem:[#allocation64_spill] sm:$0xff] }
 0x521   :  { %2089 = vmatpush2.bf16.msra.mxu0 %v6349_v4  ;;  %2130 = vmatpush2.bf16.msra.mxu1 %v6350_v58  ;;  %v6360_v4 = vld [vmem:[#allocation67_spill] sm:$0xff]  ;;  %v6361_v58 = vld [vmem:[#allocation70_spill] sm:$0xff] }
 0x522   :  { %2090 = vmatprep.subr.bf16.mxu0 %v6351_v51  ;;  %2131 = vmatprep.subr.bf16.mxu1 %v6352_v49  ;;  %v6362_v51 = vld [vmem:[#allocation71_spill] sm:$0xff] }
 0x523   :  { %v6363_v49 = vld [vmem:[#allocation19_spill] sm:$0xff] }
 0x525   :  { %2091 = vmatpush2.bf16.msra.mxu0 %v6353_v63  ;;  %2132 = vmatpush2.bf16.msra.mxu1 %v6354_v50  ;;  %v6364_v63 = vld [vmem:[#allocation72_spill] sm:$0xff] }
 0x526   :  { %2092 = vmatprep.subr.bf16.mxu0 %v6355_v57  ;;  %2133 = vmatprep.subr.bf16.mxu1 %v6356_v48  ;;  %vm2166_vm5 = vcmp.eq.s32.totalorder %v6364_v63, 4  ;;  %v6365_v48 = vld [vmem:[#allocation15_spill] sm:$0xff] }
 0x529   :  { %2093 = vmatpush2.bf16.msra.mxu0 %v6357_v1  ;;  %2134 = vmatpush2.bf16.msra.mxu1 %v6358_v54  ;;  %v2167_v54 = vsel %vm2166_vm5, 1, %v6118_v44 }
 0x52a   :  { %2094 = vmatprep.subr.bf16.mxu0 %v6359_v53  ;;  %2135 = vmatprep.subr.bf16.mxu1 %v6360_v4 }
 0x52b   :  { %2169 = vperm.xlu0 %3440, %v2167_v54  }
 0x52d   :  { %2095 = vmatpush2.bf16.msra.mxu0 %v6361_v58  ;;  %2136 = vmatpush2.bf16.msra.mxu1 %v6362_v51 }
 0x52e   :  { %2179 = vmatprep.subr.bf16.mxu0 %v6363_v49  ;;  %3347 = vmatprep.subr.bf16.mxu1 %v6114_v23  ;;  %v6366_v49 = vld [vmem:[#allocation16_spill] sm:$0xff] }
 0x590   :  { %v1880_v50 = vpop.f32.mrf.mxu0  ;;  %v1921_v57 = vpop.f32.mrf.mxu1 }
 0x591   :  { %v1881_v1 = vadd.f32 %v1880_v50, %v6365_v48 }
 0x592   :  { %v1882_v13 = vpop.f32.mrf.mxu0  ;;  %v1923_v53 = vpop.f32.mrf.mxu1 }
 0x593   :  { %v3101_v4 = vmul.f32 -1.442695, %v1881_v1  ;;  %v1883_v11 = vadd.f32 %v1882_v13, %v6366_v49  ;;  %v1924_v56 = vadd.f32 %v1923_v53, %v6367_v2 }
 0x594   :  { %v1884_v45 = vpop.f32.mrf.mxu0  ;;  %v1925_v58 = vpop.f32.mrf.mxu1 }
 0x595   :  { %3676 = vpow2.f32 %v3101_v4  ;;  %v3102_v62 = vmul.f32 -1.442695, %v1883_v11  ;;  %v1922_v4 = vadd.f32 %v1921_v57, %v4613_v7 }
 0x596   :  { %v1885_v51 = vpop.f32.mrf.mxu0  ;;  %v1926_v20 = vpop.f32.mrf.mxu1 }
 0x597   :  { %3678 = vpow2.f32 %v3102_v62  ;;  %v6369_v51 = vld [vmem:[#allocation76_spill] sm:$0xff] }
 0x5a2   :  { %v3677_v0 = vpop.eup %3676 }
 0x5a3   :  { %v1931_v46 = vadd.f32 1.0, %v3677_v0 }
 0x5a4   :  { %v3679_v48 = vpop.eup %3678 }
 0x5a5   :  { %3680 = vrcp.f32 %v1931_v46  ;;  %v1937_v0 = vadd.f32 1.0, %v3679_v48 }
 0x5b0   :  { %v1995_v63 = vpop.f32.mrf.mxu0  ;;  %v2036_v50 = vpop.f32.mrf.mxu1 }
 0x5b1   :  { %v1996_v54 = vadd.f32 %v1995_v63, %v6368_v60  ;;  %v6370_v63 = vld [vmem:[#allocation78_spill] sm:$0xff] }
 0x5b2   :  { %v3681_v1 = vpop.eup %3680  ;;  %v1997_v45 = vpop.f32.mrf.mxu0 }
 0x5b3   :  { %v3345_v58 = vpop.f32.mrf.mxu1  ;;  %v1940_v20 = vmul.f32 %v3681_v1, %v1924_v56  ;;  %v2042_v13 = vadd.f32 %v1996_v54, %v6369_v51  ;;  %v1998_v53 = vadd.f32 %v1997_v45, %v4484_v14  ;;  %v2037_v45 = vadd.f32 %v2036_v50, %v4489_v6  ;;  %v5176_v50 = vld [vmem:[#allocation9 + $0xa8] ss:$12 sps:$4 sm:$0xff]  }
 0x5b4   :  { %v1999_v11 = vpop.f32.mrf.mxu0 }
 0x5b5   :  { %v2039_v49 = vpop.f32.mrf.mxu1  ;;  %v1941_v62 = vadd.f32 %v1940_v20, %v1922_v4  ;;  %v3103_v46 = vmul.f32 -1.442695, %v2042_v13  ;;  %v2049_v60 = vadd.f32 %v1998_v53, %v6370_v63  ;;  %v6372_v20 = vld [vmem:[#allocation81_spill] sm:$0xff] }
 0x5b6   :  { %v2000_v59 = vpop.f32.mrf.mxu0  ;;  %v5179_v63 = vld [vmem:[#allocation9 + $0xb0] ss:$12 sps:$4 sm:$0xff]  }
 0x5b7   :  { %v3346_v3 = vpop.f32.mrf.mxu1  ;;  %3682 = vtanh.f32 %v1941_v62  ;;  %v3104_v58 = vmul.f32 -1.442695, %v2049_v60 }
 0x5b8   :  { %3684 = vpow2.f32 %v3103_v46 }
 0x5b9   :  { %3686 = vrcp.f32 %v1937_v0 }
 0x5ba   :  { %3688 = vpow2.f32 %v3104_v58  ;;  %v5182_v58 = vld [vmem:[#allocation9 + $0x94] ss:$12 sps:$4 sm:$0xff]  }
 0x5c4   :  { %v3683_v2 = vpop.eup %3682 }
 0x5c5   :  { %v3685_v57 = vpop.eup %3684  ;;  %v1943_v56 = vsub.f32 %v5044_v55, %v3683_v2  ;;  %v5462_v55 = vld [vmem:[#allocation11 + $0x4] ss:$16 sps:$4 sm:$0xff]  }
 0x5c6   :  { %v3687_v54 = vpop.eup %3686  ;;  %v2046_v1 = vadd.f32 1.0, %v3685_v57  ;;  %v5192_v57 = vld [vmem:[#allocation9 + $0x98] ss:$12 sps:$4 sm:$0xff]   ;;  %6438 = vst [vmem:[#allocation81_spill] sm:$0xff] %v5462_v55 }
 0x5c7   :  { %v1944_v48 = vmul.f32 %v3687_v54, %v1943_v56  ;;  %v3689_v59 = vpop.eup %3688  ;;  %v5195_v56 = vld [vmem:[#allocation9 + $0x7c] ss:$12 sps:$4 sm:$0xff]   ;;  %v5199_v54 = vld [vmem:[#allocation9 + $0x78] ss:$12 sps:$4 sm:$0xff]  }
 0x5c8   :  { %3690 = vrcp.f32 %v2046_v1  ;;  %v2053_v13 = vadd.f32 1.0, %v3689_v59  ;;  %v5203_v1 = vld [vmem:[#allocation9 + $0x64] ss:$12 sps:$4 sm:$0xff]   ;;  %v5215_v59 = vld [vmem:[#allocation9 + $0x48] ss:$12 sps:$4 sm:$0xff]  }
 0x5c9   :  { %v5165_v49 = vadd.f32 %v3683_v2, %v1944_v48  ;;  %v5207_v48 = vld [vmem:[#allocation9 + $0x60] ss:$12 sps:$4 sm:$0xff]  }
 0x5cb   :  { %6371 = vst [vmem:[#allocation74_spill] sm:$0xff] %v5165_v49  ;;  %v2063_v3 = vpack.c.bf16 %v5165_v49, %v5165_v49 }
 0x5cd   :  { %2096 = vmatprep.mubr.bf16.mxu0 %v2063_v3  ;;  %2137 = vmatprep.mubr.bf16.mxu1 %v2063_v3  ;;  %v5211_v3 = vld [vmem:[#allocation9 + $0x4c] ss:$12 sps:$4 sm:$0xff]  }
 0x5d5   :  { %v3691_v60 = vpop.eup %3690 }
 0x5d6   :  { %v2056_v4 = vmul.f32 %v3691_v60, %v2037_v45  ;;  %v5223_v45 = vld [vmem:[#allocation9 + $0x30] ss:$12 sps:$4 sm:$0xff]  }
 0x5d7   :  { %v6406_v60 = vld [vmem:[#allocation61_spill] sm:$0xff] }
 0x5d8   :  { %v2057_v51 = vadd.f32 %v2056_v4, %v6372_v20  ;;  %v6407_v4 = vld [vmem:[#allocation62_spill] sm:$0xff]  ;;  %v6408_v20 = vld [vmem:[#allocation63_spill] sm:$0xff] }
 0x5da   :  { %3692 = vtanh.f32 %v2057_v51  ;;  %v6409_v51 = vld [vmem:[#allocation64_spill] sm:$0xff] }
 0x5db   :  { %3694 = vrcp.f32 %v2053_v13  ;;  %v6410_v13 = vld [vmem:[#allocation67_spill] sm:$0xff] }
 0x5e7   :  { %v3693_v11 = vpop.eup %3692 }
 0x5e8   :  { %v2059_v0 = vsub.f32 %v5051_v47, %v3693_v11  ;;  %v3695_v2 = vpop.eup %3694  ;;  %v5189_v47 = vld [vmem:[#allocation9 + $0x90] ss:$12 sps:$4 sm:$0xff]  }
 0x5ea   :  { %v2060_v62 = vmul.f32 %v3695_v2, %v2059_v0  ;;  %v6412_v0 = vld [vmem:[#allocation71_spill] sm:$0xff] }
 0x5eb   :  { %v5299_v2 = vld [vmem:[#allocation9 + $0xac] ss:$12 sps:$4 sm:$0xff]  }
 0x5ec   :  { %v5172_v46 = vadd.f32 %v3693_v11, %v2060_v62  ;;  %v6411_v11 = vld [vmem:[#allocation70_spill] sm:$0xff] }
 0x5ee   :  { %v2062_v53 = vpack.c.bf16 %v5172_v46, %v5172_v46 }
 0x5f0   :  { %2097 = vmatmul.mubr.bf16.vlgmr.msra.gmra.mxu0 %v2062_v53  ;;  %2138 = vmatmul.mubr.bf16.vlgmr.msra.gmra.mxu1 %v2062_v53 }
 0x5f1   :  { %2180 = vmatpush1.bf16.msra.mxu0 %v5176_v50  ;;  %3348 = vmatpush3.bf16.msra.mxu1 %v5179_v63 }
 0x5f2   :  { %2181 = vmatprep.subr.bf16.mxu0 %v5182_v58  ;;  %3349 = vmatprep.subr.bf16.mxu1 %v6114_v23 }
 0x5f3   :  { %2211 = vmatprep.mubr.bf16.mxu0 %v6118_v44  ;;  %3363 = vmatprep.mubr.msk.bf16.mxu1 %vm4025_vm0, %v6114_v23 }
 0x5f5   :  { %2182 = vmatpush1.bf16.msra.mxu0 %v5189_v47  ;;  %3350 = vmatpush3.bf16.msra.mxu1 %v5192_v57 }
 0x5f6   :  { %2183 = vmatprep.subr.bf16.mxu0 %v5195_v56  ;;  %3351 = vmatprep.subr.bf16.mxu1 %v6114_v23 }
 0x5f9   :  { %2184 = vmatpush1.bf16.msra.mxu0 %v5199_v54  ;;  %3352 = vmatpush3.bf16.msra.mxu1 %v4793_v9  ;;  %v5219_v9 = vld [vmem:[#allocation9 + $0x34] ss:$12 sps:$4 sm:$0xff]  }
 0x5fa   :  { %2185 = vmatprep.subr.bf16.mxu0 %v5203_v1  ;;  %3353 = vmatprep.subr.bf16.mxu1 %v6114_v23 }
 0x5fd   :  { %2186 = vmatpush1.bf16.msra.mxu0 %v5207_v48  ;;  %3354 = vmatpush3.bf16.msra.mxu1 %v4799_v61  ;;  %v6373_v61 = vld [vmem:[#allocation28_spill] sm:$0xff] }
 0x5fe   :  { %2187 = vmatprep.subr.bf16.mxu0 %v5211_v3  ;;  %3355 = vmatprep.subr.bf16.mxu1 %v6114_v23 }
 0x601   :  { %2188 = vmatpush1.bf16.msra.mxu0 %v5215_v59  ;;  %3356 = vmatpush3.bf16.msra.mxu1 %v4805_v5  ;;  %v6374_v5 = vld [vmem:[#allocation29_spill] sm:$0xff] }
 0x602   :  { %2189 = vmatprep.subr.bf16.mxu0 %v5219_v9  ;;  %3357 = vmatprep.subr.bf16.mxu1 %v6114_v23 }
 0x605   :  { %2190 = vmatpush1.bf16.msra.mxu0 %v5223_v45  ;;  %3358 = vmatpush3.bf16.msra.mxu1 %v4811_v25  ;;  %v6375_v25 = vld [vmem:[#allocation30_spill] sm:$0xff] }
 0x606   :  { %2191 = vmatprep.subr.bf16.mxu0 %v4814_v26  ;;  %3359 = vmatprep.subr.bf16.mxu1 %v6114_v23  ;;  %v6376_v26 = vld [vmem:[#allocation31_spill] sm:$0xff] }
 0x609   :  { %2192 = vmatpush1.bf16.msra.mxu0 %v4818_v28  ;;  %3360 = vmatpush3.bf16.msra.mxu1 %v4821_v30  ;;  %v6377_v28 = vld [vmem:[#allocation32_spill] sm:$0xff]  ;;  %v6378_v30 = vld [vmem:[#allocation33_spill] sm:$0xff] }
 0x60a   :  { %2193 = vmatprep.subr.bf16.mxu0 %v4824_v32  ;;  %3361 = vmatprep.subr.bf16.mxu1 %v6114_v23  ;;  %v6379_v32 = vld [vmem:[#allocation34_spill] sm:$0xff] }
 0x60d   :  { %2194 = vmatpush1.bf16.msra.mxu0 %v4828_v33  ;;  %3362 = vmatpush3.bf16.msra.mxu1 %v4831_v34  ;;  %v6380_v33 = vld [vmem:[#allocation35_spill] sm:$0xff]  ;;  %v6381_v34 = vld [vmem:[#allocation36_spill] sm:$0xff] }
 0x60e   :  { %2282 = vmatprep.subr.bf16.mxu0 %v4834_v35  ;;  %2323 = vmatprep.subr.bf16.mxu1 %v4837_v37  ;;  %v6382_v35 = vld [vmem:[#allocation37_spill] sm:$0xff]  ;;  %v6383_v37 = vld [vmem:[#allocation38_spill] sm:$0xff] }
 0x610   :  { %2212 = vmatmul.mubr.bf16.vlgmr.msra.gmra.mxu0 %v2062_v53  ;;  %3364 = vmatmul.mubr.bf16.vlgmr.msra.gmra.mxu1 %v2062_v53 }
 0x611   :  { %2283 = vmatpush1.bf16.msra.mxu0 %v4840_v39  ;;  %2324 = vmatpush1.bf16.msra.mxu1 %v4843_v40  ;;  %v6384_v39 = vld [vmem:[#allocation39_spill] sm:$0xff]  ;;  %v6385_v40 = vld [vmem:[#allocation40_spill] sm:$0xff] }
 0x612   :  { %2284 = vmatprep.subr.bf16.mxu0 %v4846_v16  ;;  %2325 = vmatprep.subr.bf16.mxu1 %v4849_v17  ;;  %v6386_v16 = vld [vmem:[#allocation41_spill] sm:$0xff]  ;;  %v6387_v17 = vld [vmem:[#allocation42_spill] sm:$0xff] }
 0x615   :  { %2285 = vmatpush1.bf16.msra.mxu0 %v4852_v10  ;;  %2326 = vmatpush1.bf16.msra.mxu1 %v4855_v21  ;;  %v6388_v10 = vld [vmem:[#allocation43_spill] sm:$0xff]  ;;  %v6389_v21 = vld [vmem:[#allocation44_spill] sm:$0xff] }
 0x616   :  { %2286 = vmatprep.subr.bf16.mxu0 %v4858_v36  ;;  %2327 = vmatprep.subr.bf16.mxu1 %v4861_v18  ;;  %v6390_v36 = vld [vmem:[#allocation45_spill] sm:$0xff]  ;;  %v6391_v18 = vld [vmem:[#allocation46_spill] sm:$0xff] }
 0x619   :  { %2287 = vmatpush1.bf16.msra.mxu0 %v4864_v29  ;;  %2328 = vmatpush1.bf16.msra.mxu1 %v6310_v52  ;;  %v6392_v29 = vld [vmem:[#allocation47_spill] sm:$0xff]  ;;  %v6393_v52 = vld [vmem:[#allocation48_spill] sm:$0xff] }
 0x61a   :  { %2288 = vmatprep.subr.bf16.mxu0 %v6311_v31  ;;  %2329 = vmatprep.subr.bf16.mxu1 %v6312_v27  ;;  %v6394_v31 = vld [vmem:[#allocation49_spill] sm:$0xff]  ;;  %v6395_v27 = vld [vmem:[#allocation50_spill] sm:$0xff] }
 0x61d   :  { %2289 = vmatpush1.bf16.msra.mxu0 %v6313_v8  ;;  %2330 = vmatpush1.bf16.msra.mxu1 %v6314_v22  ;;  %v6396_v8 = vld [vmem:[#allocation51_spill] sm:$0xff]  ;;  %v6397_v22 = vld [vmem:[#allocation52_spill] sm:$0xff] }
 0x61e   :  { %2290 = vmatprep.subr.bf16.mxu0 %v6315_v24  ;;  %2331 = vmatprep.subr.bf16.mxu1 %v6316_v19  ;;  %v6398_v24 = vld [vmem:[#allocation53_spill] sm:$0xff]  ;;  %v6399_v19 = vld [vmem:[#allocation54_spill] sm:$0xff] }
 0x621   :  { %2291 = vmatpush1.bf16.msra.mxu0 %v6317_v38  ;;  %2332 = vmatpush1.bf16.msra.mxu1 %v6318_v12  ;;  %v6400_v38 = vld [vmem:[#allocation55_spill] sm:$0xff]  ;;  %v6401_v12 = vld [vmem:[#allocation56_spill] sm:$0xff] }
 0x622   :  { %2292 = vmatprep.subr.bf16.mxu0 %v6319_v41  ;;  %2333 = vmatprep.subr.bf16.mxu1 %v6320_v43  ;;  %v6402_v41 = vld [vmem:[#allocation57_spill] sm:$0xff]  ;;  %v6403_v43 = vld [vmem:[#allocation58_spill] sm:$0xff] }
 0x625   :  { %2293 = vmatpush1.bf16.msra.mxu0 %v6321_v42  ;;  %2334 = vmatpush1.bf16.msra.mxu1 %v6322_v15  ;;  %v6404_v42 = vld [vmem:[#allocation59_spill] sm:$0xff]  ;;  %v6405_v15 = vld [vmem:[#allocation60_spill] sm:$0xff] }
 0x626   :  { %2294 = vmatprep.subr.bf16.mxu0 %v6373_v61  ;;  %2335 = vmatprep.subr.bf16.mxu1 %v6374_v5  ;;  %v6413_v61 = vld [vmem:[#allocation72_spill] sm:$0xff]  ;;  %v6414_v5 = vld [vmem:[#allocation15_spill] sm:$0xff] }
 0x627   :  { %vm2384_vm6 = vcmp.eq.s32.totalorder %v6413_v61, 5 }
 0x629   :  { %2295 = vmatpush1.bf16.msra.mxu0 %v6375_v25  ;;  %2336 = vmatpush1.bf16.msra.mxu1 %v6376_v26  ;;  %v2385_v26 = vsel %vm2384_vm6, 1, %v6118_v44 }
 0x62a   :  { %2296 = vmatprep.subr.bf16.mxu0 %v6377_v28  ;;  %2337 = vmatprep.subr.bf16.mxu1 %v6378_v30 }
 0x62b   :  { %2387 = vperm.xlu1 %3441, %v2385_v26  }
 0x62d   :  { %2297 = vmatpush1.bf16.msra.mxu0 %v6379_v32  ;;  %2338 = vmatpush1.bf16.msra.mxu1 %v6380_v33 }
 0x62e   :  { %2298 = vmatprep.subr.bf16.mxu0 %v6381_v34  ;;  %2339 = vmatprep.subr.bf16.mxu1 %v6382_v35 }
 0x631   :  { %2299 = vmatpush2.bf16.msra.mxu0 %v6383_v37  ;;  %2340 = vmatpush2.bf16.msra.mxu1 %v6384_v39  ;;  %v6415_v39 = vld [vmem:[#allocation16_spill] sm:$0xff] }
 0x632   :  { %2300 = vmatprep.subr.bf16.mxu0 %v6385_v40  ;;  %2341 = vmatprep.subr.bf16.mxu1 %v6386_v16 }
 0x635   :  { %2301 = vmatpush2.bf16.msra.mxu0 %v6387_v17  ;;  %2342 = vmatpush2.bf16.msra.mxu1 %v6388_v10 }
 0x636   :  { %2302 = vmatprep.subr.bf16.mxu0 %v6389_v21  ;;  %2343 = vmatprep.subr.bf16.mxu1 %v6390_v36 }
 0x639   :  { %2303 = vmatpush2.bf16.msra.mxu0 %v6391_v18  ;;  %2344 = vmatpush2.bf16.msra.mxu1 %v6392_v29  ;;  %v6416_v29 = vld [vmem:[#allocation17_spill] sm:$0xff] }
 0x63a   :  { %2304 = vmatprep.subr.bf16.mxu0 %v6393_v52  ;;  %2345 = vmatprep.subr.bf16.mxu1 %v6394_v31  ;;  %v6417_v31 = vld [vmem:[#allocation88_spill] sm:$0xff] }
 0x63d   :  { %2305 = vmatpush2.bf16.msra.mxu0 %v6395_v27  ;;  %2346 = vmatpush2.bf16.msra.mxu1 %v6396_v8 }
 0x63e   :  { %2306 = vmatprep.subr.bf16.mxu0 %v6397_v22  ;;  %2347 = vmatprep.subr.bf16.mxu1 %v6398_v24 }
 0x641   :  { %2307 = vmatpush2.bf16.msra.mxu0 %v6399_v19  ;;  %2348 = vmatpush2.bf16.msra.mxu1 %v6400_v38 }
 0x642   :  { %2308 = vmatprep.subr.bf16.mxu0 %v6401_v12  ;;  %2349 = vmatprep.subr.bf16.mxu1 %v6402_v41  ;;  %v6418_v12 = vld [vmem:[#allocation80_spill] sm:$0xff] }
 0x645   :  { %2309 = vmatpush2.bf16.msra.mxu0 %v6403_v43  ;;  %2350 = vmatpush2.bf16.msra.mxu1 %v6404_v42 }
 0x646   :  { %2310 = vmatprep.subr.bf16.mxu0 %v6405_v15  ;;  %2351 = vmatprep.subr.bf16.mxu1 %v6406_v60 }
 0x649   :  { %2311 = vmatpush2.bf16.msra.mxu0 %v6407_v4  ;;  %2352 = vmatpush2.bf16.msra.mxu1 %v6408_v20 }
 0x64a   :  { %2312 = vmatprep.subr.bf16.mxu0 %v6409_v51  ;;  %2353 = vmatprep.subr.bf16.mxu1 %v6410_v13 }
 0x64d   :  { %2313 = vmatpush2.bf16.msra.mxu0 %v6411_v11  ;;  %2354 = vmatpush2.bf16.msra.mxu1 %v6412_v0  ;;  %v6419_v11 = vld [vmem:[#allocation82_spill] sm:$0xff] }
 0x64e   :  { %2397 = vmatprep.subr.bf16.mxu0 %v5299_v2  ;;  %3367 = vmatprep.subr.bf16.mxu1 %v6114_v23 }
 0x6b0   :  { %v2098_v62 = vpop.f32.mrf.mxu0  ;;  %v2139_v53 = vpop.f32.mrf.mxu1 }
 0x6b1   :  { %v2099_v25 = vadd.f32 %v2098_v62, %v6414_v5  ;;  %v2140_v19 = vadd.f32 %v2139_v53, %v4613_v7 }
 0x6b2   :  { %v2100_v28 = vpop.f32.mrf.mxu0  ;;  %v2141_v30 = vpop.f32.mrf.mxu1 }
 0x6b3   :  { %v3105_v32 = vmul.f32 -1.442695, %v2099_v25  ;;  %v2101_v40 = vadd.f32 %v2100_v28, %v6415_v39  ;;  %v2142_v52 = vadd.f32 %v2141_v30, %v6416_v29 }
 0x6b4   :  { %v2102_v33 = vpop.f32.mrf.mxu0  ;;  %v2143_v34 = vpop.f32.mrf.mxu1 }
 0x6b5   :  { %3696 = vpow2.f32 %v3105_v32  ;;  %v3106_v16 = vmul.f32 -1.442695, %v2101_v40 }
 0x6b6   :  { %v2103_v35 = vpop.f32.mrf.mxu0  ;;  %v2144_v37 = vpop.f32.mrf.mxu1 }
 0x6b7   :  { %3698 = vpow2.f32 %v3106_v16  ;;  %v6420_v16 = vld [vmem:[#allocation85_spill] sm:$0xff] }
 0x6c2   :  { %v3697_v17 = vpop.eup %3696 }
 0x6c3   :  { %v2149_v10 = vadd.f32 1.0, %v3697_v17 }
 0x6c4   :  { %v3699_v18 = vpop.eup %3698 }
 0x6c5   :  { %3700 = vrcp.f32 %v2149_v10  ;;  %v2155_v15 = vadd.f32 1.0, %v3699_v18 }
 0x6d0   :  { %v2213_v21 = vpop.f32.mrf.mxu0  ;;  %v2254_v36 = vpop.f32.mrf.mxu1 }
 0x6d1   :  { %v2214_v27 = vadd.f32 %v2213_v21, %v6417_v31  ;;  %v2255_v35 = vadd.f32 %v2254_v36, %v4489_v6  ;;  %v5343_v36 = vld [vmem:[#allocation9 + $0x68] ss:$12 sps:$4 sm:$0xff]  }
 0x6d2   :  { %v3701_v8 = vpop.eup %3700  ;;  %v2215_v22 = vpop.f32.mrf.mxu0 }
 0x6d3   :  { %v3365_v24 = vpop.f32.mrf.mxu1  ;;  %v2158_v38 = vmul.f32 %v3701_v8, %v2142_v52  ;;  %v2260_v41 = vadd.f32 %v2214_v27, %v6418_v12  ;;  %v2216_v13 = vadd.f32 %v2215_v22, %v4484_v14  ;;  %v5362_v12 = vld [vmem:[#allocation9 + $0x18] ss:$12 sps:$4 sm:$0xff]  }
 0x6d4   :  { %v2217_v43 = vpop.f32.mrf.mxu0  ;;  %v5349_v24 = vld [vmem:[#allocation9 + $0x50] ss:$12 sps:$4 sm:$0xff]  }
 0x6d5   :  { %v2257_v42 = vpop.f32.mrf.mxu1  ;;  %v2159_v60 = vadd.f32 %v2158_v38, %v2140_v19  ;;  %v3107_v4 = vmul.f32 -1.442695, %v2260_v41  ;;  %v2267_v0 = vadd.f32 %v2216_v13, %v6419_v11  ;;  %v5355_v19 = vld [vmem:[#allocation9 + $0x38] ss:$12 sps:$4 sm:$0xff]   ;;  %v5358_v38 = vld [vmem:[#allocation9 + $0x1c] ss:$12 sps:$4 sm:$0xff]  }
 0x6d6   :  { %v2218_v20 = vpop.f32.mrf.mxu0  ;;  %v5365_v41 = vld [vmem:[#allocation9 + $0x20] ss:$12 sps:$4 sm:$0xff]   ;;  %v5368_v43 = vld [vmem:[#allocation9 + $0x4] ss:$12 sps:$4 sm:$0xff]  }
 0x6d7   :  { %v3366_v51 = vpop.f32.mrf.mxu1  ;;  %3702 = vtanh.f32 %v2159_v60  ;;  %v3108_v62 = vmul.f32 -1.442695, %v2267_v0  ;;  %v5372_v42 = vld [vmem:[#allocation9] ss:$12 sps:$4 sm:$0xff]   ;;  %v5378_v60 = vld [vmem:[#allocation11 + $0xe4] ss:$16 sps:$4 sm:$0xff]  }
 0x6d8   :  { %3704 = vpow2.f32 %v3107_v4  ;;  %v5381_v4 = vld [vmem:[#allocation11 + $0xec] ss:$16 sps:$4 sm:$0xff]   ;;  %v5384_v20 = vld [vmem:[#allocation11 + $0xe0] ss:$16 sps:$4 sm:$0xff]   ;;  %v5387_v51 = vld [vmem:[#allocation11 + $0xe8] ss:$16 sps:$4 sm:$0xff]  }
 0x6d9   :  { %3706 = vrcp.f32 %v2155_v15  ;;  %v5375_v15 = vld [vmem:[#allocation9 + $0x8] ss:$12 sps:$4 sm:$0xff]   ;;  %v5393_v11 = vld [vmem:[#allocation11 + $0xcc] ss:$16 sps:$4 sm:$0xff]   ;;  %v5396_v0 = vld [vmem:[#allocation11 + $0xc0] ss:$16 sps:$4 sm:$0xff]  }
 0x6da   :  { %3708 = vpow2.f32 %v3108_v62  ;;  %v5390_v13 = vld [vmem:[#allocation11 + $0xc4] ss:$16 sps:$4 sm:$0xff]   ;;  %v5399_v62 = vld [vmem:[#allocation11 + $0xc8] ss:$16 sps:$4 sm:$0xff]  }
 0x6e4   :  { %v3703_v61 = vpop.eup %3702 }
 0x6e5   :  { %v3705_v53 = vpop.eup %3704  ;;  %v2161_v25 = vsub.f32 %v5165_v49, %v3703_v61  ;;  %v5459_v49 = vld [vmem:[#allocation11 + $0x28] ss:$16 sps:$4 sm:$0xff]  }
 0x6e6   :  { %v3707_v26 = vpop.eup %3706  ;;  %v2264_v28 = vadd.f32 1.0, %v3705_v53  ;;  %v5405_v53 = vld [vmem:[#allocation11 + $0xac] ss:$16 sps:$4 sm:$0xff]   ;;  %6437 = vst [vmem:[#allocation78_spill] sm:$0xff] %v5459_v49 }
 0x6e7   :  { %v2162_v30 = vmul.f32 %v3707_v26, %v2161_v25  ;;  %v3709_v34 = vpop.eup %3708  ;;  %v5408_v25 = vld [vmem:[#allocation11 + $0xa0] ss:$16 sps:$4 sm:$0xff]   ;;  %v5411_v26 = vld [vmem:[#allocation11 + $0xa8] ss:$16 sps:$4 sm:$0xff]  }
 0x6e8   :  { %3710 = vrcp.f32 %v2264_v28  ;;  %v2271_v10 = vadd.f32 1.0, %v3709_v34  ;;  %6421 = vst [vmem:[#allocation75_spill] sm:$0xff] %v5411_v26  ;;  %v5414_v28 = vld [vmem:[#allocation11 + $0x84] ss:$16 sps:$4 sm:$0xff]   ;;  %v5423_v34 = vld [vmem:[#allocation11 + $0x88] ss:$16 sps:$4 sm:$0xff]  }
 0x6e9   :  { %v5314_v32 = vadd.f32 %v3703_v61, %v2162_v30  ;;  %v5402_v61 = vld [vmem:[#allocation11 + $0xa4] ss:$16 sps:$4 sm:$0xff]   ;;  %6422 = vst [vmem:[#allocation21_spill] sm:$0xff] %v5414_v28  ;;  %v5417_v30 = vld [vmem:[#allocation11 + $0x8c] ss:$16 sps:$4 sm:$0xff]   ;;  %6425 = vst [vmem:[#allocation24_spill] sm:$0xff] %v5423_v34 }
 0x6ea   :  { %6423 = vst [vmem:[#allocation22_spill] sm:$0xff] %v5417_v30 }
 0x6eb   :  { %v2281_v33 = vpack.c.bf16 %v5314_v32, %v5314_v32 }
 0x6ed   :  { %2314 = vmatprep.mubr.bf16.mxu0 %v2281_v33  ;;  %2355 = vmatprep.mubr.bf16.mxu1 %v2281_v33  ;;  %v5420_v33 = vld [vmem:[#allocation11 + $0x80] ss:$16 sps:$4 sm:$0xff]  }
 0x6ee   :  { %6424 = vst [vmem:[#allocation23_spill] sm:$0xff] %v5420_v33 }
 0x6f5   :  { %v3711_v37 = vpop.eup %3710 }
 0x6f6   :  { %v2274_v40 = vmul.f32 %v3711_v37, %v2255_v35  ;;  %v5426_v35 = vld [vmem:[#allocation11 + $0x64] ss:$16 sps:$4 sm:$0xff]   ;;  %v5429_v37 = vld [vmem:[#allocation11 + $0x6c] ss:$16 sps:$4 sm:$0xff]  }
 0x6f7   :  { %6426 = vst [vmem:[#allocation25_spill] sm:$0xff] %v5426_v35  ;;  %6427 = vst [vmem:[#allocation14_spill] sm:$0xff] %v5429_v37 }
 0x6f8   :  { %v2275_v17 = vadd.f32 %v2274_v40, %v6420_v16  ;;  %v5432_v40 = vld [vmem:[#allocation11 + $0x60] ss:$16 sps:$4 sm:$0xff]   ;;  %v5435_v16 = vld [vmem:[#allocation11 + $0x68] ss:$16 sps:$4 sm:$0xff]  }
 0x6f9   :  { %6428 = vst [vmem:[#allocation66_spill] sm:$0xff] %v5432_v40  ;;  %6429 = vst [vmem:[#allocation65_spill] sm:$0xff] %v5435_v16 }
 0x6fa   :  { %3712 = vtanh.f32 %v2275_v17  ;;  %v5438_v17 = vld [vmem:[#allocation11 + $0x44] ss:$16 sps:$4 sm:$0xff]  }
 0x6fb   :  { %3714 = vrcp.f32 %v2271_v10  ;;  %6430 = vst [vmem:[#allocation68_spill] sm:$0xff] %v5438_v17  ;;  %v5441_v10 = vld [vmem:[#allocation11 + $0x4c] ss:$16 sps:$4 sm:$0xff]  }
 0x6fc   :  { %6431 = vst [vmem:[#allocation69_spill] sm:$0xff] %v5441_v10 }
 0x707   :  { %v3713_v21 = vpop.eup %3712 }
 0x708   :  { %v2277_v18 = vsub.f32 %v5172_v46, %v3713_v21  ;;  %v3715_v52 = vpop.eup %3714  ;;  %v5337_v46 = vld [vmem:[#allocation9 + $0x80] ss:$12 sps:$4 sm:$0xff]  }
 0x70a   :  { %v2278_v27 = vmul.f32 %v3715_v52, %v2277_v18  ;;  %v5447_v18 = vld [vmem:[#allocation11 + $0x48] ss:$16 sps:$4 sm:$0xff]   ;;  %v5450_v52 = vld [vmem:[#allocation11 + $0x24] ss:$16 sps:$4 sm:$0xff]  }
 0x70b   :  { %6433 = vst [vmem:[#allocation26_spill] sm:$0xff] %v5447_v18  ;;  %6434 = vst [vmem:[#allocation27_spill] sm:$0xff] %v5450_v52 }
 0x70c   :  { %v5321_v8 = vadd.f32 %v3713_v21, %v2278_v27  ;;  %v5444_v21 = vld [vmem:[#allocation11 + $0x40] ss:$16 sps:$4 sm:$0xff]   ;;  %v5453_v27 = vld [vmem:[#allocation11 + $0x2c] ss:$16 sps:$4 sm:$0xff]  }
 0x70d   :  { %6432 = vst [vmem:[#allocation77_spill] sm:$0xff] %v5444_v21  ;;  %6435 = vst [vmem:[#allocation19_spill] sm:$0xff] %v5453_v27 }
 0x70e   :  { %v2280_v22 = vpack.c.bf16 %v5321_v8, %v5321_v8 }
 0x710   :  { %2315 = vmatmul.mubr.bf16.vlgmr.msra.gmra.mxu0 %v2280_v22  ;;  %2356 = vmatmul.mubr.bf16.vlgmr.msra.gmra.mxu1 %v2280_v22 }
 0x711   :  { %2398 = vmatpush1.bf16.msra.mxu0 %v5176_v50  ;;  %3368 = vmatpush3.bf16.msra.mxu1 %v5179_v63 }
 0x712   :  { %2399 = vmatprep.subr.bf16.mxu0 %v5182_v58  ;;  %3369 = vmatprep.subr.bf16.mxu1 %v6114_v23 }
 0x713   :  { %2429 = vmatprep.mubr.bf16.mxu0 %v6118_v44  ;;  %3383 = vmatprep.mubr.msk.bf16.mxu1 %vm4025_vm0, %v6114_v23 }
 0x715   :  { %2400 = vmatpush1.bf16.msra.mxu0 %v5189_v47  ;;  %3370 = vmatpush3.bf16.msra.mxu1 %v5192_v57 }
 0x716   :  { %2401 = vmatprep.subr.bf16.mxu0 %v5195_v56  ;;  %3371 = vmatprep.subr.bf16.mxu1 %v6114_v23 }
 0x719   :  { %2402 = vmatpush1.bf16.msra.mxu0 %v5199_v54  ;;  %3372 = vmatpush3.bf16.msra.mxu1 %v5337_v46 }
 0x71a   :  { %2403 = vmatprep.subr.bf16.mxu0 %v5203_v1  ;;  %3373 = vmatprep.subr.bf16.mxu1 %v6114_v23 }
 0x71d   :  { %2404 = vmatpush1.bf16.msra.mxu0 %v5207_v48  ;;  %3374 = vmatpush3.bf16.msra.mxu1 %v5343_v36 }
 0x71e   :  { %2405 = vmatprep.subr.bf16.mxu0 %v5211_v3  ;;  %3375 = vmatprep.subr.bf16.mxu1 %v6114_v23 }
 0x721   :  { %2406 = vmatpush1.bf16.msra.mxu0 %v5215_v59  ;;  %3376 = vmatpush3.bf16.msra.mxu1 %v5349_v24 }
 0x722   :  { %2407 = vmatprep.subr.bf16.mxu0 %v5219_v9  ;;  %3377 = vmatprep.subr.bf16.mxu1 %v6114_v23 }
 0x725   :  { %2408 = vmatpush1.bf16.msra.mxu0 %v5223_v45  ;;  %3378 = vmatpush3.bf16.msra.mxu1 %v5355_v19 }
 0x726   :  { %2409 = vmatprep.subr.bf16.mxu0 %v5358_v38  ;;  %3379 = vmatprep.subr.bf16.mxu1 %v6114_v23 }
 0x729   :  { %2410 = vmatpush1.bf16.msra.mxu0 %v5362_v12  ;;  %3380 = vmatpush3.bf16.msra.mxu1 %v5365_v41 }
 0x72a   :  { %2411 = vmatprep.subr.bf16.mxu0 %v5368_v43  ;;  %3381 = vmatprep.subr.bf16.mxu1 %v6114_v23 }
 0x72d   :  { %2412 = vmatpush1.bf16.msra.mxu0 %v5372_v42  ;;  %3382 = vmatpush3.bf16.msra.mxu1 %v5375_v15 }
 0x72e   :  { %2500 = vmatprep.subr.bf16.mxu0 %v5378_v60  ;;  %2541 = vmatprep.subr.bf16.mxu1 %v5381_v4 }
 0x730   :  { %2430 = vmatmul.mubr.bf16.vlgmr.msra.gmra.mxu0 %v2280_v22  ;;  %3384 = vmatmul.mubr.bf16.vlgmr.msra.gmra.mxu1 %v2280_v22  ;;  %v5456_v22 = vld [vmem:[#allocation11 + $0x20] ss:$16 sps:$4 sm:$0xff]  }
 0x731   :  { %2501 = vmatpush1.bf16.msra.mxu0 %v5384_v20  ;;  %2542 = vmatpush1.bf16.msra.mxu1 %v5387_v51  ;;  %6436 = vst [vmem:[#allocation76_spill] sm:$0xff] %v5456_v22 }
 0x732   :  { %2502 = vmatprep.subr.bf16.mxu0 %v5390_v13  ;;  %2543 = vmatprep.subr.bf16.mxu1 %v5393_v11 }
 0x735   :  { %2503 = vmatpush1.bf16.msra.mxu0 %v5396_v0  ;;  %2544 = vmatpush1.bf16.msra.mxu1 %v5399_v62 }
 0x736   :  { %2504 = vmatprep.subr.bf16.mxu0 %v5402_v61  ;;  %2545 = vmatprep.subr.bf16.mxu1 %v5405_v53 }
 0x739   :  { %2505 = vmatpush1.bf16.msra.mxu0 %v5408_v25  ;;  %2546 = vmatpush1.bf16.msra.mxu1 %v5411_v26 }
 0x73a   :  { %2506 = vmatprep.subr.bf16.mxu0 %v5414_v28  ;;  %2547 = vmatprep.subr.bf16.mxu1 %v5417_v30 }
 0x73d   :  { %2507 = vmatpush1.bf16.msra.mxu0 %v5420_v33  ;;  %2548 = vmatpush1.bf16.msra.mxu1 %v5423_v34 }
 0x73e   :  { %2508 = vmatprep.subr.bf16.mxu0 %v5426_v35  ;;  %2549 = vmatprep.subr.bf16.mxu1 %v5429_v37 }
 0x741   :  { %2509 = vmatpush1.bf16.msra.mxu0 %v5432_v40  ;;  %2550 = vmatpush1.bf16.msra.mxu1 %v5435_v16 }
 0x742   :  { %2510 = vmatprep.subr.bf16.mxu0 %v5438_v17  ;;  %2551 = vmatprep.subr.bf16.mxu1 %v5441_v10 }
 0x745   :  { %2511 = vmatpush1.bf16.msra.mxu0 %v5444_v21  ;;  %2552 = vmatpush1.bf16.msra.mxu1 %v5447_v18  ;;  %v5465_v18 = vld [vmem:[#allocation11 + $0xc] ss:$16 sps:$4 sm:$0xff]  }
 0x746   :  { %2512 = vmatprep.subr.bf16.mxu0 %v5450_v52  ;;  %2553 = vmatprep.subr.bf16.mxu1 %v5453_v27  ;;  %6439 = vst [vmem:[#allocation28_spill] sm:$0xff] %v5465_v18  ;;  %v5468_v52 = vld [vmem:[#allocation11] ss:$16 sps:$4 sm:$0xff]   ;;  %v5471_v27 = vld [vmem:[#allocation11 + $0x8] ss:$16 sps:$4 sm:$0xff]  }
 0x747   :  { %6440 = vst [vmem:[#allocation29_spill] sm:$0xff] %v5468_v52  ;;  %6441 = vst [vmem:[#allocation30_spill] sm:$0xff] %v5471_v27 }
 0x749   :  { %2513 = vmatpush1.bf16.msra.mxu0 %v5456_v22  ;;  %2554 = vmatpush1.bf16.msra.mxu1 %v5459_v49  ;;  %v5474_v22 = vld [vmem:[#allocation11 + $0x1e4] ss:$16 sps:$4 sm:$0xff]   ;;  %v5477_v49 = vld [vmem:[#allocation11 + $0x1ec] ss:$16 sps:$4 sm:$0xff]  }
 0x74a   :  { %2514 = vmatprep.subr.bf16.mxu0 %v5462_v55  ;;  %2555 = vmatprep.subr.bf16.mxu1 %v5465_v18  ;;  %6442 = vst [vmem:[#allocation31_spill] sm:$0xff] %v5474_v22  ;;  %6443 = vst [vmem:[#allocation32_spill] sm:$0xff] %v5477_v49  ;;  %v5480_v55 = vld [vmem:[#allocation11 + $0x1e0] ss:$16 sps:$4 sm:$0xff]   ;;  %v5483_v18 = vld [vmem:[#allocation11 + $0x1e8] ss:$16 sps:$4 sm:$0xff]  }
 0x74b   :  { %6444 = vst [vmem:[#allocation33_spill] sm:$0xff] %v5480_v55  ;;  %6445 = vst [vmem:[#allocation34_spill] sm:$0xff] %v5483_v18 }
 0x74d   :  { %2515 = vmatpush1.bf16.msra.mxu0 %v5468_v52  ;;  %2556 = vmatpush1.bf16.msra.mxu1 %v5471_v27  ;;  %v5486_v52 = vld [vmem:[#allocation11 + $0x1c4] ss:$16 sps:$4 sm:$0xff]   ;;  %v5489_v27 = vld [vmem:[#allocation11 + $0x1cc] ss:$16 sps:$4 sm:$0xff]  }
 0x74e   :  { %2516 = vmatprep.subr.bf16.mxu0 %v5474_v22  ;;  %2557 = vmatprep.subr.bf16.mxu1 %v5477_v49  ;;  %6446 = vst [vmem:[#allocation35_spill] sm:$0xff] %v5486_v52  ;;  %6447 = vst [vmem:[#allocation36_spill] sm:$0xff] %v5489_v27  ;;  %v5492_v22 = vld [vmem:[#allocation11 + $0x1c0] ss:$16 sps:$4 sm:$0xff]   ;;  %v5495_v49 = vld [vmem:[#allocation11 + $0x1c8] ss:$16 sps:$4 sm:$0xff]  }
 0x74f   :  { %6448 = vst [vmem:[#allocation37_spill] sm:$0xff] %v5492_v22  ;;  %6449 = vst [vmem:[#allocation38_spill] sm:$0xff] %v5495_v49 }
 0x751   :  { %2517 = vmatpush2.bf16.msra.mxu0 %v5480_v55  ;;  %2558 = vmatpush2.bf16.msra.mxu1 %v5483_v18  ;;  %v5498_v55 = vld [vmem:[#allocation11 + $0x1a4] ss:$16 sps:$4 sm:$0xff]   ;;  %v5501_v18 = vld [vmem:[#allocation11 + $0x1ac] ss:$16 sps:$4 sm:$0xff]  }
 0x752   :  { %2518 = vmatprep.subr.bf16.mxu0 %v5486_v52  ;;  %2559 = vmatprep.subr.bf16.mxu1 %v5489_v27  ;;  %6450 = vst [vmem:[#allocation39_spill] sm:$0xff] %v5498_v55  ;;  %6451 = vst [vmem:[#allocation40_spill] sm:$0xff] %v5501_v18  ;;  %v5504_v52 = vld [vmem:[#allocation11 + $0x1a0] ss:$16 sps:$4 sm:$0xff]   ;;  %v5507_v27 = vld [vmem:[#allocation11 + $0x1a8] ss:$16 sps:$4 sm:$0xff]  }
 0x753   :  { %6452 = vst [vmem:[#allocation41_spill] sm:$0xff] %v5504_v52  ;;  %6453 = vst [vmem:[#allocation42_spill] sm:$0xff] %v5507_v27 }
 0x755   :  { %2519 = vmatpush2.bf16.msra.mxu0 %v5492_v22  ;;  %2560 = vmatpush2.bf16.msra.mxu1 %v5495_v49  ;;  %v5510_v22 = vld [vmem:[#allocation11 + $0x184] ss:$16 sps:$4 sm:$0xff]   ;;  %v5513_v49 = vld [vmem:[#allocation11 + $0x18c] ss:$16 sps:$4 sm:$0xff]  }
 0x756   :  { %2520 = vmatprep.subr.bf16.mxu0 %v5498_v55  ;;  %2561 = vmatprep.subr.bf16.mxu1 %v5501_v18  ;;  %6454 = vst [vmem:[#allocation43_spill] sm:$0xff] %v5510_v22  ;;  %6455 = vst [vmem:[#allocation44_spill] sm:$0xff] %v5513_v49  ;;  %v5516_v55 = vld [vmem:[#allocation11 + $0x180] ss:$16 sps:$4 sm:$0xff]   ;;  %v5519_v18 = vld [vmem:[#allocation11 + $0x188] ss:$16 sps:$4 sm:$0xff]  }
 0x757   :  { %6456 = vst [vmem:[#allocation45_spill] sm:$0xff] %v5516_v55  ;;  %6457 = vst [vmem:[#allocation46_spill] sm:$0xff] %v5519_v18 }
 0x759   :  { %2521 = vmatpush2.bf16.msra.mxu0 %v5504_v52  ;;  %2562 = vmatpush2.bf16.msra.mxu1 %v5507_v27  ;;  %v5522_v52 = vld [vmem:[#allocation11 + $0x164] ss:$16 sps:$4 sm:$0xff]   ;;  %v5525_v27 = vld [vmem:[#allocation11 + $0x16c] ss:$16 sps:$4 sm:$0xff]  }
 0x75a   :  { %2522 = vmatprep.subr.bf16.mxu0 %v5510_v22  ;;  %2563 = vmatprep.subr.bf16.mxu1 %v5513_v49  ;;  %6458 = vst [vmem:[#allocation47_spill] sm:$0xff] %v5522_v52  ;;  %6459 = vst [vmem:[#allocation48_spill] sm:$0xff] %v5525_v27  ;;  %v5528_v22 = vld [vmem:[#allocation11 + $0x160] ss:$16 sps:$4 sm:$0xff]   ;;  %v5531_v49 = vld [vmem:[#allocation11 + $0x168] ss:$16 sps:$4 sm:$0xff]  }
 0x75b   :  { %6460 = vst [vmem:[#allocation49_spill] sm:$0xff] %v5528_v22  ;;  %6461 = vst [vmem:[#allocation50_spill] sm:$0xff] %v5531_v49 }
 0x75d   :  { %2523 = vmatpush2.bf16.msra.mxu0 %v5516_v55  ;;  %2564 = vmatpush2.bf16.msra.mxu1 %v5519_v18  ;;  %v5534_v55 = vld [vmem:[#allocation11 + $0x144] ss:$16 sps:$4 sm:$0xff]   ;;  %v5537_v18 = vld [vmem:[#allocation11 + $0x14c] ss:$16 sps:$4 sm:$0xff]  }
 0x75e   :  { %2524 = vmatprep.subr.bf16.mxu0 %v5522_v52  ;;  %2565 = vmatprep.subr.bf16.mxu1 %v5525_v27  ;;  %6462 = vst [vmem:[#allocation51_spill] sm:$0xff] %v5534_v55  ;;  %6463 = vst [vmem:[#allocation52_spill] sm:$0xff] %v5537_v18  ;;  %v5540_v52 = vld [vmem:[#allocation11 + $0x140] ss:$16 sps:$4 sm:$0xff]   ;;  %v5543_v27 = vld [vmem:[#allocation11 + $0x148] ss:$16 sps:$4 sm:$0xff]  }
 0x75f   :  { %6464 = vst [vmem:[#allocation53_spill] sm:$0xff] %v5540_v52  ;;  %6465 = vst [vmem:[#allocation54_spill] sm:$0xff] %v5543_v27 }
 0x761   :  { %2525 = vmatpush2.bf16.msra.mxu0 %v5528_v22  ;;  %2566 = vmatpush2.bf16.msra.mxu1 %v5531_v49  ;;  %v5546_v22 = vld [vmem:[#allocation11 + $0x124] ss:$16 sps:$4 sm:$0xff]   ;;  %v5549_v49 = vld [vmem:[#allocation11 + $0x12c] ss:$16 sps:$4 sm:$0xff]  }
 0x762   :  { %2526 = vmatprep.subr.bf16.mxu0 %v5534_v55  ;;  %2567 = vmatprep.subr.bf16.mxu1 %v5537_v18  ;;  %6466 = vst [vmem:[#allocation55_spill] sm:$0xff] %v5546_v22  ;;  %6467 = vst [vmem:[#allocation56_spill] sm:$0xff] %v5549_v49  ;;  %v5552_v55 = vld [vmem:[#allocation11 + $0x120] ss:$16 sps:$4 sm:$0xff]   ;;  %v5555_v18 = vld [vmem:[#allocation11 + $0x128] ss:$16 sps:$4 sm:$0xff]  }
 0x763   :  { %6468 = vst [vmem:[#allocation57_spill] sm:$0xff] %v5552_v55  ;;  %6469 = vst [vmem:[#allocation58_spill] sm:$0xff] %v5555_v18 }
 0x765   :  { %2527 = vmatpush2.bf16.msra.mxu0 %v5540_v52  ;;  %2568 = vmatpush2.bf16.msra.mxu1 %v5543_v27  ;;  %v5558_v52 = vld [vmem:[#allocation11 + $0x104] ss:$16 sps:$4 sm:$0xff]   ;;  %v5561_v27 = vld [vmem:[#allocation11 + $0x10c] ss:$16 sps:$4 sm:$0xff]  }
 0x766   :  { %2528 = vmatprep.subr.bf16.mxu0 %v5546_v22  ;;  %2569 = vmatprep.subr.bf16.mxu1 %v5549_v49  ;;  %6470 = vst [vmem:[#allocation59_spill] sm:$0xff] %v5558_v52  ;;  %6471 = vst [vmem:[#allocation60_spill] sm:$0xff] %v5561_v27  ;;  %v5564_v22 = vld [vmem:[#allocation11 + $0x100] ss:$16 sps:$4 sm:$0xff]   ;;  %v5567_v49 = vld [vmem:[#allocation11 + $0x108] ss:$16 sps:$4 sm:$0xff]  }
 0x767   :  { %6472 = vst [vmem:[#allocation61_spill] sm:$0xff] %v5564_v22  ;;  %6473 = vst [vmem:[#allocation62_spill] sm:$0xff] %v5567_v49 }
 0x769   :  { %2529 = vmatpush2.bf16.msra.mxu0 %v5552_v55  ;;  %2570 = vmatpush2.bf16.msra.mxu1 %v5555_v18 }
 0x76a   :  { %2530 = vmatprep.subr.bf16.mxu0 %v5558_v52  ;;  %2571 = vmatprep.subr.bf16.mxu1 %v5561_v27  ;;  %v5575_v52 = vld [vmem:[%s5760_s1] sm:$0xff] }
 0x76b   :  { %6474 = vst [vmem:[#allocation63_spill] sm:$0xff] %v5575_v52  ;;  %vm2602_vm7 = vcmp.eq.s32.totalorder %v5575_v52, 6 }
 0x76d   :  { %2531 = vmatpush2.bf16.msra.mxu0 %v5564_v22  ;;  %2572 = vmatpush2.bf16.msra.mxu1 %v5567_v49  ;;  %v2603_v22 = vsel %vm2602_vm7, 1, %v6118_v44 }
 0x76e   :  { %2615 = vmatprep.subr.bf16.mxu0 %v5299_v2  ;;  %3387 = vmatprep.subr.bf16.mxu1 %v6114_v23 }
 0x76f   :  { %2605 = vperm.xlu0 %3440, %v2603_v22  }
 0x7d0   :  { %v2316_v18 = vpop.f32.mrf.mxu0  ;;  %v2357_v55 = vpop.f32.mrf.mxu1 }
 0x7d1   :  { %v2317_v27 = vadd.f32 %v2316_v18, %v6414_v5 }
 0x7d2   :  { %v2318_v21 = vpop.f32.mrf.mxu0  ;;  %v2359_v10 = vpop.f32.mrf.mxu1 }
 0x7d3   :  { %v3109_v49 = vmul.f32 -1.442695, %v2317_v27  ;;  %v2319_v37 = vadd.f32 %v2318_v21, %v6415_v39  ;;  %v2360_v30 = vadd.f32 %v2359_v10, %v6416_v29 }
 0x7d4   :  { %v2320_v2 = vpop.f32.mrf.mxu0  ;;  %v2361_v17 = vpop.f32.mrf.mxu1 }
 0x7d5   :  { %3716 = vpow2.f32 %v3109_v49  ;;  %v3110_v35 = vmul.f32 -1.442695, %v2319_v37  ;;  %v2358_v49 = vadd.f32 %v2357_v55, %v4613_v7 }
 0x7d6   :  { %v2321_v16 = vpop.f32.mrf.mxu0  ;;  %v2362_v40 = vpop.f32.mrf.mxu1 }
 0x7d7   :  { %3718 = vpow2.f32 %v3110_v35  ;;  %v6475_v16 = vld [vmem:[#allocation84_spill] sm:$0xff] }
 0x7e2   :  { %v3717_v34 = vpop.eup %3716 }
 0x7e3   :  { %v2367_v33 = vadd.f32 1.0, %v3717_v34 }
 0x7e4   :  { %v3719_v5 = vpop.eup %3718 }
 0x7e5   :  { %3720 = vrcp.f32 %v2367_v33  ;;  %v2373_v34 = vadd.f32 1.0, %v3719_v5 }
 0x7f0   :  { %v2431_v52 = vpop.f32.mrf.mxu0  ;;  %v2472_v18 = vpop.f32.mrf.mxu1 }
 0x7f1   :  { %v2432_v22 = vadd.f32 %v2431_v52, %v6417_v31  ;;  %v6476_v52 = vld [vmem:[#allocation86_spill] sm:$0xff] }
 0x7f2   :  { %v3721_v27 = vpop.eup %3720  ;;  %v2433_v2 = vpop.f32.mrf.mxu0 }
 0x7f3   :  { %v3385_v17 = vpop.f32.mrf.mxu1  ;;  %v2376_v40 = vmul.f32 %v3721_v27, %v2360_v30  ;;  %v2478_v21 = vadd.f32 %v2432_v22, %v6475_v16  ;;  %v2434_v10 = vadd.f32 %v2433_v2, %v4484_v14  ;;  %v2473_v2 = vadd.f32 %v2472_v18, %v4489_v6  ;;  %v6514_v18 = vld [vmem:[#allocation46_spill] sm:$0xff] }
 0x7f4   :  { %v2435_v37 = vpop.f32.mrf.mxu0 }
 0x7f5   :  { %v2475_v39 = vpop.f32.mrf.mxu1  ;;  %v2377_v35 = vadd.f32 %v2376_v40, %v2358_v49  ;;  %v3111_v33 = vmul.f32 -1.442695, %v2478_v21  ;;  %v2485_v31 = vadd.f32 %v2434_v10, %v6476_v52  ;;  %v6477_v40 = vld [vmem:[#allocation79_spill] sm:$0xff] }
 0x7f6   :  { %v2436_v28 = vpop.f32.mrf.mxu0  ;;  %v6515_v52 = vld [vmem:[#allocation47_spill] sm:$0xff] }
 0x7f7   :  { %v3386_v26 = vpop.f32.mrf.mxu1  ;;  %3722 = vtanh.f32 %v2377_v35  ;;  %v3112_v17 = vmul.f32 -1.442695, %v2485_v31 }
 0x7f8   :  { %3724 = vpow2.f32 %v3111_v33 }
 0x7f9   :  { %3726 = vrcp.f32 %v2373_v34 }
 0x7fa   :  { %3728 = vpow2.f32 %v3112_v17  ;;  %v6516_v17 = vld [vmem:[#allocation48_spill] sm:$0xff] }
 0x804   :  { %v3723_v29 = vpop.eup %3722 }
 0x805   :  { %v3725_v55 = vpop.eup %3724  ;;  %v2379_v30 = vsub.f32 %v5314_v32, %v3723_v29 }
 0x806   :  { %v3727_v22 = vpop.eup %3726  ;;  %v2482_v27 = vadd.f32 1.0, %v3725_v55  ;;  %v6517_v55 = vld [vmem:[#allocation49_spill] sm:$0xff] }
 0x807   :  { %v2380_v5 = vmul.f32 %v3727_v22, %v2379_v30  ;;  %v3729_v28 = vpop.eup %3728  ;;  %v6518_v30 = vld [vmem:[#allocation50_spill] sm:$0xff]  ;;  %v6519_v22 = vld [vmem:[#allocation51_spill] sm:$0xff] }
 0x808   :  { %3730 = vrcp.f32 %v2482_v27  ;;  %v2489_v21 = vadd.f32 1.0, %v3729_v28  ;;  %v6520_v27 = vld [vmem:[#allocation52_spill] sm:$0xff]  ;;  %v6523_v28 = vld [vmem:[#allocation55_spill] sm:$0xff] }
 0x809   :  { %v5588_v39 = vadd.f32 %v3723_v29, %v2380_v5  ;;  %v6521_v5 = vld [vmem:[#allocation53_spill] sm:$0xff] }
 0x80b   :  { %v2499_v26 = vpack.c.bf16 %v5588_v39, %v5588_v39 }
 0x80d   :  { %2532 = vmatprep.mubr.bf16.mxu0 %v2499_v26  ;;  %2573 = vmatprep.mubr.bf16.mxu1 %v2499_v26  ;;  %v6522_v26 = vld [vmem:[#allocation54_spill] sm:$0xff] }
 0x815   :  { %v3731_v31 = vpop.eup %3730 }
 0x816   :  { %v2492_v49 = vmul.f32 %v3731_v31, %v2473_v2  ;;  %v6524_v2 = vld [vmem:[#allocation56_spill] sm:$0xff]  ;;  %v6525_v31 = vld [vmem:[#allocation57_spill] sm:$0xff] }
 0x818   :  { %v2493_v16 = vadd.f32 %v2492_v49, %v6477_v40  ;;  %v6526_v49 = vld [vmem:[#allocation58_spill] sm:$0xff]  ;;  %v6527_v40 = vld [vmem:[#allocation59_spill] sm:$0xff] }
 0x81a   :  { %3732 = vtanh.f32 %v2493_v16  ;;  %v6528_v16 = vld [vmem:[#allocation60_spill] sm:$0xff] }
 0x81b   :  { %3734 = vrcp.f32 %v2489_v21  ;;  %v6529_v21 = vld [vmem:[#allocation61_spill] sm:$0xff] }
 0x827   :  { %v3733_v37 = vpop.eup %3732 }
 0x828   :  { %v2495_v34 = vsub.f32 %v5321_v8, %v3733_v37  ;;  %v3735_v29 = vpop.eup %3734  ;;  %v6492_v8 = vld [vmem:[#allocation19_spill] sm:$0xff] }
 0x82a   :  { %v2496_v35 = vmul.f32 %v3735_v29, %v2495_v34  ;;  %v6531_v34 = vld [vmem:[#allocation63_spill] sm:$0xff] }
 0x82b   :  { %vm2820_vm8 = vcmp.eq.s32.totalorder %v6531_v34, 7 }
 0x82c   :  { %v5595_v33 = vadd.f32 %v3733_v37, %v2496_v35  ;;  %v6530_v37 = vld [vmem:[#allocation62_spill] sm:$0xff]  ;;  %v2821_v29 = vsel %vm2820_vm8, 1, %v6118_v44 }
 0x82d   :  { %2823 = vperm.xlu1 %3441, %v2821_v29  }
 0x82e   :  { %v2498_v10 = vpack.c.bf16 %v5595_v33, %v5595_v33 }
 0x830   :  { %2533 = vmatmul.mubr.bf16.vlgmr.msra.gmra.mxu0 %v2498_v10  ;;  %2574 = vmatmul.mubr.bf16.vlgmr.msra.gmra.mxu1 %v2498_v10 }
 0x831   :  { %2616 = vmatpush1.bf16.msra.mxu0 %v5176_v50  ;;  %3388 = vmatpush3.bf16.msra.mxu1 %v5179_v63  ;;  %v6479_v50 = vld [vmem:[#allocation21_spill] sm:$0xff]  ;;  %v6480_v63 = vld [vmem:[#allocation22_spill] sm:$0xff] }
 0x832   :  { %2617 = vmatprep.subr.bf16.mxu0 %v5182_v58  ;;  %3389 = vmatprep.subr.bf16.mxu1 %v6114_v23  ;;  %v6481_v58 = vld [vmem:[#allocation23_spill] sm:$0xff] }
 0x833   :  { %2647 = vmatprep.mubr.bf16.mxu0 %v6118_v44  ;;  %3403 = vmatprep.mubr.msk.bf16.mxu1 %vm4025_vm0, %v6114_v23 }
 0x835   :  { %2618 = vmatpush1.bf16.msra.mxu0 %v5189_v47  ;;  %3390 = vmatpush3.bf16.msra.mxu1 %v5192_v57  ;;  %v6482_v47 = vld [vmem:[#allocation24_spill] sm:$0xff]  ;;  %v6483_v57 = vld [vmem:[#allocation25_spill] sm:$0xff] }
 0x836   :  { %2619 = vmatprep.subr.bf16.mxu0 %v5195_v56  ;;  %3391 = vmatprep.subr.bf16.mxu1 %v6114_v23  ;;  %v6484_v56 = vld [vmem:[#allocation14_spill] sm:$0xff] }
 0x839   :  { %2620 = vmatpush1.bf16.msra.mxu0 %v5199_v54  ;;  %3392 = vmatpush3.bf16.msra.mxu1 %v5337_v46  ;;  %v6485_v54 = vld [vmem:[#allocation66_spill] sm:$0xff]  ;;  %v6493_v46 = vld [vmem:[#allocation76_spill] sm:$0xff] }
 0x83a   :  { %2621 = vmatprep.subr.bf16.mxu0 %v5203_v1  ;;  %3393 = vmatprep.subr.bf16.mxu1 %v6114_v23  ;;  %v6486_v1 = vld [vmem:[#allocation65_spill] sm:$0xff] }
 0x83d   :  { %2622 = vmatpush1.bf16.msra.mxu0 %v5207_v48  ;;  %3394 = vmatpush3.bf16.msra.mxu1 %v5343_v36  ;;  %v6487_v48 = vld [vmem:[#allocation68_spill] sm:$0xff]  ;;  %v6494_v36 = vld [vmem:[#allocation78_spill] sm:$0xff] }
 0x83e   :  { %2623 = vmatprep.subr.bf16.mxu0 %v5211_v3  ;;  %3395 = vmatprep.subr.bf16.mxu1 %v6114_v23  ;;  %v6488_v3 = vld [vmem:[#allocation69_spill] sm:$0xff] }
 0x841   :  { %2624 = vmatpush1.bf16.msra.mxu0 %v5215_v59  ;;  %3396 = vmatpush3.bf16.msra.mxu1 %v5349_v24  ;;  %v6489_v59 = vld [vmem:[#allocation77_spill] sm:$0xff] }
 0x842   :  { %2625 = vmatprep.subr.bf16.mxu0 %v5219_v9  ;;  %3397 = vmatprep.subr.bf16.mxu1 %v6114_v23  ;;  %v6490_v9 = vld [vmem:[#allocation26_spill] sm:$0xff]  ;;  %v6495_v24 = vld [vmem:[#allocation81_spill] sm:$0xff] }
 0x845   :  { %2626 = vmatpush1.bf16.msra.mxu0 %v5223_v45  ;;  %3398 = vmatpush3.bf16.msra.mxu1 %v5355_v19  ;;  %v6491_v45 = vld [vmem:[#allocation27_spill] sm:$0xff]  ;;  %v6496_v19 = vld [vmem:[#allocation28_spill] sm:$0xff] }
 0x846   :  { %2627 = vmatprep.subr.bf16.mxu0 %v5358_v38  ;;  %3399 = vmatprep.subr.bf16.mxu1 %v6114_v23  ;;  %v6497_v38 = vld [vmem:[#allocation29_spill] sm:$0xff] }
 0x849   :  { %2628 = vmatpush1.bf16.msra.mxu0 %v5362_v12  ;;  %3400 = vmatpush3.bf16.msra.mxu1 %v5365_v41  ;;  %v6498_v12 = vld [vmem:[#allocation30_spill] sm:$0xff]  ;;  %v6499_v41 = vld [vmem:[#allocation31_spill] sm:$0xff] }
 0x84a   :  { %2629 = vmatprep.subr.bf16.mxu0 %v5368_v43  ;;  %3401 = vmatprep.subr.bf16.mxu1 %v6114_v23  ;;  %v6478_v23 = vld [vmem:[#allocation75_spill] sm:$0xff]  ;;  %v6500_v43 = vld [vmem:[#allocation32_spill] sm:$0xff] }
 0x84d   :  { %2630 = vmatpush1.bf16.msra.mxu0 %v5372_v42  ;;  %3402 = vmatpush3.bf16.msra.mxu1 %v5375_v15  ;;  %v6501_v42 = vld [vmem:[#allocation33_spill] sm:$0xff]  ;;  %v6502_v15 = vld [vmem:[#allocation34_spill] sm:$0xff] }
 0x84e   :  { %2718 = vmatprep.subr.bf16.mxu0 %v5378_v60  ;;  %2759 = vmatprep.subr.bf16.mxu1 %v5381_v4  ;;  %v6503_v60 = vld [vmem:[#allocation35_spill] sm:$0xff]  ;;  %v6504_v4 = vld [vmem:[#allocation36_spill] sm:$0xff] }
 0x850   :  { %2648 = vmatmul.mubr.bf16.vlgmr.msra.gmra.mxu0 %v2498_v10  ;;  %3404 = vmatmul.mubr.bf16.vlgmr.msra.gmra.mxu1 %v2498_v10 }
 0x851   :  { %2719 = vmatpush1.bf16.msra.mxu0 %v5384_v20  ;;  %2760 = vmatpush1.bf16.msra.mxu1 %v5387_v51  ;;  %v6505_v20 = vld [vmem:[#allocation37_spill] sm:$0xff]  ;;  %v6506_v51 = vld [vmem:[#allocation38_spill] sm:$0xff] }
 0x852   :  { %2720 = vmatprep.subr.bf16.mxu0 %v5390_v13  ;;  %2761 = vmatprep.subr.bf16.mxu1 %v5393_v11  ;;  %v6507_v13 = vld [vmem:[#allocation39_spill] sm:$0xff]  ;;  %v6508_v11 = vld [vmem:[#allocation40_spill] sm:$0xff] }
 0x855   :  { %2721 = vmatpush1.bf16.msra.mxu0 %v5396_v0  ;;  %2762 = vmatpush1.bf16.msra.mxu1 %v5399_v62  ;;  %v6509_v0 = vld [vmem:[#allocation41_spill] sm:$0xff]  ;;  %v6510_v62 = vld [vmem:[#allocation42_spill] sm:$0xff] }
 0x856   :  { %2722 = vmatprep.subr.bf16.mxu0 %v5402_v61  ;;  %2763 = vmatprep.subr.bf16.mxu1 %v5405_v53  ;;  %v6511_v61 = vld [vmem:[#allocation43_spill] sm:$0xff]  ;;  %v6512_v53 = vld [vmem:[#allocation44_spill] sm:$0xff] }
 0x859   :  { %2723 = vmatpush1.bf16.msra.mxu0 %v5408_v25  ;;  %2764 = vmatpush1.bf16.msra.mxu1 %v6478_v23  ;;  %v6513_v25 = vld [vmem:[#allocation45_spill] sm:$0xff]  ;;  %v6532_v23 = vld [vmem:[#allocation15_spill] sm:$0xff] }
 0x85a   :  { %2724 = vmatprep.subr.bf16.mxu0 %v6479_v50  ;;  %2765 = vmatprep.subr.bf16.mxu1 %v6480_v63 }
 0x85d   :  { %2725 = vmatpush1.bf16.msra.mxu0 %v6481_v58  ;;  %2766 = vmatpush1.bf16.msra.mxu1 %v6482_v47 }
 0x85e   :  { %2726 = vmatprep.subr.bf16.mxu0 %v6483_v57  ;;  %2767 = vmatprep.subr.bf16.mxu1 %v6484_v56 }
 0x861   :  { %2727 = vmatpush1.bf16.msra.mxu0 %v6485_v54  ;;  %2768 = vmatpush1.bf16.msra.mxu1 %v6486_v1 }
 0x862   :  { %2728 = vmatprep.subr.bf16.mxu0 %v6487_v48  ;;  %2769 = vmatprep.subr.bf16.mxu1 %v6488_v3  ;;  %v6533_v48 = vld [vmem:[#allocation16_spill] sm:$0xff] }
 0x865   :  { %2729 = vmatpush1.bf16.msra.mxu0 %v6489_v59  ;;  %2770 = vmatpush1.bf16.msra.mxu1 %v6490_v9 }
 0x866   :  { %2730 = vmatprep.subr.bf16.mxu0 %v6491_v45  ;;  %2771 = vmatprep.subr.bf16.mxu1 %v6492_v8 }
 0x869   :  { %2731 = vmatpush1.bf16.msra.mxu0 %v6493_v46  ;;  %2772 = vmatpush1.bf16.msra.mxu1 %v6494_v36  ;;  %v6534_v36 = vld [vmem:[#allocation17_spill] sm:$0xff] }
 0x86a   :  { %2732 = vmatprep.subr.bf16.mxu0 %v6495_v24  ;;  %2773 = vmatprep.subr.bf16.mxu1 %v6496_v19  ;;  %v6535_v19 = vld [vmem:[#allocation88_spill] sm:$0xff] }
 0x86d   :  { %2733 = vmatpush1.bf16.msra.mxu0 %v6497_v38  ;;  %2774 = vmatpush1.bf16.msra.mxu1 %v6498_v12 }
 0x86e   :  { %2734 = vmatprep.subr.bf16.mxu0 %v6499_v41  ;;  %2775 = vmatprep.subr.bf16.mxu1 %v6500_v43 }
 0x871   :  { %2735 = vmatpush2.bf16.msra.mxu0 %v6501_v42  ;;  %2776 = vmatpush2.bf16.msra.mxu1 %v6502_v15 }
 0x872   :  { %2736 = vmatprep.subr.bf16.mxu0 %v6503_v60  ;;  %2777 = vmatprep.subr.bf16.mxu1 %v6504_v4  ;;  %v6536_v60 = vld [vmem:[#allocation87_spill] sm:$0xff] }
 0x875   :  { %2737 = vmatpush2.bf16.msra.mxu0 %v6505_v20  ;;  %2778 = vmatpush2.bf16.msra.mxu1 %v6506_v51 }
 0x876   :  { %2738 = vmatprep.subr.bf16.mxu0 %v6507_v13  ;;  %2779 = vmatprep.subr.bf16.mxu1 %v6508_v11 }
 0x879   :  { %2739 = vmatpush2.bf16.msra.mxu0 %v6509_v0  ;;  %2780 = vmatpush2.bf16.msra.mxu1 %v6510_v62 }
 0x87a   :  { %2740 = vmatprep.subr.bf16.mxu0 %v6511_v61  ;;  %2781 = vmatprep.subr.bf16.mxu1 %v6512_v53 }
 0x87d   :  { %2741 = vmatpush2.bf16.msra.mxu0 %v6513_v25  ;;  %2782 = vmatpush2.bf16.msra.mxu1 %v6514_v18  ;;  %v6537_v25 = vld [vmem:[#allocation89_spill] sm:$0xff] }
 0x87e   :  { %2742 = vmatprep.subr.bf16.mxu0 %v6515_v52  ;;  %2783 = vmatprep.subr.bf16.mxu1 %v6516_v17 }
 0x881   :  { %2743 = vmatpush2.bf16.msra.mxu0 %v6517_v55  ;;  %2784 = vmatpush2.bf16.msra.mxu1 %v6518_v30 }
 0x882   :  { %2744 = vmatprep.subr.bf16.mxu0 %v6519_v22  ;;  %2785 = vmatprep.subr.bf16.mxu1 %v6520_v27 }
 0x885   :  { %2745 = vmatpush2.bf16.msra.mxu0 %v6521_v5  ;;  %2786 = vmatpush2.bf16.msra.mxu1 %v6522_v26 }
 0x886   :  { %2746 = vmatprep.subr.bf16.mxu0 %v6523_v28  ;;  %2787 = vmatprep.subr.bf16.mxu1 %v6524_v2 }
 0x889   :  { %2747 = vmatpush2.bf16.msra.mxu0 %v6525_v31  ;;  %2788 = vmatpush2.bf16.msra.mxu1 %v6526_v49 }
 0x88a   :  { %2748 = vmatprep.subr.bf16.mxu0 %v6527_v40  ;;  %2789 = vmatprep.subr.bf16.mxu1 %v6528_v16  ;;  %v6538_v40 = vld [vmem:[#allocation83_spill] sm:$0xff] }
 0x88d   :  { %2749 = vmatpush2.bf16.msra.mxu0 %v6529_v21  ;;  %2790 = vmatpush2.bf16.msra.mxu1 %v6530_v37 }
 0x8f0   :  { %v2534_v35 = vpop.f32.mrf.mxu0  ;;  %v2575_v10 = vpop.f32.mrf.mxu1 }
 0x8f1   :  { %v2535_v50 = vadd.f32 %v2534_v35, %v6532_v23  ;;  %v2576_v42 = vadd.f32 %v2575_v10, %v4613_v7 }
 0x8f2   :  { %v2536_v63 = vpop.f32.mrf.mxu0  ;;  %v2577_v58 = vpop.f32.mrf.mxu1 }
 0x8f3   :  { %v3113_v47 = vmul.f32 -1.442695, %v2535_v50  ;;  %v2537_v3 = vadd.f32 %v2536_v63, %v6533_v48  ;;  %v2578_v24 = vadd.f32 %v2577_v58, %v6534_v36 }
 0x8f4   :  { %v2538_v57 = vpop.f32.mrf.mxu0  ;;  %v2579_v56 = vpop.f32.mrf.mxu1 }
 0x8f5   :  { %3736 = vpow2.f32 %v3113_v47  ;;  %v3114_v59 = vmul.f32 -1.442695, %v2537_v3 }
 0x8f6   :  { %v2539_v54 = vpop.f32.mrf.mxu0  ;;  %v2580_v1 = vpop.f32.mrf.mxu1 }
 0x8f7   :  { %3738 = vpow2.f32 %v3114_v59 }
 0x902   :  { %v3737_v9 = vpop.eup %3736 }
 0x903   :  { %v2585_v45 = vadd.f32 1.0, %v3737_v9 }
 0x904   :  { %v3739_v46 = vpop.eup %3738 }
 0x905   :  { %3740 = vrcp.f32 %v2585_v45  ;;  %v2591_v13 = vadd.f32 1.0, %v3739_v46 }
 0x910   :  { %v2649_v44 = vpop.f32.mrf.mxu0  ;;  %v2690_v8 = vpop.f32.mrf.mxu1 }
 0x911   :  { %v2650_v38 = vadd.f32 %v2649_v44, %v6535_v19  ;;  %v2691_v2 = vadd.f32 %v2690_v8, %v4489_v6 }
 0x912   :  { %v3741_v12 = vpop.eup %3740  ;;  %v2651_v41 = vpop.f32.mrf.mxu0 }
 0x913   :  { %v3405_v43 = vpop.f32.mrf.mxu1  ;;  %v2594_v15 = vmul.f32 %v3741_v12, %v2578_v24  ;;  %v2696_v4 = vadd.f32 %v2650_v38, %v6536_v60  ;;  %v2652_v53 = vadd.f32 %v2651_v41, %v4484_v14  ;;  %v1298_v41 = vpop.permute.xlu0 %1297 }
 0x914   :  { %v2653_v20 = vpop.f32.mrf.mxu0  ;;  %v1734_v43 = vpop.permute.xlu1 %1733  ;;  %vm1299_vm9 = vcmp.eq.s32.totalorder %v1298_v41, 1 }
 0x915   :  { %v2693_v51 = vpop.f32.mrf.mxu1  ;;  %v2595_v11 = vadd.f32 %v2594_v15, %v2576_v42  ;;  %v3115_v0 = vmul.f32 -1.442695, %v2696_v4  ;;  %v2703_v18 = vadd.f32 %v2652_v53, %v6537_v25  ;;  %vm1735_vm11 = vcmp.eq.s32.totalorder %v1734_v43, 1  ;;  %v6539_v20 = vld [vmem:[#allocation18_spill] sm:$0xff] }
 0x916   :  { %v2654_v62 = vpop.f32.mrf.mxu0  ;;  %v6542_v53 = vld [vmem:[#allocation74_spill] sm:$0xff] }
 0x917   :  { %v3406_v61 = vpop.f32.mrf.mxu1  ;;  %3742 = vtanh.f32 %v2595_v11  ;;  %v3116_v52 = vmul.f32 -1.442695, %v2703_v18  ;;  %v1516_v42 = vpop.permute.xlu0 %1515  ;;  %v6541_v62 = vld [vmem:[#allocation73_spill] sm:$0xff] }
 0x918   :  { %3744 = vpow2.f32 %v3115_v0  ;;  %vm1517_vm10 = vcmp.eq.s32.totalorder %v1516_v42, 1 }
 0x919   :  { %3746 = vrcp.f32 %v2591_v13 }
 0x91a   :  { %3748 = vpow2.f32 %v3116_v52 }
 0x91b   :  { %v2170_v15 = vpop.permute.xlu0 %2169 }
 0x91c   :  { %vm2171_vm13 = vcmp.eq.s32.totalorder %v2170_v15, 1 }
 0x91f   :  { %v2606_v51 = vpop.permute.xlu0 %2605 }
 0x920   :  { %vm2607_vm15 = vcmp.eq.s32.totalorder %v2606_v51, 1 }
 0x924   :  { %v3743_v17 = vpop.eup %3742 }
 0x925   :  { %v3745_v55 = vpop.eup %3744  ;;  %v2597_v30 = vsub.f32 %v5588_v39, %v3743_v17 }
 0x926   :  { %v3747_v22 = vpop.eup %3746  ;;  %v2700_v27 = vadd.f32 1.0, %v3745_v55 }
 0x927   :  { %v2598_v5 = vmul.f32 %v3747_v22, %v2597_v30  ;;  %v3749_v14 = vpop.eup %3748 }
 0x928   :  { %3750 = vrcp.f32 %v2700_v27  ;;  %v2707_v21 = vadd.f32 1.0, %v3749_v14 }
 0x929   :  { %v5707_v26 = vadd.f32 %v3743_v17, %v2598_v5 }
 0x92b   :  { %v2717_v28 = vpack.c.bf16 %v5707_v26, %v5707_v26 }
 0x92d   :  { %2750 = vmatprep.mubr.bf16.mxu0 %v2717_v28  ;;  %2791 = vmatprep.mubr.bf16.mxu1 %v2717_v28 }
 0x935   :  { %v3751_v31 = vpop.eup %3750 }
 0x936   :  { %v2710_v49 = vmul.f32 %v3751_v31, %v2691_v2 }
 0x938   :  { %v2711_v16 = vadd.f32 %v2710_v49, %v6538_v40 }
 0x93a   :  { %3752 = vtanh.f32 %v2711_v16 }
 0x93b   :  { %3754 = vrcp.f32 %v2707_v21 }
 0x947   :  { %v3753_v37 = vpop.eup %3752 }
 0x948   :  { %v2713_v34 = vsub.f32 %v5595_v33, %v3753_v37  ;;  %v3755_v29 = vpop.eup %3754 }
 0x94a   :  { %v2714_v35 = vmul.f32 %v3755_v29, %v2713_v34 }
 0x94c   :  { %v2715_v10 = vadd.f32 %v3753_v37, %v2714_v35 }
 0x94e   :  { %v2716_v50 = vpack.c.bf16 %v2715_v10, %v2715_v10 }
 0x950   :  { %2751 = vmatmul.mubr.bf16.vlgmr.msra.gmra.mxu0 %v2716_v50  ;;  %2792 = vmatmul.mubr.bf16.vlgmr.msra.gmra.mxu1 %v2716_v50 }
 0xa10   :  { %v2752_v63 = vpop.f32.mrf.mxu0  ;;  %v2793_v58 = vpop.f32.mrf.mxu1 }
 0xa11   :  { %v2753_v6 = vadd.f32 %v2752_v63, %v6532_v23  ;;  %v2794_v23 = vadd.f32 %v2793_v58, %v4613_v7  ;;  %v6540_v7 = vld [vmem:[#allocation20_spill] sm:$0xff] }
 0xa12   :  { %v2754_v47 = vpop.f32.mrf.mxu0  ;;  %v2795_v57 = vpop.f32.mrf.mxu1 }
 0xa13   :  { %v3117_v56 = vmul.f32 -1.442695, %v2753_v6  ;;  %v2755_v33 = vadd.f32 %v2754_v47, %v6533_v48  ;;  %v2796_v46 = vadd.f32 %v2795_v57, %v6534_v36  ;;  %v1952_v48 = vpop.permute.xlu1 %1951  ;;  %v1300_v36 = vsel %vm1299_vm9, %v6539_v20, 0.0 }
 0xa14   :  { %v2756_v54 = vpop.f32.mrf.mxu0  ;;  %v2797_v1 = vpop.f32.mrf.mxu1  ;;  %vm1953_vm12 = vcmp.eq.s32.totalorder %v1952_v48, 1  ;;  %v1518_v13 = vsel %vm1517_vm10, %v6540_v7, %v1300_v36 }
 0xa15   :  { %3756 = vpow2.f32 %v3117_v56  ;;  %v3118_v9 = vmul.f32 -1.442695, %v2755_v33  ;;  %v1736_v61 = vsel %vm1735_vm11, %v6541_v62, %v1518_v13 }
 0xa16   :  { %v2757_v3 = vpop.f32.mrf.mxu0  ;;  %v2798_v59 = vpop.f32.mrf.mxu1  ;;  %v1954_v25 = vsel %vm1953_vm12, %v6542_v53, %v1736_v61 }
 0xa17   :  { %3758 = vpow2.f32 %v3118_v9  ;;  %v2388_v60 = vpop.permute.xlu1 %2387  ;;  %v2172_v17 = vsel %vm2171_vm13, %v5314_v32, %v1954_v25 }
 0xa18   :  { %vm2389_vm14 = vcmp.eq.s32.totalorder %v2388_v60, 1 }
 0xa19   :  { %v2390_v55 = vsel %vm2389_vm14, %v5588_v39, %v2172_v17 }
 0xa1a   :  { %v2608_v22 = vsel %vm2607_vm15, %v5707_v26, %v2390_v55 }
 0xa1b   :  { %v2824_v18 = vpop.permute.xlu1 %2823 }
 0xa1c   :  { %vm2825_vm0 = vcmp.eq.s32.totalorder %v2824_v18, 1 }
 0xa22   :  { %v3757_v45 = vpop.eup %3756 }
 0xa23   :  { %v2803_v44 = vadd.f32 1.0, %v3757_v45 }
 0xa24   :  { %v3759_v8 = vpop.eup %3758 }
 0xa25   :  { %3760 = vrcp.f32 %v2803_v44  ;;  %v2809_v38 = vadd.f32 1.0, %v3759_v8 }
 0xa32   :  { %v3761_v24 = vpop.eup %3760 }
 0xa33   :  { %v2812_v19 = vmul.f32 %v3761_v24, %v2796_v46 }
 0xa35   :  { %v2813_v12 = vadd.f32 %v2812_v19, %v2794_v23 }
 0xa37   :  { %3762 = vtanh.f32 %v2813_v12 }
 0xa38   :  { %3764 = vrcp.f32 %v2809_v38 }
 0xa44   :  { %v3763_v4 = vpop.eup %3762 }
 0xa45   :  { %v2815_v11 = vsub.f32 %v5707_v26, %v3763_v4  ;;  %v3765_v0 = vpop.eup %3764 }
 0xa47   :  { %v2816_v52 = vmul.f32 %v3765_v0, %v2815_v11  ;;  %2833 = sbr.rel (%p3120_p4) target bundleno = 2868 (0xb34), region = 65 }
 0xa49   :  { %v2817_v30 = vadd.f32 %v3763_v4, %v2816_v52 }
 0xa4b   :  { %v2826_v27 = vsel %vm2825_vm0, %v2817_v30, %v2608_v22 }
 0xa4c   :  { %v3944_v5 = vld [vmem:[%s5768_s9 + $0x38] sm:$0xff]   ;;  %v4027_v28 = vmov 0.0   ;;  %v3945_v32 = vld [vmem:[%s5768_s9 + $0x30] sm:$0xff]   ;;  %vm4028_vm1 = vmmov 0   ;;  %v3946_v39 = vld [vmem:[%s5768_s9 + $0x28] sm:$0xff]   ;;  %v2834_v40 = vpack.c.bf16 %v2826_v27, %v2826_v27 }
 0xa4d   :  { %3407 = vmatprep.subr.bf16.mxu0 %v4027_v28  ;;  %3423 = vmatprep.mubr.msk.bf16.mxu0 %vm4028_vm1, %v4027_v28  ;;  %v3947_v26 = vld [vmem:[%s5768_s9 + $0x20] sm:$0xff]   ;;  %v3948_v14 = vld [vmem:[%s5768_s9 + $0x18] sm:$0xff]   ;;  %v3949_v2 = vld [vmem:[%s5768_s9 + $0x10] sm:$0xff]  }
 0xa4e   :  { %3408 = vmatpush3.bf16.msra.mxu0 %v3944_v5  ;;  %v3950_v31 = vld [vmem:[%s5768_s9 + $0x8] sm:$0xff]   ;;  %v3951_v49 = vld [vmem:[%s5768_s9] sm:$0xff]  }
 0xa4f   :  { %3409 = vmatprep.subr.bf16.mxu0 %v4027_v28  ;;  %v3121_v16 = vld [vmem:[%s5769_s10] ss:$0 sm:$0xff] }
 0xa52   :  { %3410 = vmatpush3.bf16.msra.mxu0 %v3945_v32 }
 0xa53   :  { %3411 = vmatprep.subr.bf16.mxu0 %v4027_v28 }
 0xa56   :  { %3412 = vmatpush3.bf16.msra.mxu0 %v3946_v39 }
 0xa57   :  { %3413 = vmatprep.subr.bf16.mxu0 %v4027_v28 }
 0xa5a   :  { %3414 = vmatpush3.bf16.msra.mxu0 %v3947_v26 }
 0xa5b   :  { %3415 = vmatprep.subr.bf16.mxu0 %v4027_v28 }
 0xa5e   :  { %3416 = vmatpush3.bf16.msra.mxu0 %v3948_v14 }
 0xa5f   :  { %3417 = vmatprep.subr.bf16.mxu0 %v4027_v28 }
 0xa62   :  { %3418 = vmatpush3.bf16.msra.mxu0 %v3949_v2 }
 0xa63   :  { %3419 = vmatprep.subr.bf16.mxu0 %v4027_v28 }
 0xa66   :  { %3420 = vmatpush3.bf16.msra.mxu0 %v3950_v31 }
 0xa67   :  { %3421 = vmatprep.subr.bf16.mxu0 %v4027_v28 }
 0xa6a   :  { %3422 = vmatpush3.bf16.msra.mxu0 %v3951_v49 }
 0xa6d   :  { %3424 = vmatmul.mubr.bf16.vlgmr.msra.gmra.mxu0 %v2834_v40 }
 0xb2d   :  { %v2940_v21 = vpop.f32.mrf.mxu0 }
 0xb2e   :  { %v2941_v37 = vadd.f32 %v3121_v16, %v2940_v21 }
 0xb2f   :  { %v3425_v34 = vpop.f32.mrf.mxu0 }
 0xb30   :  { %2946 = vst [vmem:[%s5770_s11] sm:$0xff] %v2941_v37 }
 0xb31   :  { %v2943_v29 = vpop.f32.mrf.mxu0 }
 0xb33   :  { %v3426_v35 = vpop.f32.mrf.mxu0 }
 0xb34 PF:  { %2951 = vsyncpa [#allocation8], 1 }
 0xb35   :  { %2952 = vsyncpa [#allocation10], 1 }

</bundles_post_ra>
